<compile_context>
chip_gen: v7x
topology: tpu7x:2x2x1
jax: 0.10.0
libtpu: 0.0.40
codegen_flags: <defaults>
</compile_context>

<pallas_src>
import functools
import math

import jax
import jax.numpy as jnp
from jax.experimental import pallas as pl
from jax.experimental.pallas import tpu as pltpu


CHN_MID = 32
_K_IN = 8              # 5 real feature channels + bias row + 2 zero rows = 8 sublanes
_LEAKY_SLOPE = 0.2
_MAX_TILE_M = 32768    # lane tile of pixels (amortizes per-step overhead)


def _round_up(x, n):
    return ((x + n - 1) // n) * n


# ----------------------------------------------------------------------------
# Fused kernel: feature build + conv1x1(+bias fold) + LeakyReLU + conv1x1 +
#               LeakyReLU + conv1x1 + sigmoid
# ----------------------------------------------------------------------------
def _dist2logit_kernel(d0_ref, d1_ref, w1_ref, w2_ref, b2_ref, w3_ref, b3_ref,
                       o_ref, *, eps):
    d0 = d0_ref[...]                               # (1, TM)
    d1 = d1_ref[...]                               # (1, TM)
    ones = jnp.ones_like(d0)
    zero = jnp.zeros_like(d0)

    # 5-channel judge feature, padded to 8 sublanes.  Row 5 is a constant 1.0:
    # w1's column 5 holds b1, so the layer-1 bias is accumulated by the MXU.
    feat = jnp.concatenate(
        [d0, d1, d0 - d1, d0 / (d1 + eps), d1 / (d0 + eps),
         ones, zero, zero], axis=0)                # (8, TM)

    # layer 1: (32, 8) @ (8, TM)   (bias folded into the matmul)
    h = jnp.dot(w1_ref[...], feat, preferred_element_type=jnp.float32)
    h = jnp.maximum(h, _LEAKY_SLOPE * h)           # LeakyReLU(0.2)

    # layer 2: (32, 32) @ (32, TM)
    h = jnp.dot(w2_ref[...], h, preferred_element_type=jnp.float32)
    h = h + b2_ref[...]                            # (32, TM)
    h = jnp.maximum(h, _LEAKY_SLOPE * h)

    # layer 3: (1, 32) @ (32, TM) on the MXU (the MXU/vex slot has slack; the
    # previous VPU multiply + sublane reduce landed on the saturated VALU/XLU).
    logit = jnp.dot(w3_ref[...], h, preferred_element_type=jnp.float32)
    logit = logit + b3_ref[...]                    # (1, TM)

    o_ref[...] = 1.0 / (1.0 + jnp.exp(-logit))     # sigmoid (exp -> EUP slot)


# ----------------------------------------------------------------------------
# Wrapper
# ----------------------------------------------------------------------------
def dist2logit_forward(params, d0, d1, eps=0.1):
    """d0, d1: (B, 1, H, W) float32 distance maps.  Returns (B, 1, H, W)."""
    b, c, h, w = d0.shape
    assert c == 1 and d1.shape == d0.shape
    m = b * h * w
    chn_mid = params["w2"].shape[0]

    # Pack layer-1 bias into w1's 6th column (feature row 5 is a constant 1.0);
    # remaining padded columns are zero.  Tiny (32, 8) op, negligible cost.
    w1p = jnp.concatenate(
        [params["w1"], params["b1"][:, None],
         jnp.zeros((chn_mid, _K_IN - 6), jnp.float32)], axis=1)   # (32, 8)
    b2 = params["b2"].reshape(chn_mid, 1)                         # (32, 1)
    w3 = params["w3"].reshape(1, chn_mid)                         # (1, 32)
    b3 = params["b3"].reshape(1, 1)                               # (1, 1)

    # No HBM-side pad/slice copies: flat (1, m) views in, (1, m) out; the grid
    # tiles the pixel axis and Pallas masks the partial final block.
    d0_rows = d0.reshape(1, m)
    d1_rows = d1.reshape(1, m)

    m128 = _round_up(m, 128)
    tile = min(_MAX_TILE_M, m128)
    if m128 > 128:
        # Keep >= 2 grid steps so both of v7x's TensorCores get work.
        tile = min(tile, _round_up(pl.cdiv(m128, 2), 128))
    grid = (pl.cdiv(m, tile),)

    row_spec = pl.BlockSpec((1, tile), lambda i: (0, i))

    def const_spec(shape):                        # whole array, fetched once
        return pl.BlockSpec(shape, lambda i: (0, 0))

    out = pl.pallas_call(
        functools.partial(_dist2logit_kernel, eps=eps),
        out_shape=jax.ShapeDtypeStruct((1, m), jnp.float32),
        grid_spec=pltpu.PrefetchScalarGridSpec(
            num_scalar_prefetch=0,
            grid=grid,
            in_specs=[
                row_spec,                          # d0
                row_spec,                          # d1
                const_spec((chn_mid, _K_IN)),      # w1 (bias folded, zero-padded K)
                const_spec((chn_mid, chn_mid)),    # w2
                const_spec((chn_mid, 1)),          # b2
                const_spec((1, chn_mid)),          # w3
                const_spec((1, 1)),                # b3
            ],
            out_specs=row_spec,
        ),
        compiler_params=pltpu.CompilerParams(
            dimension_semantics=("parallel",),
            vmem_limit_bytes=32 * 1024 * 1024),
    )(d0_rows, d1_rows, w1p, params["w2"], b2, w3, b3)

    return out.reshape(b, 1, h, w)


# ----------------------------------------------------------------------------
# Deterministic parameter init (PyTorch Conv2d default: U(-1/sqrt(fan_in), ..))
# ----------------------------------------------------------------------------
def init_params(key, chn_mid=CHN_MID):
    def conv1x1(k, cin, cout):
        kw, kb = jax.random.split(k)
        bound = 1.0 / math.sqrt(cin)
        wgt = jax.random.uniform(kw, (cout, cin), jnp.float32, -bound, bound)
        bia = jax.random.uniform(kb, (cout,), jnp.float32, -bound, bound)
        return wgt, bia

    k1, k2, k3 = jax.random.split(key, 3)
    w1, b1 = conv1x1(k1, 5, chn_mid)
    w2, b2 = conv1x1(k2, chn_mid, chn_mid)
    w3, b3 = conv1x1(k3, chn_mid, 1)
    return {"w1": w1, "b1": b1, "w2": w2, "b2": b2, "w3": w3, "b3": b3}


# ----------------------------------------------------------------------------
# Pure-JAX reference (same math as the PyTorch module) for a correctness check
# ----------------------------------------------------------------------------
def _reference(params, d0, d1, eps=0.1):
    feat = jnp.concatenate(
        [d0, d1, d0 - d1, d0 / (d1 + eps), d1 / (d0 + eps)], axis=1)
    h = jnp.einsum("oc,bchw->bohw", params["w1"], feat) + params["b1"].reshape(1, -1, 1, 1)
    h = jnp.where(h > 0, h, _LEAKY_SLOPE * h)
    h = jnp.einsum("oc,bchw->bohw", params["w2"], h) + params["b2"].reshape(1, -1, 1, 1)
    h = jnp.where(h > 0, h, _LEAKY_SLOPE * h)
    h = jnp.einsum("oc,bchw->bohw", params["w3"], h) + params["b3"].reshape(1, -1, 1, 1)
    return jax.nn.sigmoid(h)


# ----------------------------------------------------------------------------
if __name__ == "__main__":
    key = jax.random.PRNGKey(0)
    kp, k0, k1, k2, k3 = jax.random.split(key, 5)
    params = init_params(kp)

    fwd = jax.jit(lambda p, a, b: dist2logit_forward(p, a, b))

    # Main test: two per-pixel distance maps, as the LPIPS rank-loss judge uses.
    d0 = jax.random.uniform(k0, (2, 1, 64, 64), jnp.float32)
    d1 = jax.random.uniform(k1, (2, 1, 64, 64), jnp.float32)
    out = jax.block_until_ready(fwd(params, d0, d1))

    assert out.shape == (2, 1, 64, 64), out.shape
    assert bool(jnp.isfinite(out).all())
    assert bool((out >= 0.0).all()) and bool((out <= 1.0).all())
    ref = _reference(params, d0, d1)
    err = float(jnp.max(jnp.abs(out - ref)))
    assert bool(jnp.allclose(out, ref, rtol=1e-5, atol=1e-5)), err

    # Odd-shape test: exercises the masked partial final block (no HBM padding).
    e0 = jax.random.uniform(k2, (1, 1, 37, 19), jnp.float32)
    e1 = jax.random.uniform(k3, (1, 1, 37, 19), jnp.float32)
    out2 = jax.block_until_ready(fwd(params, e0, e1))
    ref2 = _reference(params, e0, e1)
    assert out2.shape == (1, 1, 37, 19)
    assert bool(jnp.isfinite(out2).all())
    err2 = float(jnp.max(jnp.abs(out2 - ref2)))
    assert bool(jnp.allclose(out2, ref2, rtol=1e-5, atol=1e-5)), err2

    print("KERNEL_OK")
</pallas_src>

<mosaic_0001>
module attributes {stable_mosaic.version = 11 : i64} {
  func.func @_dist2logit_kernel(%arg0: i32, %arg1: memref<1x4096xf32, #tpu.memory_space<vmem>>, %arg2: memref<1x4096xf32, #tpu.memory_space<vmem>>, %arg3: memref<32x8xf32, #tpu.memory_space<vmem>>, %arg4: memref<32x32xf32, #tpu.memory_space<vmem>>, %arg5: memref<32x1xf32, #tpu.memory_space<vmem>>, %arg6: memref<1x32xf32, #tpu.memory_space<vmem>>, %arg7: memref<1x1xf32, #tpu.memory_space<vmem>>, %arg8: memref<1x4096xf32, #tpu.memory_space<vmem>>) attributes {dimension_semantics = [#tpu.dimension_semantics<parallel>], iteration_bounds = array<i64: 2>, scalar_prefetch = 0 : i64, scratch_operands = 0 : i64, tpu.core_type = #tpu.core_type<tc>, window_params = [{transform_indices = @transform_0, window_bounds = array<i64: 1, 4096>}, {transform_indices = @transform_1, window_bounds = array<i64: 1, 4096>}, {pipeline_mode = #tpu.pipeline_mode<synchronous>, transform_indices = @transform_2, window_bounds = array<i64: 32, 8>}, {pipeline_mode = #tpu.pipeline_mode<synchronous>, transform_indices = @transform_3, window_bounds = array<i64: 32, 32>}, {pipeline_mode = #tpu.pipeline_mode<synchronous>, transform_indices = @transform_4, window_bounds = array<i64: 32, 1>}, {pipeline_mode = #tpu.pipeline_mode<synchronous>, transform_indices = @transform_5, window_bounds = array<i64: 1, 32>}, {pipeline_mode = #tpu.pipeline_mode<synchronous>, transform_indices = @transform_6, window_bounds = array<i64: 1, 1>}, {transform_indices = @transform_7, window_bounds = array<i64: 1, 4096>}]} {
    %c0 = arith.constant 0 : index
    %c0_0 = arith.constant 0 : index
    %0 = vector.load %arg1[%c0, %c0_0] : memref<1x4096xf32, #tpu.memory_space<vmem>>, vector<1x4096xf32>
    %c0_1 = arith.constant 0 : index
    %c0_2 = arith.constant 0 : index
    %1 = vector.load %arg2[%c0_1, %c0_2] : memref<1x4096xf32, #tpu.memory_space<vmem>>, vector<1x4096xf32>
    %cst = arith.constant 1.000000e+00 : f32
    %2 = vector.broadcast %cst : f32 to vector<1x4096xf32>
    %cst_3 = arith.constant 0.000000e+00 : f32
    %3 = vector.broadcast %cst_3 : f32 to vector<1x4096xf32>
    %4 = arith.subf %0, %1 : vector<1x4096xf32>
    %cst_4 = arith.constant 1.000000e-01 : f32
    %5 = vector.broadcast %cst_4 : f32 to vector<1x4096xf32>
    %6 = arith.addf %1, %5 : vector<1x4096xf32>
    %7 = arith.divf %0, %6 : vector<1x4096xf32>
    %cst_5 = arith.constant 1.000000e-01 : f32
    %8 = vector.broadcast %cst_5 : f32 to vector<1x4096xf32>
    %9 = arith.addf %0, %8 : vector<1x4096xf32>
    %10 = arith.divf %1, %9 : vector<1x4096xf32>
    %11 = tpu.concatenate %0, %1, %4, %7, %10, %2, %3, %3 in 0 : vector<1x4096xf32>, vector<1x4096xf32>, vector<1x4096xf32>, vector<1x4096xf32>, vector<1x4096xf32>, vector<1x4096xf32>, vector<1x4096xf32>, vector<1x4096xf32> -> vector<8x4096xf32>
    %c0_6 = arith.constant 0 : index
    %c0_7 = arith.constant 0 : index
    %12 = vector.load %arg3[%c0_6, %c0_7] : memref<32x8xf32, #tpu.memory_space<vmem>>, vector<32x8xf32>
    %cst_8 = arith.constant dense<0.000000e+00> : vector<32x4096xf32>
    %13 = tpu.matmul %12, %11, %cst_8 {dimension_numbers = #tpu.dot_dimension_numbers<[1], [0], [0], [1], [0, 0, 1, 1], [], []>} : vector<32x8xf32>, vector<8x4096xf32>, vector<32x4096xf32> -> vector<32x4096xf32>
    %cst_9 = arith.constant 2.000000e-01 : f32
    %14 = vector.broadcast %cst_9 : f32 to vector<32x4096xf32>
    %15 = arith.mulf %14, %13 : vector<32x4096xf32>
    %16 = arith.maximumf %13, %15 : vector<32x4096xf32>
    %c0_10 = arith.constant 0 : index
    %c0_11 = arith.constant 0 : index
    %17 = vector.load %arg4[%c0_10, %c0_11] : memref<32x32xf32, #tpu.memory_space<vmem>>, vector<32x32xf32>
    %cst_12 = arith.constant dense<0.000000e+00> : vector<32x4096xf32>
    %18 = tpu.matmul %17, %16, %cst_12 {dimension_numbers = #tpu.dot_dimension_numbers<[1], [0], [0], [1], [0, 0, 1, 1], [], []>} : vector<32x32xf32>, vector<32x4096xf32>, vector<32x4096xf32> -> vector<32x4096xf32>
    %c0_13 = arith.constant 0 : index
    %c0_14 = arith.constant 0 : index
    %19 = vector.load %arg5[%c0_13, %c0_14] : memref<32x1xf32, #tpu.memory_space<vmem>>, vector<32x1xf32>
    %20 = vector.broadcast %19 : vector<32x1xf32> to vector<32x4096xf32>
    %21 = arith.addf %18, %20 : vector<32x4096xf32>
    %cst_15 = arith.constant 2.000000e-01 : f32
    %22 = vector.broadcast %cst_15 : f32 to vector<32x4096xf32>
    %23 = arith.mulf %22, %21 : vector<32x4096xf32>
    %24 = arith.maximumf %21, %23 : vector<32x4096xf32>
    %c0_16 = arith.constant 0 : index
    %c0_17 = arith.constant 0 : index
    %25 = vector.load %arg6[%c0_16, %c0_17] : memref<1x32xf32, #tpu.memory_space<vmem>>, vector<1x32xf32>
    %cst_18 = arith.constant dense<0.000000e+00> : vector<1x4096xf32>
    %26 = tpu.matmul %25, %24, %cst_18 {dimension_numbers = #tpu.dot_dimension_numbers<[1], [0], [0], [1], [0, 0, 1, 1], [], []>} : vector<1x32xf32>, vector<32x4096xf32>, vector<1x4096xf32> -> vector<1x4096xf32>
    %c0_19 = arith.constant 0 : index
    %c0_20 = arith.constant 0 : index
    %27 = vector.load %arg7[%c0_19, %c0_20] : memref<1x1xf32, #tpu.memory_space<vmem>>, vector<1x1xf32>
    %28 = vector.broadcast %27 : vector<1x1xf32> to vector<1x4096xf32>
    %29 = arith.addf %26, %28 : vector<1x4096xf32>
    %cst_21 = arith.constant 0.000000e+00 : f32
    %30 = vector.broadcast %cst_21 : f32 to vector<1x4096xf32>
    %31 = arith.subf %30, %29 : vector<1x4096xf32>
    %32 = math.exp %31 : vector<1x4096xf32>
    %cst_22 = arith.constant 1.000000e+00 : f32
    %33 = vector.broadcast %cst_22 : f32 to vector<1x4096xf32>
    %34 = arith.addf %33, %32 : vector<1x4096xf32>
    %cst_23 = arith.constant 1.000000e+00 : f32
    %35 = vector.broadcast %cst_23 : f32 to vector<1x4096xf32>
    %36 = arith.divf %35, %34 : vector<1x4096xf32>
    %c0_24 = arith.constant 0 : index
    %c0_25 = arith.constant 0 : index
    %37 = vector.load %arg8[%c0_24, %c0_25] : memref<1x4096xf32, #tpu.memory_space<vmem>>, vector<1x4096xf32>
    tpu.vector_store %arg8[%c0_24, %c0_25], %36 {strides = array<i32>} : memref<1x4096xf32, #tpu.memory_space<vmem>>, vector<1x4096xf32>,
    return
  }
  func.func @transform_0(%arg0: i32) -> (i32, i32) {
    %c0_i32 = arith.constant 0 : i32
    %c0_i32_0 = arith.constant 0 : i32
    return %c0_i32, %arg0 : i32, i32
  }
  func.func @transform_1(%arg0: i32) -> (i32, i32) {
    %c0_i32 = arith.constant 0 : i32
    %c0_i32_0 = arith.constant 0 : i32
    return %c0_i32, %arg0 : i32, i32
  }
  func.func @transform_2(%arg0: i32) -> (i32, i32) {
    %c0_i32 = arith.constant 0 : i32
    %c0_i32_0 = arith.constant 0 : i32
    %c0_i32_1 = arith.constant 0 : i32
    return %c0_i32, %c0_i32_0 : i32, i32
  }
  func.func @transform_3(%arg0: i32) -> (i32, i32) {
    %c0_i32 = arith.constant 0 : i32
    %c0_i32_0 = arith.constant 0 : i32
    %c0_i32_1 = arith.constant 0 : i32
    return %c0_i32, %c0_i32_0 : i32, i32
  }
  func.func @transform_4(%arg0: i32) -> (i32, i32) {
    %c0_i32 = arith.constant 0 : i32
    %c0_i32_0 = arith.constant 0 : i32
    %c0_i32_1 = arith.constant 0 : i32
    return %c0_i32, %c0_i32_0 : i32, i32
  }
  func.func @transform_5(%arg0: i32) -> (i32, i32) {
    %c0_i32 = arith.constant 0 : i32
    %c0_i32_0 = arith.constant 0 : i32
    %c0_i32_1 = arith.constant 0 : i32
    return %c0_i32, %c0_i32_0 : i32, i32
  }
  func.func @transform_6(%arg0: i32) -> (i32, i32) {
    %c0_i32 = arith.constant 0 : i32
    %c0_i32_0 = arith.constant 0 : i32
    %c0_i32_1 = arith.constant 0 : i32
    return %c0_i32, %c0_i32_0 : i32, i32
  }
  func.func @transform_7(%arg0: i32) -> (i32, i32) {
    %c0_i32 = arith.constant 0 : i32
    %c0_i32_0 = arith.constant 0 : i32
    return %c0_i32, %arg0 : i32, i32
  }
}

</mosaic_0001>

<bundles_post_ra>
// kernel: _lambda_.1
= control target key start
LH: loop header
LB: loop body
LE: loop exit
PB: predicated region body
PF: predicated region fallthrough
CT: control target
= control target key end

     0   :  { %s7094_s26 = smov 0   ;;  %s8483_s0 = inlined_call_operand.vmem [shape: f32[1,8192], index: 0, kind: input, shape index: {}]   ;;  %s8484_s1 = inlined_call_operand.vmem [shape: f32[1,8192], index: 1, kind: input, shape index: {}]   ;;  %s8485_s2 = inlined_call_operand.vmem [shape: f32[32,8], index: 2, kind: input, shape index: {}]   ;;  %s8486_s3 = inlined_call_operand.vmem [shape: f32[32,32], index: 3, kind: input, shape index: {}]   ;;  %s8487_s4 = inlined_call_operand.vmem [shape: f32[32,1], index: 4, kind: input, shape index: {}]   ;;  %s8488_s5 = inlined_call_operand.vmem [shape: f32[1,32], index: 5, kind: input, shape index: {}]   ;;  %s8489_s6 = inlined_call_operand.<no memory space> [shape: f32[1,1], index: 6, kind: input, shape index: {}]   ;;  %s8490_s7 = inlined_call_operand.vmem [shape: f32[1,8192], index: 7, kind: output, shape index: {}]  }
   0x1   :  { %v12_v0 = vstv %s8489_s6 }
   0x2   :  { %13 = vst [vmem:[#allocation2] sm:$0x1] %v12_v0 }
   0x3 LB: > { %s6437_s27 = sadd.s32 4294967295, %s7046_s26   ;;  %p6441_p0 = scmp.ge.s32.totalorder %s7046_s26, 1  ;;  %s7046_s26 = sphi %s7094_s26, %s19_s26  }
   0x4   : > { %p249_p1 = scmp.lt.s32.totalorder %s7046_s26, 3 }
   0x6   : > { %p250_p2 = pnand %p6441_p0, %p249_p1 }
   0x7   : > { %s6442_s28 = sshll.u32 (!%p250_p2), %s6437_s27, 5  ;;  %v338_v1 = vlaneseq (!%p250_p2)  ;;  %v7048_v3 = vmov (!%p250_p2), 0.0   ;;  %vm1154_vm0 = vcmask (!%p250_p2), 1040384   ;;  %vm1187_vm1 = vcmask (!%p250_p2), 1041408  }
   0x8   : > { %253 = sbr.rel (%p250_p2) target bundleno = 885 (0x375), region = 48  ;;  %p284_p3 = scmp.lt.s32.totalorder (!%p250_p2), %s6442_s28, 63  ;;  %1466 = vmatprep.mubr.f32.mxu0 (!%p250_p2), %v7048_v3  ;;  %1555 = vmatprep.mubr.f32.mxu1 (!%p250_p2), %v7048_v3  ;;  %vm1220_vm2 = vcmask (!%p250_p2), 1042432   ;;  %vm1253_vm3 = vcmask (!%p250_p2), 1043456   ;;  %vm1286_vm4 = vcmask (!%p250_p2), 1044480   ;;  %vm1319_vm5 = vcmask (!%p250_p2), 1045504  }
   0x9   : > { %v7102_v2 = vshrl.u32 (!%p250_p2), %v338_v1, 7  ;;  %vm1352_vm6 = vcmask (!%p250_p2), 1046528   ;;  %vm1389_vm7 = vcmask (!%p250_p2), 64512   ;;  %vm3110_vm8 = vcmask (!%p250_p2), 261120  }
   0xb   : > { %v7109_v4 = vsub.s32 (!%p250_p2), 1, %v7102_v2  ;;  %v7112_v5 = vsub.s32 (!%p250_p2), 3, %v7102_v2  ;;  %v7127_v6 = vsub.s32 (!%p250_p2), 0, %v7102_v2  ;;  %v7136_v9 = vsub.s32 (!%p250_p2), 2, %v7102_v2 }
   0xc   : > { %v7139_v10 = vsub.s32 (!%p250_p2), 5, %v7102_v2  ;;  %v7142_v11 = vsub.s32 (!%p250_p2), 7, %v7102_v2  ;;  %v7145_v12 = vsub.s32 (!%p250_p2), 4, %v7102_v2  ;;  %v7160_v20 = vsub.s32 (!%p250_p2), 6, %v7102_v2 }
   0xf   : > { %s8492_s28 = smov (!%p284_p3, %s6442_s28), 63 }
  0x10   : > { %s7118_s30 = scalar_lea.vmem %s8483_s0, %s8492_s28  ;;  %s7124_s10 = scalar_lea.vmem %s8484_s1, %s8492_s28 }
  0x11   : > { %v7130_v7 = vld [vmem:[%s7118_s30] sm:$0xff]  ;;  %v7203_v47 = vld [vmem:[%s7118_s30 + $0x8] sm:$0xff]  ;;  %s8440_s25 = scalar_lea.vmem %s8490_s7, %s8492_s28 }
  0x12   : > { %v7133_v8 = vld [vmem:[%s7124_s10] sm:$0xff]  ;;  %v322_v15 = vadd.f32 0.1, %v7130_v7  ;;  %v345_v16 = vrot.slane %v7130_v7, %v7109_v4  ;;  %v353_v18 = vrot.slane %v7130_v7, %v7112_v5  ;;  %v341_v23 = vrot.slane %v7130_v7, %v7127_v6  ;;  %v7206_v48 = vld [vmem:[%s7124_s10 + $0x8] sm:$0xff] }
  0x13   : > { %v306_v13 = vsub.f32 %v7130_v7, %v7133_v8  ;;  %v310_v14 = vadd.f32 0.1, %v7133_v8  ;;  %v509_v17 = vrot.slane %v7133_v8, %v7109_v4  ;;  %v517_v19 = vrot.slane %v7133_v8, %v7112_v5 }
  0x14   : > { %v505_v26 = vrot.slane %v7133_v8, %v7127_v6  ;;  %v349_v30 = vrot.slane %v7130_v7, %v7136_v9  ;;  %v513_v32 = vrot.slane %v7133_v8, %v7136_v9  ;;  %v361_v34 = vrot.slane %v7130_v7, %v7139_v10 }
  0x15   : > { %6892 = vrcp.f32 %v310_v14  ;;  %v673_v21 = vrot.slane %v306_v13, %v7109_v4  ;;  %v681_v22 = vrot.slane %v306_v13, %v7112_v5  ;;  %v1156_v24 = vsel %vm1154_vm0, %v345_v16, %v509_v17 }
  0x16   : > { %6894 = vrcp.f32 %v322_v15  ;;  %v1158_v25 = vsel %vm1154_vm0, %v353_v18, %v517_v19  ;;  %v669_v29 = vrot.slane %v306_v13, %v7127_v6  ;;  %v1155_v31 = vsel %vm1154_vm0, %v341_v23, %v505_v26 }
  0x17   : > { %v7171_v27 = vsel %vm1187_vm1, %v1156_v24, %v673_v21  ;;  %v7174_v28 = vsel %vm1187_vm1, %v1158_v25, %v681_v22  ;;  %v677_v33 = vrot.slane %v306_v13, %v7136_v9  ;;  %v525_v36 = vrot.slane %v7133_v8, %v7139_v10 }
  0x18   : > { %v1188_v35 = vsel %vm1187_vm1, %v1155_v31, %v669_v29  ;;  %v689_v37 = vrot.slane %v306_v13, %v7139_v10  ;;  %v369_v38 = vrot.slane %v7130_v7, %v7142_v11  ;;  %v1157_v39 = vsel %vm1154_vm0, %v349_v30, %v513_v32 }
  0x19   : > { %v533_v40 = vrot.slane %v7133_v8, %v7142_v11  ;;  %v697_v41 = vrot.slane %v306_v13, %v7142_v11  ;;  %v357_v42 = vrot.slane %v7130_v7, %v7145_v12  ;;  %v1190_v43 = vsel %vm1187_vm1, %v1157_v39, %v677_v33 }
  0x1a   : > { %v1160_v44 = vsel %vm1154_vm0, %v361_v34, %v525_v36  ;;  %v521_v45 = vrot.slane %v7133_v8, %v7145_v12  ;;  %v685_v46 = vrot.slane %v306_v13, %v7145_v12  ;;  %v365_v51 = vrot.slane %v7130_v7, %v7160_v20 }
  0x1b   : > { %v7209_v49 = vsel %vm1187_vm1, %v1160_v44, %v689_v37  ;;  %v1162_v50 = vsel %vm1154_vm0, %v369_v38, %v533_v40  ;;  %v529_v52 = vrot.slane %v7133_v8, %v7160_v20  ;;  %v693_v55 = vrot.slane %v306_v13, %v7160_v20 }
  0x1c   : > { %v7217_v53 = vsel %vm1187_vm1, %v1162_v50, %v697_v41  ;;  %v1159_v54 = vsel %vm1154_vm0, %v357_v42, %v521_v45  ;;  %v7223_v56 = vsub.f32 %v7203_v47, %v7206_v48  ;;  %v311_v59 = vadd.f32 0.1, %v7206_v48 }
  0x1d   : > { %v7226_v57 = vsel %vm1187_vm1, %v1159_v54, %v685_v46  ;;  %v1161_v58 = vsel %vm1154_vm0, %v365_v51, %v529_v52  ;;  %v323_v60 = vadd.f32 0.1, %v7203_v47  ;;  %v377_v63 = vrot.slane %v7203_v47, %v7109_v4 }
  0x1e   : > { %v7232_v62 = vsel %vm1187_vm1, %v1161_v58, %v693_v55  ;;  %v541_v0 = vrot.slane %v7206_v48, %v7109_v4  ;;  %v705_v1 = vrot.slane %v7223_v56, %v7109_v4  ;;  %6896 = vrcp.f32 %v311_v59 }
  0x1f   : > { %v6893_v61 = vpop.eup %6892  ;;  %v385_v15 = vrot.slane %v7203_v47, %v7112_v5  ;;  %v549_v16 = vrot.slane %v7206_v48, %v7112_v5  ;;  %6898 = vrcp.f32 %v323_v60  ;;  %v713_v19 = vrot.slane %v7223_v56, %v7112_v5 }
  0x20   : > { %v6895_v13 = vpop.eup %6894  ;;  %v7241_v14 = vmul.f32 %v6893_v61, %v7130_v7  ;;  %v7251_v18 = vsel %vm1154_vm0, %v377_v63, %v541_v0  ;;  %v7325_v61 = vld [vmem:[%s8485_s2 + $0x8] sm:$0xff] }
  0x21   : > { %v7248_v17 = vmul.f32 %v6895_v13, %v7133_v8 }
  0x22   : > { %v837_v7 = vrot.slane %v7241_v14, %v7109_v4  ;;  %v845_v21 = vrot.slane %v7241_v14, %v7112_v5  ;;  %v833_v22 = vrot.slane %v7241_v14, %v7127_v6  ;;  %v841_v8 = vrot.slane %v7241_v14, %v7136_v9 }
  0x23   : > { %v1001_v23 = vrot.slane %v7248_v17, %v7109_v4  ;;  %v1009_v24 = vrot.slane %v7248_v17, %v7112_v5  ;;  %v997_v25 = vrot.slane %v7248_v17, %v7127_v6  ;;  %v1005_v26 = vrot.slane %v7248_v17, %v7136_v9 }
  0x24   : > { %v1222_v29 = vsel %vm1220_vm2, %v7171_v27, %v837_v7  ;;  %v1224_v30 = vsel %vm1220_vm2, %v7174_v28, %v845_v21  ;;  %v1221_v31 = vsel %vm1220_vm2, %v1188_v35, %v833_v22  ;;  %v1223_v32 = vsel %vm1220_vm2, %v1190_v43, %v841_v8  ;;  %v7292_v43 = vld [vmem:[%s8485_s2] sm:$0xff] }
  0x25   : > { %v1255_v33 = vsel %vm1253_vm3, %v1222_v29, %v1001_v23  ;;  %v1257_v34 = vsel %vm1253_vm3, %v1224_v30, %v1009_v24  ;;  %v1254_v36 = vsel %vm1253_vm3, %v1221_v31, %v997_v25  ;;  %v1256_v37 = vsel %vm1253_vm3, %v1223_v32, %v1005_v26  ;;  %v7359_v26 = vld [vmem:[%s8485_s2 + $0x10] sm:$0xff] }
  0x26   : > { %v1288_v38 = vsel %vm1286_vm4, %v1255_v33, 1.0  ;;  %v1290_v39 = vsel %vm1286_vm4, %v1257_v34, 1.0  ;;  %v1287_v27 = vsel %vm1286_vm4, %v1254_v36, 1.0  ;;  %v1289_v28 = vsel %vm1286_vm4, %v1256_v37, 1.0  ;;  %v7376_v32 = vld [vmem:[%s7124_s10 + $0x10] sm:$0xff] }
  0x27   : > { %v1321_v35 = vsel %vm1319_vm5, %v1288_v38, 0.0  ;;  %v1323_v40 = vsel %vm1319_vm5, %v1290_v39, 0.0  ;;  %v1320_v41 = vsel %vm1319_vm5, %v1287_v27, 0.0  ;;  %v1322_v42 = vsel %vm1319_vm5, %v1289_v28, 0.0 }
  0x28   : > { %6445 = vmatprep.subr.msk.mxu0 %vm1352_vm6, %v1321_v35  ;;  %6451 = vmatprep.subr.msk.mxu1 %vm1352_vm6, %v1323_v40  ;;  %v853_v44 = vrot.slane %v7241_v14, %v7139_v10  ;;  %v1017_v45 = vrot.slane %v7248_v17, %v7139_v10  ;;  %v861_v46 = vrot.slane %v7241_v14, %v7142_v11  ;;  %v6897_v54 = vpop.eup %6896  ;;  %v312_v28 = vadd.f32 0.1, %v7376_v32 }
  0x29   : > { %6446 = vmatpush1.msk.msra.mxu0 %vm1352_vm6, %v1320_v41  ;;  %6452 = vmatpush1.msk.msra.mxu1 %vm1352_vm6, %v1322_v42  ;;  %v1025_v50 = vrot.slane %v7248_v17, %v7142_v11  ;;  %v849_v51 = vrot.slane %v7241_v14, %v7145_v12  ;;  %v1013_v52 = vrot.slane %v7248_v17, %v7145_v12  ;;  %v6899_v60 = vpop.eup %6898 }
  0x2a   : > { %6447 = vmatmul.mubr.msk.f32.vlgmr.msra.gmra.mrb[0].mxu0 %vm1389_vm7, %v7292_v43  ;;  %6453 = vmatmul.mubr.msk.f32.vlgmr.msra.gmra.mrb[0].mxu1 %vm1389_vm7, %v7292_v43  ;;  %v1226_v55 = vsel %vm1220_vm2, %v7209_v49, %v853_v44  ;;  %v1228_v58 = vsel %vm1220_vm2, %v7217_v53, %v861_v46  ;;  %v857_v59 = vrot.slane %v7241_v14, %v7160_v20  ;;  %6900 = vrcp.f32 %v312_v28 }
  0x2b   : > { %1472 = vmatprep.mubr.f32.mxu0 %v7048_v3  ;;  %1561 = vmatprep.mubr.f32.mxu1 %v7048_v3  ;;  %v1259_v63 = vsel %vm1253_vm3, %v1226_v55, %v1017_v45  ;;  %v1261_v49 = vsel %vm1253_vm3, %v1228_v58, %v1025_v50  ;;  %v1225_v53 = vsel %vm1220_vm2, %v7226_v57, %v849_v51 }
  0x2c   : > { %v1292_v0 = vsel %vm1286_vm4, %v1259_v63, 1.0  ;;  %v1294_v13 = vsel %vm1286_vm4, %v1261_v49, 1.0  ;;  %v1258_v14 = vsel %vm1253_vm3, %v1225_v53, %v1013_v52  ;;  %v1021_v7 = vrot.slane %v7248_v17, %v7160_v20 }
  0x2d   : > { %v1325_v21 = vsel %vm1319_vm5, %v1292_v0, 0.0  ;;  %v1327_v22 = vsel %vm1319_vm5, %v1294_v13, 0.0  ;;  %v1291_v8 = vsel %vm1286_vm4, %v1258_v14, 1.0  ;;  %v1227_v23 = vsel %vm1220_vm2, %v7232_v62, %v857_v59 }
  0x2e   : > { %6448 = vmatmul.mubr.msk.f32.gmra.mrb[2].mxu0 %vm1389_vm7, %v7325_v61  ;;  %6454 = vmatmul.mubr.msk.f32.gmra.mrb[2].mxu1 %vm1389_vm7, %v7325_v61  ;;  %v1324_v57 = vsel %vm1319_vm5, %v1291_v8, 0.0  ;;  %v1260_v17 = vsel %vm1253_vm3, %v1227_v23, %v1021_v7  ;;  %v7348_v24 = vmul.f32 %v6897_v54, %v7203_v47  ;;  %v7351_v25 = vmul.f32 %v6899_v60, %v7206_v48 }
  0x2f   : > { %6457 = vmatprep.subr.msk.mxu0 %vm1352_vm6, %v1325_v21  ;;  %6463 = vmatprep.subr.msk.mxu1 %vm1352_vm6, %v1327_v22  ;;  %v1293_v62 = vsel %vm1286_vm4, %v1260_v17, 1.0  ;;  %v1197_v29 = vsel %vm1187_vm1, %v7251_v18, %v705_v1  ;;  %v1166_v30 = vsel %vm1154_vm0, %v385_v15, %v549_v16  ;;  %v373_v31 = vrot.slane %v7203_v47, %v7127_v6  ;;  %v7388_v16 = vld [vmem:[%s7118_s30 + $0x10] sm:$0xff] }
  0x30   : > { %6458 = vmatpush1.msk.msra.mxu0 %vm1352_vm6, %v1324_v57  ;;  %v1326_v33 = vsel %vm1319_vm5, %v1293_v62, 0.0  ;;  %1478 = vmatprep.mubr.f32.mxu0 %v7048_v3  ;;  %v869_v1 = vrot.slane %v7348_v24, %v7109_v4  ;;  %v1033_v18 = vrot.slane %v7351_v25, %v7109_v4  ;;  %v877_v15 = vrot.slane %v7348_v24, %v7112_v5 }
  0x31   : > { %6464 = vmatpush1.msk.msra.mxu1 %vm1352_vm6, %v1326_v33  ;;  %1567 = vmatprep.mubr.f32.mxu1 %v7048_v3  ;;  %v1041_v34 = vrot.slane %v7351_v25, %v7112_v5  ;;  %v1199_v36 = vsel %vm1187_vm1, %v1166_v30, %v713_v19  ;;  %v537_v37 = vrot.slane %v7206_v48, %v7127_v6  ;;  %v7414_v19 = vld [vmem:[%s8485_s2 + $0x18] sm:$0xff]  ;;  %v324_v42 = vadd.f32 0.1, %v7388_v16 }
  0x32   : > { %6449 = vmatmul.mubr.msk.f32.gmra.mrb[4].mxu0 %vm1389_vm7, %v7359_v26  ;;  %6455 = vmatmul.mubr.msk.f32.gmra.mrb[4].mxu1 %vm1389_vm7, %v7359_v26  ;;  %v1230_v38 = vsel %vm1220_vm2, %v1197_v29, %v869_v1  ;;  %v1232_v39 = vsel %vm1220_vm2, %v1199_v36, %v877_v15  ;;  %v701_v27 = vrot.slane %v7223_v56, %v7127_v6 }
  0x33   : > { %1484 = vmatprep.mubr.f32.mxu0 %v7048_v3  ;;  %1573 = vmatprep.mubr.f32.mxu1 %v7048_v3  ;;  %v1263_v35 = vsel %vm1253_vm3, %v1230_v38, %v1033_v18  ;;  %v1265_v40 = vsel %vm1253_vm3, %v1232_v39, %v1041_v34  ;;  %v865_v41 = vrot.slane %v7348_v24, %v7127_v6  ;;  %6902 = vrcp.f32 %v324_v42 }
  0x34   : > { %v1296_v44 = vsel %vm1286_vm4, %v1263_v35, 1.0  ;;  %v1298_v45 = vsel %vm1286_vm4, %v1265_v40, 1.0  ;;  %v1029_v46 = vrot.slane %v7351_v25, %v7127_v6  ;;  %v1163_v50 = vsel %vm1154_vm0, %v373_v31, %v537_v37 }
  0x35   : > { %v1329_v51 = vsel %vm1319_vm5, %v1296_v44, 0.0  ;;  %v1331_v52 = vsel %vm1319_vm5, %v1298_v45, 0.0  ;;  %v1196_v54 = vsel %vm1187_vm1, %v1163_v50, %v701_v27  ;;  %v381_v55 = vrot.slane %v7203_v47, %v7136_v9  ;;  %v6901_v45 = vpop.eup %6900 }
  0x36   : > { %6450 = vmatmul.mubr.msk.f32.gmra.mrb[6].mxu0 %vm1389_vm7, %v7414_v19  ;;  %6456 = vmatmul.mubr.msk.f32.gmra.mrb[6].mxu1 %vm1389_vm7, %v7414_v19  ;;  %v1229_v58 = vsel %vm1220_vm2, %v1196_v54, %v865_v41  ;;  %v545_v59 = vrot.slane %v7206_v48, %v7136_v9  ;;  %v709_v60 = vrot.slane %v7223_v56, %v7136_v9 }
  0x37   : > { %1644 = vmatprep.mubr.f32.mxu0 %v7048_v3  ;;  %1733 = vmatprep.mubr.f32.mxu1 %v7048_v3  ;;  %v1262_v63 = vsel %vm1253_vm3, %v1229_v58, %v1029_v46  ;;  %v873_v49 = vrot.slane %v7348_v24, %v7136_v9  ;;  %v1037_v53 = vrot.slane %v7351_v25, %v7136_v9 }
  0x38   : > { %6469 = vmatprep.subr.msk.mxu0 %vm1352_vm6, %v1329_v51  ;;  %6475 = vmatprep.subr.msk.mxu1 %vm1352_vm6, %v1331_v52  ;;  %v1295_v0 = vsel %vm1286_vm4, %v1262_v63, 1.0  ;;  %v1165_v13 = vsel %vm1154_vm0, %v381_v55, %v545_v59  ;;  %v393_v14 = vrot.slane %v7203_v47, %v7139_v10  ;;  %v557_v7 = vrot.slane %v7206_v48, %v7139_v10 }
  0x39   : > { %v1328_v21 = vsel %vm1319_vm5, %v1295_v0, 0.0  ;;  %v1198_v22 = vsel %vm1187_vm1, %v1165_v13, %v709_v60  ;;  %v721_v8 = vrot.slane %v7223_v56, %v7139_v10  ;;  %v885_v23 = vrot.slane %v7348_v24, %v7139_v10 }
  0x3a   : > { %6459 = vmatmul.mubr.msk.f32.vlgmr.msra.gmra.mrb[8].mxu0 %vm1389_vm7, %v7292_v43  ;;  %6465 = vmatmul.mubr.msk.f32.vlgmr.msra.gmra.mrb[8].mxu1 %vm1389_vm7, %v7292_v43  ;;  %v1231_v57 = vsel %vm1220_vm2, %v1198_v22, %v873_v49  ;;  %v1049_v17 = vrot.slane %v7351_v25, %v7139_v10  ;;  %v1168_v62 = vsel %vm1154_vm0, %v393_v14, %v557_v7 }
  0x3b   : > { %1650 = vmatprep.mubr.f32.mxu0 %v7048_v3  ;;  %1739 = vmatprep.mubr.f32.mxu1 %v7048_v3  ;;  %v1264_v29 = vsel %vm1253_vm3, %v1231_v57, %v1037_v53  ;;  %v1201_v30 = vsel %vm1187_vm1, %v1168_v62, %v721_v8  ;;  %v401_v31 = vrot.slane %v7203_v47, %v7142_v11 }
  0x3c   : > { %6470 = vmatpush1.msk.msra.mxu0 %vm1352_vm6, %v1328_v21  ;;  %v1297_v33 = vsel %vm1286_vm4, %v1264_v29, 1.0  ;;  %v1234_v1 = vsel %vm1220_vm2, %v1201_v30, %v885_v23  ;;  %v565_v18 = vrot.slane %v7206_v48, %v7142_v11  ;;  %v729_v15 = vrot.slane %v7223_v56, %v7142_v11 }
  0x3d   : > { %v1330_v34 = vsel %vm1319_vm5, %v1297_v33, 0.0  ;;  %v1267_v36 = vsel %vm1253_vm3, %v1234_v1, %v1049_v17  ;;  %v893_v37 = vrot.slane %v7348_v24, %v7142_v11  ;;  %v1057_v38 = vrot.slane %v7351_v25, %v7142_v11  ;;  %v6903_v52 = vpop.eup %6902 }
  0x3e   : > { %6460 = vmatmul.mubr.msk.f32.gmra.mrb[10].mxu0 %vm1389_vm7, %v7325_v61  ;;  %6466 = vmatmul.mubr.msk.f32.gmra.mrb[10].mxu1 %vm1389_vm7, %v7325_v61  ;;  %v1300_v39 = vsel %vm1286_vm4, %v1267_v36, 1.0  ;;  %v1170_v27 = vsel %vm1154_vm0, %v401_v31, %v565_v18  ;;  %v389_v28 = vrot.slane %v7203_v47, %v7145_v12  ;;  %v553_v35 = vrot.slane %v7206_v48, %v7145_v12  ;;  %v7575_v18 = vld [vmem:[%s7118_s30 + $0x18] sm:$0xff] }
  0x3f   : > { %6476 = vmatpush1.msk.msra.mxu1 %vm1352_vm6, %v1330_v34  ;;  %1656 = vmatprep.mubr.f32.mxu0 %v7048_v3  ;;  %v1333_v40 = vsel %vm1319_vm5, %v1300_v39, 0.0  ;;  %v1203_v41 = vsel %vm1187_vm1, %v1170_v27, %v729_v15  ;;  %v717_v42 = vrot.slane %v7223_v56, %v7145_v12  ;;  %v881_v44 = vrot.slane %v7348_v24, %v7145_v12 }
  0x40   : > { %1745 = vmatprep.mubr.f32.mxu1 %v7048_v3  ;;  %6481 = vmatprep.subr.msk.mxu0 %vm1352_vm6, %v1333_v40  ;;  %v1236_v46 = vsel %vm1220_vm2, %v1203_v41, %v893_v37  ;;  %v1045_v50 = vrot.slane %v7351_v25, %v7145_v12  ;;  %v1167_v51 = vsel %vm1154_vm0, %v389_v28, %v553_v35 }
  0x41   : > { %v1269_v54 = vsel %vm1253_vm3, %v1236_v46, %v1057_v38  ;;  %v1200_v55 = vsel %vm1187_vm1, %v1167_v51, %v717_v42  ;;  %v397_v58 = vrot.slane %v7203_v47, %v7160_v20  ;;  %v561_v59 = vrot.slane %v7206_v48, %v7160_v20  ;;  %v7529_v47 = vld [vmem:[%s7124_s10 + $0x18] sm:$0xff] }
  0x42   : > { %6461 = vmatmul.mubr.msk.f32.gmra.mrb[12].mxu0 %vm1389_vm7, %v7359_v26  ;;  %6467 = vmatmul.mubr.msk.f32.gmra.mrb[12].mxu1 %vm1389_vm7, %v7359_v26  ;;  %v1302_v60 = vsel %vm1286_vm4, %v1269_v54, 1.0  ;;  %v1233_v63 = vsel %vm1220_vm2, %v1200_v55, %v881_v44  ;;  %v725_v49 = vrot.slane %v7223_v56, %v7160_v20  ;;  %v889_v53 = vrot.slane %v7348_v24, %v7160_v20 }
  0x43   : > { %1662 = vmatprep.mubr.f32.mxu0 %v7048_v3  ;;  %1751 = vmatprep.mubr.f32.mxu1 %v7048_v3  ;;  %v1335_v48 = vsel %vm1319_vm5, %v1302_v60, 0.0  ;;  %v1266_v0 = vsel %vm1253_vm3, %v1233_v63, %v1045_v50  ;;  %v1053_v13 = vrot.slane %v7351_v25, %v7160_v20  ;;  %v1169_v14 = vsel %vm1154_vm0, %v397_v58, %v561_v59 }
  0x44   : > { %6487 = vmatprep.subr.msk.mxu1 %vm1352_vm6, %v1335_v48  ;;  %v1299_v56 = vsel %vm1286_vm4, %v1266_v0, 1.0  ;;  %v1202_v24 = vsel %vm1187_vm1, %v1169_v14, %v725_v49  ;;  %v7543_v7 = vsub.f32 %v7388_v16, %v7376_v32  ;;  %v7546_v21 = vmul.f32 %v6901_v45, %v7388_v16 }
  0x45   : > { %v1235_v22 = vsel %vm1220_vm2, %v1202_v24, %v889_v53  ;;  %v7550_v25 = vmul.f32 %v6903_v52, %v7376_v32  ;;  %v409_v8 = vrot.slane %v7388_v16, %v7109_v4  ;;  %v313_v23 = vadd.f32 0.1, %v7529_v47 }
  0x46   : > { %6462 = vmatmul.mubr.msk.f32.gmra.mrb[14].mxu0 %vm1389_vm7, %v7414_v19  ;;  %6468 = vmatmul.mubr.msk.f32.gmra.mrb[14].mxu1 %vm1389_vm7, %v7414_v19  ;;  %v1332_v57 = vsel %vm1319_vm5, %v1299_v56, 0.0  ;;  %v1268_v17 = vsel %vm1253_vm3, %v1235_v22, %v1053_v13  ;;  %v573_v62 = vrot.slane %v7376_v32, %v7109_v4  ;;  %v737_v29 = vrot.slane %v7543_v7, %v7109_v4 }
  0x47   : > { %1822 = vmatprep.mubr.f32.mxu0 %v7048_v3  ;;  %1911 = vmatprep.mubr.f32.mxu1 %v7048_v3  ;;  %v1301_v30 = vsel %vm1286_vm4, %v1268_v17, 1.0  ;;  %v901_v31 = vrot.slane %v7546_v21, %v7109_v4  ;;  %v1065_v33 = vrot.slane %v7550_v25, %v7109_v4  ;;  %v417_v1 = vrot.slane %v7388_v16, %v7112_v5 }
  0x48   : > { %v1334_v15 = vsel %vm1319_vm5, %v1301_v30, 0.0  ;;  %v1172_v34 = vsel %vm1154_vm0, %v409_v8, %v573_v62  ;;  %v581_v36 = vrot.slane %v7376_v32, %v7112_v5  ;;  %v745_v37 = vrot.slane %v7543_v7, %v7112_v5 }
  0x49   : > { %v1205_v38 = vsel %vm1187_vm1, %v1172_v34, %v737_v29  ;;  %v909_v39 = vrot.slane %v7546_v21, %v7112_v5  ;;  %v1073_v27 = vrot.slane %v7550_v25, %v7112_v5  ;;  %v405_v28 = vrot.slane %v7388_v16, %v7127_v6 }
  0x4a   : > { %6471 = vmatmul.mubr.msk.f32.vlgmr.msra.gmra.mrb[16].mxu0 %vm1389_vm7, %v7292_v43  ;;  %6477 = vmatmul.mubr.msk.f32.vlgmr.msra.gmra.mrb[16].mxu1 %vm1389_vm7, %v7292_v43  ;;  %v1238_v35 = vsel %vm1220_vm2, %v1205_v38, %v901_v31  ;;  %v1174_v40 = vsel %vm1154_vm0, %v417_v1, %v581_v36  ;;  %v569_v41 = vrot.slane %v7376_v32, %v7127_v6  ;;  %v325_v42 = vadd.f32 0.1, %v7575_v18 }
  0x4b   : > { %1828 = vmatprep.mubr.f32.mxu0 %v7048_v3  ;;  %1917 = vmatprep.mubr.f32.mxu1 %v7048_v3  ;;  %v1271_v44 = vsel %vm1253_vm3, %v1238_v35, %v1065_v33  ;;  %v1207_v45 = vsel %vm1187_vm1, %v1174_v40, %v745_v37  ;;  %v733_v46 = vrot.slane %v7543_v7, %v7127_v6  ;;  %6904 = vrcp.f32 %v313_v23 }
  0x4c   : > { %6482 = vmatpush1.msk.msra.mxu0 %vm1352_vm6, %v1332_v57  ;;  %6488 = vmatpush1.msk.msra.mxu1 %vm1352_vm6, %v1334_v15  ;;  %v1304_v50 = vsel %vm1286_vm4, %v1271_v44, 1.0  ;;  %v1240_v51 = vsel %vm1220_vm2, %v1207_v45, %v909_v39  ;;  %v897_v52 = vrot.slane %v7546_v21, %v7127_v6  ;;  %v1061_v54 = vrot.slane %v7550_v25, %v7127_v6 }
  0x4d   : > { %v1337_v55 = vsel %vm1319_vm5, %v1304_v50, 0.0  ;;  %v1273_v58 = vsel %vm1253_vm3, %v1240_v51, %v1073_v27  ;;  %v1171_v59 = vsel %vm1154_vm0, %v405_v28, %v569_v41  ;;  %v413_v60 = vrot.slane %v7388_v16, %v7136_v9 }
  0x4e   : > { %6472 = vmatmul.mubr.msk.f32.gmra.mrb[18].mxu0 %vm1389_vm7, %v7325_v61  ;;  %6478 = vmatmul.mubr.msk.f32.gmra.mrb[18].mxu1 %vm1389_vm7, %v7325_v61  ;;  %v1306_v63 = vsel %vm1286_vm4, %v1273_v58, 1.0  ;;  %v1204_v49 = vsel %vm1187_vm1, %v1171_v59, %v733_v46  ;;  %v577_v53 = vrot.slane %v7376_v32, %v7136_v9  ;;  %v741_v48 = vrot.slane %v7543_v7, %v7136_v9 }
  0x4f   : > { %1834 = vmatprep.mubr.f32.mxu0 %v7048_v3  ;;  %1923 = vmatprep.mubr.f32.mxu1 %v7048_v3  ;;  %v1339_v0 = vsel %vm1319_vm5, %v1306_v63, 0.0  ;;  %v1237_v13 = vsel %vm1220_vm2, %v1204_v49, %v897_v52  ;;  %v905_v14 = vrot.slane %v7546_v21, %v7136_v9  ;;  %v1069_v56 = vrot.slane %v7550_v25, %v7136_v9 }
  0x50   : > { %6493 = vmatprep.subr.msk.mxu0 %vm1352_vm6, %v1337_v55  ;;  %6499 = vmatprep.subr.msk.mxu1 %vm1352_vm6, %v1339_v0  ;;  %v1270_v24 = vsel %vm1253_vm3, %v1237_v13, %v1061_v54  ;;  %v1173_v22 = vsel %vm1154_vm0, %v413_v60, %v577_v53  ;;  %v425_v8 = vrot.slane %v7388_v16, %v7139_v10  ;;  %6906 = vrcp.f32 %v325_v42 }
  0x51   : > { %v1206_v23 = vsel %vm1187_vm1, %v1173_v22, %v741_v48  ;;  %v589_v57 = vrot.slane %v7376_v32, %v7139_v10  ;;  %v753_v17 = vrot.slane %v7543_v7, %v7139_v10  ;;  %v1303_v62 = vsel %vm1286_vm4, %v1270_v24, 1.0 }
  0x52   : > { %6473 = vmatmul.mubr.msk.f32.gmra.mrb[20].mxu0 %vm1389_vm7, %v7359_v26  ;;  %6479 = vmatmul.mubr.msk.f32.gmra.mrb[20].mxu1 %vm1389_vm7, %v7359_v26  ;;  %v1239_v29 = vsel %vm1220_vm2, %v1206_v23, %v905_v14  ;;  %v917_v30 = vrot.slane %v7546_v21, %v7139_v10  ;;  %v1081_v31 = vrot.slane %v7550_v25, %v7139_v10  ;;  %v1336_v27 = vsel %vm1319_vm5, %v1303_v62, 0.0 }
  0x53   : > { %1840 = vmatprep.mubr.f32.mxu0 %v7048_v3  ;;  %1929 = vmatprep.mubr.f32.mxu1 %v7048_v3  ;;  %v1272_v33 = vsel %vm1253_vm3, %v1239_v29, %v1069_v56  ;;  %v1176_v1 = vsel %vm1154_vm0, %v425_v8, %v589_v57  ;;  %v433_v15 = vrot.slane %v7388_v16, %v7142_v11 }
  0x54   : > { %v1305_v34 = vsel %vm1286_vm4, %v1272_v33, 1.0  ;;  %v1209_v36 = vsel %vm1187_vm1, %v1176_v1, %v753_v17  ;;  %v597_v37 = vrot.slane %v7376_v32, %v7142_v11  ;;  %v761_v38 = vrot.slane %v7543_v7, %v7142_v11 }
  0x55   : > { %v6905_v39 = vpop.eup %6904  ;;  %v1242_v28 = vsel %vm1220_vm2, %v1209_v36, %v917_v30  ;;  %v925_v35 = vrot.slane %v7546_v21, %v7142_v11  ;;  %v1089_v40 = vrot.slane %v7550_v25, %v7142_v11  ;;  %v1338_v41 = vsel %vm1319_vm5, %v1305_v34, 0.0 }
  0x56   : > { %6474 = vmatmul.mubr.msk.f32.gmra.mrb[22].mxu0 %vm1389_vm7, %v7414_v19  ;;  %6480 = vmatmul.mubr.msk.f32.gmra.mrb[22].mxu1 %vm1389_vm7, %v7414_v19  ;;  %v1275_v42 = vsel %vm1253_vm3, %v1242_v28, %v1081_v31  ;;  %v1178_v44 = vsel %vm1154_vm0, %v433_v15, %v597_v37  ;;  %v421_v45 = vrot.slane %v7388_v16, %v7145_v12 }
  0x57   : > { %2000 = vmatprep.mubr.f32.mxu0 %v7048_v3  ;;  %2089 = vmatprep.mubr.f32.mxu1 %v7048_v3  ;;  %v1308_v46 = vsel %vm1286_vm4, %v1275_v42, 1.0  ;;  %v1211_v50 = vsel %vm1187_vm1, %v1178_v44, %v761_v38  ;;  %v585_v51 = vrot.slane %v7376_v32, %v7145_v12  ;;  %v749_v52 = vrot.slane %v7543_v7, %v7145_v12 }
  0x58   : > { %v1341_v54 = vsel %vm1319_vm5, %v1308_v46, 0.0  ;;  %v1244_v55 = vsel %vm1220_vm2, %v1211_v50, %v925_v35  ;;  %v913_v58 = vrot.slane %v7546_v21, %v7145_v12  ;;  %v1077_v59 = vrot.slane %v7550_v25, %v7145_v12 }
  0x59   : > { %v1277_v60 = vsel %vm1253_vm3, %v1244_v55, %v1089_v40  ;;  %v1175_v63 = vsel %vm1154_vm0, %v421_v45, %v585_v51  ;;  %v429_v49 = vrot.slane %v7388_v16, %v7160_v20  ;;  %v593_v53 = vrot.slane %v7376_v32, %v7160_v20 }
  0x5a   : > { %v6907_v48 = vpop.eup %6906  ;;  %6483 = vmatmul.mubr.msk.f32.vlgmr.msra.gmra.mrb[24].mxu0 %vm1389_vm7, %v7292_v43  ;;  %6489 = vmatmul.mubr.msk.f32.vlgmr.msra.gmra.mrb[24].mxu1 %vm1389_vm7, %v7292_v43  ;;  %v1310_v0 = vsel %vm1286_vm4, %v1277_v60, 1.0  ;;  %v1208_v13 = vsel %vm1187_vm1, %v1175_v63, %v749_v52  ;;  %v757_v14 = vrot.slane %v7543_v7, %v7160_v20  ;;  %v921_v16 = vrot.slane %v7546_v21, %v7160_v20 }
  0x5b   : > { %2006 = vmatprep.mubr.f32.mxu0 %v7048_v3  ;;  %2095 = vmatprep.mubr.f32.mxu1 %v7048_v3  ;;  %v1343_v32 = vsel %vm1319_vm5, %v1310_v0, 0.0  ;;  %v1241_v56 = vsel %vm1220_vm2, %v1208_v13, %v913_v58  ;;  %v1085_v24 = vrot.slane %v7550_v25, %v7160_v20  ;;  %v1177_v22 = vsel %vm1154_vm0, %v429_v49, %v593_v53 }
  0x5c   : > { %6494 = vmatpush1.msk.msra.mxu0 %vm1352_vm6, %v1336_v27  ;;  %6500 = vmatpush1.msk.msra.mxu1 %vm1352_vm6, %v1338_v41  ;;  %v1274_v7 = vsel %vm1253_vm3, %v1241_v56, %v1077_v59  ;;  %v1210_v21 = vsel %vm1187_vm1, %v1177_v22, %v757_v14  ;;  %v7727_v8 = vsub.f32 %v7575_v18, %v7529_v47 }
  0x5d   : > { %6505 = vmatprep.subr.msk.mxu0 %vm1352_vm6, %v1341_v54  ;;  %6511 = vmatprep.subr.msk.mxu1 %vm1352_vm6, %v1343_v32  ;;  %v1243_v25 = vsel %vm1220_vm2, %v1210_v21, %v921_v16  ;;  %v7733_v23 = vmul.f32 %v6905_v39, %v7575_v18  ;;  %v7736_v57 = vmul.f32 %v6907_v48, %v7529_v47  ;;  %v1307_v1 = vsel %vm1286_vm4, %v1274_v7, 1.0 }
  0x5e   : > { %6484 = vmatmul.mubr.msk.f32.gmra.mrb[26].mxu0 %vm1389_vm7, %v7325_v61  ;;  %6490 = vmatmul.mubr.msk.f32.gmra.mrb[26].mxu1 %vm1389_vm7, %v7325_v61  ;;  %v1276_v17 = vsel %vm1253_vm3, %v1243_v25, %v1085_v24  ;;  %v441_v62 = vrot.slane %v7575_v18, %v7109_v4  ;;  %v605_v29 = vrot.slane %v7529_v47, %v7109_v4  ;;  %v1340_v44 = vsel %vm1319_vm5, %v1307_v1, 0.0 }
  0x5f   : > { %2012 = vmatprep.mubr.f32.mxu0 %v7048_v3  ;;  %2101 = vmatprep.mubr.f32.mxu1 %v7048_v3  ;;  %v769_v30 = vrot.slane %v7727_v8, %v7109_v4  ;;  %v933_v31 = vrot.slane %v7733_v23, %v7109_v4  ;;  %v1097_v33 = vrot.slane %v7736_v57, %v7109_v4  ;;  %v1309_v27 = vsel %vm1286_vm4, %v1276_v17, 1.0 }
  0x60   : > { %v1180_v15 = vsel %vm1154_vm0, %v441_v62, %v605_v29  ;;  %v449_v34 = vrot.slane %v7575_v18, %v7112_v5  ;;  %v613_v36 = vrot.slane %v7529_v47, %v7112_v5  ;;  %v777_v38 = vrot.slane %v7727_v8, %v7112_v5 }
  0x61   : > { %v1213_v37 = vsel %vm1187_vm1, %v1180_v15, %v769_v30  ;;  %v941_v39 = vrot.slane %v7733_v23, %v7112_v5  ;;  %v1105_v4 = vrot.slane %v7736_v57, %v7112_v5  ;;  %v437_v40 = vrot.slane %v7575_v18, %v7127_v6 }
  0x62   : > { %6485 = vmatmul.mubr.msk.f32.gmra.mrb[28].mxu0 %vm1389_vm7, %v7359_v26  ;;  %6491 = vmatmul.mubr.msk.f32.gmra.mrb[28].mxu1 %vm1389_vm7, %v7359_v26  ;;  %v1246_v28 = vsel %vm1220_vm2, %v1213_v37, %v933_v31  ;;  %v1182_v35 = vsel %vm1154_vm0, %v449_v34, %v613_v36  ;;  %v601_v42 = vrot.slane %v7529_v47, %v7127_v6  ;;  %v1342_v51 = vsel %vm1319_vm5, %v1309_v27, 0.0 }
  0x63   : > { %2018 = vmatprep.mubr.f32.mxu0 %v7048_v3  ;;  %2107 = vmatprep.mubr.f32.mxu1 %v7048_v3  ;;  %v1279_v5 = vsel %vm1253_vm3, %v1246_v28, %v1097_v33  ;;  %v1215_v41 = vsel %vm1187_vm1, %v1182_v35, %v777_v38  ;;  %v765_v46 = vrot.slane %v7727_v8, %v7127_v6 }
  0x64   : > { %v1248_v45 = vsel %vm1220_vm2, %v1215_v41, %v941_v39  ;;  %v929_v50 = vrot.slane %v7733_v23, %v7127_v6  ;;  %v1093_v54 = vrot.slane %v7736_v57, %v7127_v6  ;;  %v1179_v55 = vsel %vm1154_vm0, %v437_v40, %v601_v42 }
  0x65   : > { %v1281_v52 = vsel %vm1253_vm3, %v1248_v45, %v1105_v4  ;;  %v1312_v58 = vsel %vm1286_vm4, %v1279_v5, 1.0  ;;  %v1212_v59 = vsel %vm1187_vm1, %v1179_v55, %v765_v46  ;;  %v445_v60 = vrot.slane %v7575_v18, %v7136_v9 }
  0x66   : > { %6486 = vmatmul.mubr.msk.f32.gmra.mrb[30].mxu0 %vm1389_vm7, %v7414_v19  ;;  %6492 = vmatmul.mubr.msk.f32.gmra.mrb[30].mxu1 %vm1389_vm7, %v7414_v19  ;;  %v609_v63 = vrot.slane %v7529_v47, %v7136_v9  ;;  %v1314_v49 = vsel %vm1286_vm4, %v1281_v52, 1.0  ;;  %v1245_v53 = vsel %vm1220_vm2, %v1212_v59, %v929_v50  ;;  %v773_v48 = vrot.slane %v7727_v8, %v7136_v9 }
  0x67   : > { %2178 = vmatprep.mubr.f32.mxu0 %v7048_v3  ;;  %2267 = vmatprep.mubr.f32.mxu1 %v7048_v3  ;;  %v937_v0 = vrot.slane %v7733_v23, %v7136_v9  ;;  %v1278_v13 = vsel %vm1253_vm3, %v1245_v53, %v1093_v54  ;;  %v1101_v14 = vrot.slane %v7736_v57, %v7136_v9  ;;  %v1345_v56 = vsel %vm1319_vm5, %v1312_v58, 0.0 }
  0x68   : > { %v1181_v16 = vsel %vm1154_vm0, %v445_v60, %v609_v63  ;;  %v457_v32 = vrot.slane %v7575_v18, %v7139_v10  ;;  %v621_v22 = vrot.slane %v7529_v47, %v7139_v10  ;;  %v785_v7 = vrot.slane %v7727_v8, %v7139_v10 }
  0x69   : > { %v1214_v24 = vsel %vm1187_vm1, %v1181_v16, %v773_v48  ;;  %v1347_v9 = vsel %vm1319_vm5, %v1314_v49, 0.0  ;;  %v949_v25 = vrot.slane %v7733_v23, %v7139_v10  ;;  %v1113_v17 = vrot.slane %v7736_v57, %v7139_v10 }
  0x6a   : > { %6495 = vmatmul.mubr.msk.f32.vlgmr.msra.gmra.mrb[32].mxu0 %vm1389_vm7, %v7292_v43  ;;  %6501 = vmatmul.mubr.msk.f32.vlgmr.msra.gmra.mrb[32].mxu1 %vm1389_vm7, %v7292_v43  ;;  %v1247_v21 = vsel %vm1220_vm2, %v1214_v24, %v937_v0  ;;  %v1184_v29 = vsel %vm1154_vm0, %v457_v32, %v621_v22  ;;  %v465_v30 = vrot.slane %v7575_v18, %v7142_v11  ;;  %v3089_v0 = vld [vmem:[%s8487_s4 + $0x18] sm:$0xff] }
  0x6b   : > { %2184 = vmatprep.mubr.f32.mxu0 %v7048_v3  ;;  %2273 = vmatprep.mubr.f32.mxu1 %v7048_v3  ;;  %v1280_v62 = vsel %vm1253_vm3, %v1247_v21, %v1101_v14  ;;  %v1217_v31 = vsel %vm1187_vm1, %v1184_v29, %v785_v7  ;;  %v629_v10 = vrot.slane %v7529_v47, %v7142_v11 }
  0x6c   : > { %6506 = vmatpush1.msk.msra.mxu0 %vm1352_vm6, %v1340_v44  ;;  %6512 = vmatpush1.msk.msra.mxu1 %vm1352_vm6, %v1342_v51  ;;  %v793_v33 = vrot.slane %v7727_v8, %v7142_v11  ;;  %v1250_v1 = vsel %vm1220_vm2, %v1217_v31, %v949_v25  ;;  %v957_v15 = vrot.slane %v7733_v23, %v7142_v11  ;;  %v1313_v52 = vsel %vm1286_vm4, %v1280_v62, 1.0 }
  0x6d   : > { %6517 = vmatprep.subr.msk.mxu0 %vm1352_vm6, %v1345_v56  ;;  %6523 = vmatprep.subr.msk.mxu1 %vm1352_vm6, %v1347_v9  ;;  %v1121_v34 = vrot.slane %v7736_v57, %v7142_v11  ;;  %v1283_v36 = vsel %vm1253_vm3, %v1250_v1, %v1113_v17  ;;  %v1186_v37 = vsel %vm1154_vm0, %v465_v30, %v629_v10  ;;  %v1346_v58 = vsel %vm1319_vm5, %v1313_v52, 0.0 }
  0x6e   : > { %6496 = vmatmul.mubr.msk.f32.gmra.mrb[34].mxu0 %vm1389_vm7, %v7325_v61  ;;  %6502 = vmatmul.mubr.msk.f32.gmra.mrb[34].mxu1 %vm1389_vm7, %v7325_v61  ;;  %v453_v38 = vrot.slane %v7575_v18, %v7145_v12  ;;  %v1219_v39 = vsel %vm1187_vm1, %v1186_v37, %v793_v33  ;;  %v617_v11 = vrot.slane %v7529_v47, %v7145_v12 }
  0x6f   : > { %2190 = vmatprep.mubr.f32.mxu0 %v7048_v3  ;;  %2279 = vmatprep.mubr.f32.mxu1 %v7048_v3  ;;  %v781_v4 = vrot.slane %v7727_v8, %v7145_v12  ;;  %v1252_v27 = vsel %vm1220_vm2, %v1219_v39, %v957_v15  ;;  %v945_v28 = vrot.slane %v7733_v23, %v7145_v12 }
  0x70   : > { %v1109_v35 = vrot.slane %v7736_v57, %v7145_v12  ;;  %v1285_v40 = vsel %vm1253_vm3, %v1252_v27, %v1121_v34  ;;  %v1183_v5 = vsel %vm1154_vm0, %v453_v38, %v617_v11  ;;  %v461_v41 = vrot.slane %v7575_v18, %v7160_v20 }
  0x71   : > { %v625_v42 = vrot.slane %v7529_v47, %v7160_v20  ;;  %v1216_v44 = vsel %vm1187_vm1, %v1183_v5, %v781_v4  ;;  %v789_v12 = vrot.slane %v7727_v8, %v7160_v20  ;;  %v953_v45 = vrot.slane %v7733_v23, %v7160_v20 }
  0x72   : > { %6497 = vmatmul.mubr.msk.f32.gmra.mrb[36].mxu0 %vm1389_vm7, %v7359_v26  ;;  %6503 = vmatmul.mubr.msk.f32.gmra.mrb[36].mxu1 %vm1389_vm7, %v7359_v26  ;;  %v1249_v47 = vsel %vm1220_vm2, %v1216_v44, %v945_v28  ;;  %v1117_v18 = vrot.slane %v7736_v57, %v7160_v20  ;;  %v1311_v23 = vsel %vm1286_vm4, %v1278_v13, 1.0  ;;  %v1316_v57 = vsel %vm1286_vm4, %v1283_v36, 1.0 }
  0x73   : > { %2196 = vmatprep.mubr.f32.mxu0 %v7048_v3  ;;  %2285 = vmatprep.mubr.f32.mxu1 %v7048_v3  ;;  %v1185_v46 = vsel %vm1154_vm0, %v461_v41, %v625_v42  ;;  %v1282_v50 = vsel %vm1253_vm3, %v1249_v47, %v1109_v35  ;;  %v1318_v54 = vsel %vm1286_vm4, %v1285_v40, 1.0  ;;  %v1344_v55 = vsel %vm1319_vm5, %v1311_v23, 0.0 }
  0x74   : > { %v1218_v51 = vsel %vm1187_vm1, %v1185_v46, %v789_v12  ;;  %v1349_v59 = vsel %vm1319_vm5, %v1316_v57, 0.0  ;;  %v1351_v60 = vsel %vm1319_vm5, %v1318_v54, 0.0  ;;  %v1315_v63 = vsel %vm1286_vm4, %v1282_v50, 1.0 }
  0x75   : > { %v1251_v8 = vsel %vm1220_vm2, %v1218_v51, %v953_v45  ;;  %v1348_v53 = vsel %vm1319_vm5, %v1315_v63, 0.0 }
  0x76   : > { %6498 = vmatmul.mubr.msk.f32.gmra.mrb[38].mxu0 %vm1389_vm7, %v7414_v19  ;;  %6504 = vmatmul.mubr.msk.f32.gmra.mrb[38].mxu1 %vm1389_vm7, %v7414_v19  ;;  %v1284_v20 = vsel %vm1253_vm3, %v1251_v8, %v1117_v18 }
  0x77   : > { %2356 = vmatprep.mubr.f32.mxu0 %v7048_v3  ;;  %2445 = vmatprep.mubr.f32.mxu1 %v7048_v3  ;;  %v1317_v49 = vsel %vm1286_vm4, %v1284_v20, 1.0 }
  0x78   : > { %v1350_v48 = vsel %vm1319_vm5, %v1317_v49, 0.0 }
  0x7a   : > { %6507 = vmatmul.mubr.msk.f32.vlgmr.msra.gmra.mrb[40].mxu0 %vm1389_vm7, %v7292_v43  ;;  %6513 = vmatmul.mubr.msk.f32.vlgmr.msra.gmra.mrb[40].mxu1 %vm1389_vm7, %v7292_v43 }
  0x7b   : > { %2362 = vmatprep.mubr.f32.mxu0 %v7048_v3  ;;  %2451 = vmatprep.mubr.f32.mxu1 %v7048_v3 }
  0x7c   : > { %6518 = vmatpush1.msk.msra.mxu0 %vm1352_vm6, %v1344_v55  ;;  %6524 = vmatpush1.msk.msra.mxu1 %vm1352_vm6, %v1346_v58 }
  0x7d   : > { %6529 = vmatprep.subr.msk.mxu0 %vm1352_vm6, %v1349_v59  ;;  %6535 = vmatprep.subr.msk.mxu1 %vm1352_vm6, %v1351_v60 }
  0x7e   : > { %6508 = vmatmul.mubr.msk.f32.gmra.mrb[42].mxu0 %vm1389_vm7, %v7325_v61  ;;  %6514 = vmatmul.mubr.msk.f32.gmra.mrb[42].mxu1 %vm1389_vm7, %v7325_v61 }
  0x7f   : > { %2368 = vmatprep.mubr.f32.mxu0 %v7048_v3  ;;  %2457 = vmatprep.mubr.f32.mxu1 %v7048_v3 }
  0x82   : > { %6509 = vmatmul.mubr.msk.f32.gmra.mrb[44].mxu0 %vm1389_vm7, %v7359_v26  ;;  %6515 = vmatmul.mubr.msk.f32.gmra.mrb[44].mxu1 %vm1389_vm7, %v7359_v26 }
  0x83   : > { %2374 = vmatprep.mubr.f32.mxu0 %v7048_v3  ;;  %2463 = vmatprep.mubr.f32.mxu1 %v7048_v3 }
  0x86   : > { %6510 = vmatmul.mubr.msk.f32.gmra.mrb[46].mxu0 %vm1389_vm7, %v7414_v19  ;;  %6516 = vmatmul.mubr.msk.f32.gmra.mrb[46].mxu1 %vm1389_vm7, %v7414_v19 }
  0x87   : > { %2534 = vmatprep.mubr.f32.mxu0 %v7048_v3  ;;  %2623 = vmatprep.mubr.f32.mxu1 %v7048_v3 }
  0x8a   : > { %6519 = vmatmul.mubr.msk.f32.vlgmr.msra.gmra.mrb[48].mxu0 %vm1389_vm7, %v7292_v43  ;;  %6525 = vmatmul.mubr.msk.f32.vlgmr.msra.gmra.mrb[48].mxu1 %vm1389_vm7, %v7292_v43 }
  0x8b   : > { %2540 = vmatprep.mubr.f32.mxu0 %v7048_v3  ;;  %2629 = vmatprep.mubr.f32.mxu1 %v7048_v3 }
  0x8c   : > { %6530 = vmatpush1.msk.msra.mxu0 %vm1352_vm6, %v1348_v53  ;;  %6536 = vmatpush1.msk.msra.mxu1 %vm1352_vm6, %v1350_v48 }
  0x8e   : > { %6520 = vmatmul.mubr.msk.f32.gmra.mrb[50].mxu0 %vm1389_vm7, %v7325_v61  ;;  %6526 = vmatmul.mubr.msk.f32.gmra.mrb[50].mxu1 %vm1389_vm7, %v7325_v61 }
  0x8f   : > { %2546 = vmatprep.mubr.f32.mxu0 %v7048_v3  ;;  %2635 = vmatprep.mubr.f32.mxu1 %v7048_v3 }
  0x92   : > { %6521 = vmatmul.mubr.msk.f32.gmra.mrb[52].mxu0 %vm1389_vm7, %v7359_v26  ;;  %6527 = vmatmul.mubr.msk.f32.gmra.mrb[52].mxu1 %vm1389_vm7, %v7359_v26 }
  0x93   : > { %2552 = vmatprep.mubr.f32.mxu0 %v7048_v3  ;;  %2641 = vmatprep.mubr.f32.mxu1 %v7048_v3 }
  0x96   : > { %6522 = vmatmul.mubr.msk.f32.gmra.mrb[54].mxu0 %vm1389_vm7, %v7414_v19  ;;  %6528 = vmatmul.mubr.msk.f32.gmra.mrb[54].mxu1 %vm1389_vm7, %v7414_v19 }
  0x97   : > { %2712 = vmatprep.mubr.f32.mxu0 %v7048_v3  ;;  %2801 = vmatprep.mubr.f32.mxu1 %v7048_v3 }
  0x9a   : > { %6531 = vmatmul.mubr.msk.f32.vlgmr.msra.gmra.mrb[56].mxu0 %vm1389_vm7, %v7292_v43  ;;  %6537 = vmatmul.mubr.msk.f32.vlgmr.msra.gmra.mrb[56].mxu1 %vm1389_vm7, %v7292_v43  ;;  %v7049_v43 = vmov 0  }
  0x9b   : > { %2718 = vmatprep.mubr.f32.mxu0 %v7048_v3  ;;  %2807 = vmatprep.mubr.f32.mxu1 %v7048_v3 }
  0x9c   : > { %6890 = vset.pattern.permute.xlu0 %v7049_v43  ;;  %6891 = vset.pattern.permute.xlu1 %v7049_v43 }
  0x9e   : > { %6532 = vmatmul.mubr.msk.f32.gmra.mrb[58].mxu0 %vm1389_vm7, %v7325_v61  ;;  %6538 = vmatmul.mubr.msk.f32.gmra.mrb[58].mxu1 %vm1389_vm7, %v7325_v61  ;;  %v3086_v61 = vld [vmem:[%s8487_s4] sm:$0xff] }
  0x9f   : > { %2724 = vmatprep.mubr.f32.mxu0 %v7048_v3  ;;  %2813 = vmatprep.mubr.f32.mxu1 %v7048_v3 }
  0xa0   : > { %3092 = vperm.xlu0 %6890, %v3086_v61  }
  0xa2   : > { %6533 = vmatmul.mubr.msk.f32.gmra.mrb[60].mxu0 %vm1389_vm7, %v7359_v26  ;;  %6539 = vmatmul.mubr.msk.f32.gmra.mrb[60].mxu1 %vm1389_vm7, %v7359_v26  ;;  %v3087_v26 = vld [vmem:[%s8487_s4 + $0x8] sm:$0xff] }
  0xa3   : > { %2730 = vmatprep.mubr.f32.mxu0 %v7048_v3  ;;  %2819 = vmatprep.mubr.f32.mxu1 %v7048_v3 }
  0xa4   : > { %3097 = vperm.xlu0 %6890, %v3087_v26  }
  0xa6   : > { %6534 = vmatmul.mubr.msk.f32.gmra.mrb[62].mxu0 %vm1389_vm7, %v7414_v19  ;;  %6540 = vmatmul.mubr.msk.f32.gmra.mrb[62].mxu1 %vm1389_vm7, %v7414_v19  ;;  %v3088_v19 = vld [vmem:[%s8487_s4 + $0x10] sm:$0xff] }
  0xa7   : > { %3187 = vmatprep.mubr.f32.mxu0 %v7048_v3  ;;  %3276 = vmatprep.mubr.f32.mxu1 %v7048_v3 }
  0xa8   : > { %3102 = vperm.xlu1 %6891, %v3088_v19  }
  0xac   : > { %3107 = vperm.xlu1 %6891, %v3089_v0  }
  0xfd   : > { %v1468_v13 = vpop.f32.mrb[0].mxu0  ;;  %v1557_v14 = vpop.f32.mrb[0].mxu1 }
  0xfe   : > { %v1470_v16 = vpop.f32.mrb[1].mxu0  ;;  %v1559_v32 = vpop.f32.mrb[1].mxu1  ;;  %v2826_v56 = vmul.f32 0.2, %v1468_v13  ;;  %v2828_v24 = vmul.f32 0.2, %v1557_v14 }
  0xff   : > { %v2827_v22 = vmul.f32 0.2, %v1470_v16  ;;  %v2829_v7 = vmul.f32 0.2, %v1559_v32 }
 0x100   : > { %v2954_v10 = vmax.f32 %v1468_v13, %v2826_v56  ;;  %v2956_v33 = vmax.f32 %v1557_v14, %v2828_v24  ;;  %v8010_v24 = vld [vmem:[%s8486_s3] sm:$0xff] }
 0x101   : > { %v1474_v9 = vpop.f32.mrb[2].mxu0  ;;  %v1563_v21 = vpop.f32.mrb[2].mxu1  ;;  %v2955_v34 = vmax.f32 %v1470_v16, %v2827_v22  ;;  %v2957_v36 = vmax.f32 %v1559_v32, %v2829_v7 }
 0x102   : > { %v2858_v25 = vmul.f32 0.2, %v1474_v9  ;;  %v2860_v17 = vmul.f32 0.2, %v1563_v21  ;;  %v1476_v62 = vpop.f32.mrb[3].mxu0  ;;  %v1565_v29 = vpop.f32.mrb[3].mxu1 }
 0x103   : > { %v2859_v30 = vmul.f32 0.2, %v1476_v62  ;;  %v2861_v31 = vmul.f32 0.2, %v1565_v29 }
 0x104   : > { %v2986_v1 = vmax.f32 %v1474_v9, %v2858_v25  ;;  %v2988_v15 = vmax.f32 %v1563_v21, %v2860_v17 }
 0x105   : > { %v2987_v37 = vmax.f32 %v1476_v62, %v2859_v30  ;;  %v2989_v38 = vmax.f32 %v1565_v29, %v2861_v31  ;;  %v1480_v39 = vpop.f32.mrb[4].mxu0  ;;  %v1569_v11 = vpop.f32.mrb[4].mxu1  ;;  %v4804_v29 = vld [vmem:[#allocation2] sm:$0x1] }
 0x106   : > { %v6625_v4 = vpack.c.bf16 %v2986_v1, %v2954_v10  ;;  %v6633_v27 = vpack.c.bf16 %v2988_v15, %v2956_v33  ;;  %v1482_v28 = vpop.f32.mrb[5].mxu0  ;;  %v1571_v35 = vpop.f32.mrb[5].mxu1  ;;  %v2890_v41 = vmul.f32 0.2, %v1480_v39  ;;  %v2892_v42 = vmul.f32 0.2, %v1569_v11  ;;  %4807 = vperm.xlu0 %6890, %v4804_v29  }
 0x107   : > { %v6623_v40 = vpack.c.bf16 %v2987_v37, %v2955_v34  ;;  %v6631_v5 = vpack.c.bf16 %v2989_v38, %v2957_v36  ;;  %v2891_v44 = vmul.f32 0.2, %v1482_v28  ;;  %v2893_v12 = vmul.f32 0.2, %v1571_v35 }
 0x108   : > { %v3018_v52 = vmax.f32 %v1480_v39, %v2890_v41  ;;  %v3020_v20 = vmax.f32 %v1569_v11, %v2892_v42 }
 0x109   : > { %v1486_v45 = vpop.f32.mrb[6].mxu0  ;;  %v1575_v47 = vpop.f32.mrb[6].mxu1  ;;  %6624 = vmatprep.subr.bf16.mxu0 %v6623_v40  ;;  %6632 = vmatprep.subr.bf16.mxu1 %v6631_v5  ;;  %v3019_v55 = vmax.f32 %v1482_v28, %v2891_v44  ;;  %v3021_v58 = vmax.f32 %v1571_v35, %v2893_v12 }
 0x10a   : > { %v2922_v18 = vmul.f32 0.2, %v1486_v45  ;;  %v2924_v46 = vmul.f32 0.2, %v1575_v47  ;;  %v1488_v50 = vpop.f32.mrb[7].mxu0  ;;  %v1577_v51 = vpop.f32.mrb[7].mxu1  ;;  %6626 = vmatpush1.bf16.msra.mxu0 %v6625_v4  ;;  %6634 = vmatpush1.bf16.msra.mxu1 %v6633_v27 }
 0x10b   : > { %v2923_v8 = vmul.f32 0.2, %v1488_v50  ;;  %v2925_v23 = vmul.f32 0.2, %v1577_v51  ;;  %v8021_v27 = vld [vmem:[%s8486_s3 + $0x8] sm:$0xff] }
 0x10c   : > { %v3050_v57 = vmax.f32 %v1486_v45, %v2922_v18  ;;  %v3052_v54 = vmax.f32 %v1575_v47, %v2924_v46  ;;  %v8030_v45 = vld [vmem:[%s8486_s3 + $0x10] sm:$0xff] }
 0x10d   : > { %v3051_v59 = vmax.f32 %v1488_v50, %v2923_v8  ;;  %v3053_v60 = vmax.f32 %v1577_v51, %v2925_v23  ;;  %v1646_v63 = vpop.f32.mrb[8].mxu0  ;;  %v1735_v49 = vpop.f32.mrb[8].mxu1 }
 0x10e   : > { %v6629_v53 = vpack.c.bf16 %v3050_v57, %v3018_v52  ;;  %v6637_v48 = vpack.c.bf16 %v3052_v54, %v3020_v20  ;;  %v1648_v43 = vpop.f32.mrb[9].mxu0  ;;  %v1737_v61 = vpop.f32.mrb[9].mxu1  ;;  %v2830_v0 = vmul.f32 0.2, %v1646_v63  ;;  %v2832_v13 = vmul.f32 0.2, %v1735_v49 }
 0x10f   : > { %v6627_v26 = vpack.c.bf16 %v3051_v59, %v3019_v55  ;;  %v6635_v19 = vpack.c.bf16 %v3053_v60, %v3021_v58  ;;  %v2831_v14 = vmul.f32 0.2, %v1648_v43  ;;  %v2833_v16 = vmul.f32 0.2, %v1737_v61 }
 0x110   : > { %v2958_v25 = vmax.f32 %v1646_v63, %v2830_v0  ;;  %v2960_v30 = vmax.f32 %v1735_v49, %v2832_v13 }
 0x111   : > { %v1652_v32 = vpop.f32.mrb[10].mxu0  ;;  %v1741_v56 = vpop.f32.mrb[10].mxu1  ;;  %6628 = vmatprep.subr.bf16.mxu0 %v6627_v26  ;;  %6636 = vmatprep.subr.bf16.mxu1 %v6635_v19  ;;  %v2959_v31 = vmax.f32 %v1648_v43, %v2831_v14  ;;  %v2961_v1 = vmax.f32 %v1737_v61, %v2833_v16  ;;  %v8043_v61 = vld [vmem:[%s8486_s3 + $0x18] sm:$0xff] }
 0x112   : > { %v2862_v22 = vmul.f32 0.2, %v1652_v32  ;;  %v2864_v7 = vmul.f32 0.2, %v1741_v56  ;;  %v1654_v9 = vpop.f32.mrb[11].mxu0  ;;  %v1743_v21 = vpop.f32.mrb[11].mxu1  ;;  %6630 = vmatpush1.bf16.msra.mxu0 %v6629_v53  ;;  %6638 = vmatpush1.bf16.msra.mxu1 %v6637_v48 }
 0x113   : > { %v2863_v17 = vmul.f32 0.2, %v1654_v9  ;;  %v2865_v62 = vmul.f32 0.2, %v1743_v21 }
 0x114   : > { %v2990_v10 = vmax.f32 %v1652_v32, %v2862_v22  ;;  %v2992_v33 = vmax.f32 %v1741_v56, %v2864_v7 }
 0x115   : > { %v2991_v15 = vmax.f32 %v1654_v9, %v2863_v17  ;;  %v2993_v34 = vmax.f32 %v1743_v21, %v2865_v62  ;;  %v1658_v36 = vpop.f32.mrb[12].mxu0  ;;  %v1747_v37 = vpop.f32.mrb[12].mxu1  ;;  %6541 = vmatmul.mubr.msk.f32.vlgmr.msra.gmra.mrb[64].mxu0 %vm3110_vm8, %v8010_v24  ;;  %6545 = vmatmul.mubr.msk.f32.vlgmr.msra.gmra.mrb[64].mxu1 %vm3110_vm8, %v8010_v24 }
 0x116   : > { %v6641_v38 = vpack.c.bf16 %v2990_v10, %v2958_v25  ;;  %v6649_v39 = vpack.c.bf16 %v2992_v33, %v2960_v30  ;;  %v1660_v11 = vpop.f32.mrb[13].mxu0  ;;  %v1749_v4 = vpop.f32.mrb[13].mxu1  ;;  %3193 = vmatprep.mubr.f32.mxu0 %v7048_v3  ;;  %3282 = vmatprep.mubr.f32.mxu1 %v7048_v3  ;;  %v2894_v40 = vmul.f32 0.2, %v1658_v36  ;;  %v2896_v5 = vmul.f32 0.2, %v1747_v37 }
 0x117   : > { %v6639_v28 = vpack.c.bf16 %v2991_v15, %v2959_v31  ;;  %v6647_v35 = vpack.c.bf16 %v2993_v34, %v2961_v1  ;;  %v2895_v41 = vmul.f32 0.2, %v1660_v11  ;;  %v2897_v42 = vmul.f32 0.2, %v1749_v4 }
 0x118   : > { %v3022_v51 = vmax.f32 %v1658_v36, %v2894_v40  ;;  %v3024_v8 = vmax.f32 %v1747_v37, %v2896_v5 }
 0x119   : > { %v1664_v44 = vpop.f32.mrb[14].mxu0  ;;  %v1753_v12 = vpop.f32.mrb[14].mxu1  ;;  %6542 = vmatmul.mubr.msk.f32.gmra.mrb[66].mxu0 %vm3110_vm8, %v8021_v27  ;;  %6546 = vmatmul.mubr.msk.f32.gmra.mrb[66].mxu1 %vm3110_vm8, %v8021_v27  ;;  %v3023_v20 = vmax.f32 %v1660_v11, %v2895_v41  ;;  %v3025_v55 = vmax.f32 %v1749_v4, %v2897_v42 }
 0x11a   : > { %v2926_v47 = vmul.f32 0.2, %v1664_v44  ;;  %v2928_v18 = vmul.f32 0.2, %v1753_v12  ;;  %6640 = vmatprep.subr.bf16.mxu0 %v6639_v28  ;;  %6648 = vmatprep.subr.bf16.mxu1 %v6647_v35  ;;  %v1666_v46 = vpop.f32.mrb[15].mxu0  ;;  %v1755_v50 = vpop.f32.mrb[15].mxu1 }
 0x11b   : > { %v2927_v23 = vmul.f32 0.2, %v1666_v46  ;;  %v2929_v52 = vmul.f32 0.2, %v1755_v50  ;;  %6642 = vmatpush1.bf16.msra.mxu0 %v6641_v38  ;;  %6650 = vmatpush1.bf16.msra.mxu1 %v6649_v39 }
 0x11c   : > { %v3054_v57 = vmax.f32 %v1664_v44, %v2926_v47  ;;  %v3056_v54 = vmax.f32 %v1753_v12, %v2928_v18  ;;  %3199 = vmatprep.mubr.f32.mxu0 %v7048_v3  ;;  %3288 = vmatprep.mubr.f32.mxu1 %v7048_v3 }
 0x11d   : > { %v3055_v58 = vmax.f32 %v1666_v46, %v2927_v23  ;;  %v3057_v59 = vmax.f32 %v1755_v50, %v2929_v52  ;;  %v1824_v60 = vpop.f32.mrb[16].mxu0  ;;  %v1913_v63 = vpop.f32.mrb[16].mxu1  ;;  %6543 = vmatmul.mubr.msk.f32.gmra.mrb[68].mxu0 %vm3110_vm8, %v8030_v45  ;;  %6547 = vmatmul.mubr.msk.f32.gmra.mrb[68].mxu1 %vm3110_vm8, %v8030_v45 }
 0x11e   : > { %v6645_v49 = vpack.c.bf16 %v3054_v57, %v3022_v51  ;;  %v6653_v53 = vpack.c.bf16 %v3056_v54, %v3024_v8  ;;  %v1826_v48 = vpop.f32.mrb[17].mxu0  ;;  %v1915_v43 = vpop.f32.mrb[17].mxu1  ;;  %3205 = vmatprep.mubr.f32.mxu0 %v7048_v3  ;;  %3294 = vmatprep.mubr.f32.mxu1 %v7048_v3  ;;  %v2834_v0 = vmul.f32 0.2, %v1824_v60  ;;  %v2836_v13 = vmul.f32 0.2, %v1913_v63 }
 0x11f   : > { %v6643_v26 = vpack.c.bf16 %v3055_v58, %v3023_v20  ;;  %v6651_v19 = vpack.c.bf16 %v3057_v59, %v3025_v55  ;;  %v2835_v14 = vmul.f32 0.2, %v1826_v48  ;;  %v2837_v16 = vmul.f32 0.2, %v1915_v43 }
 0x120   : > { %v2962_v25 = vmax.f32 %v1824_v60, %v2834_v0  ;;  %v2964_v29 = vmax.f32 %v1913_v63, %v2836_v13 }
 0x121   : > { %v1830_v32 = vpop.f32.mrb[18].mxu0  ;;  %v1919_v56 = vpop.f32.mrb[18].mxu1  ;;  %6544 = vmatmul.mubr.msk.f32.gmra.mrb[70].mxu0 %vm3110_vm8, %v8043_v61  ;;  %6548 = vmatmul.mubr.msk.f32.gmra.mrb[70].mxu1 %vm3110_vm8, %v8043_v61  ;;  %v2963_v10 = vmax.f32 %v1826_v48, %v2835_v14  ;;  %v2965_v33 = vmax.f32 %v1915_v43, %v2837_v16 }
 0x122   : > { %v2866_v22 = vmul.f32 0.2, %v1830_v32  ;;  %v2868_v7 = vmul.f32 0.2, %v1919_v56  ;;  %6644 = vmatprep.subr.bf16.mxu0 %v6643_v26  ;;  %6652 = vmatprep.subr.bf16.mxu1 %v6651_v19  ;;  %v1832_v9 = vpop.f32.mrb[19].mxu0  ;;  %v1921_v21 = vpop.f32.mrb[19].mxu1 }
 0x123   : > { %v2867_v17 = vmul.f32 0.2, %v1832_v9  ;;  %v2869_v62 = vmul.f32 0.2, %v1921_v21  ;;  %6646 = vmatpush1.bf16.msra.mxu0 %v6645_v49  ;;  %6654 = vmatpush1.bf16.msra.mxu1 %v6653_v53 }
 0x124   : > { %v2994_v30 = vmax.f32 %v1830_v32, %v2866_v22  ;;  %v2996_v31 = vmax.f32 %v1919_v56, %v2868_v7  ;;  %3365 = vmatprep.mubr.f32.mxu0 %v7048_v3  ;;  %3454 = vmatprep.mubr.f32.mxu1 %v7048_v3 }
 0x125   : > { %v2995_v1 = vmax.f32 %v1832_v9, %v2867_v17  ;;  %v2997_v15 = vmax.f32 %v1921_v21, %v2869_v62  ;;  %v1836_v34 = vpop.f32.mrb[20].mxu0  ;;  %v1925_v36 = vpop.f32.mrb[20].mxu1 }
 0x126   : > { %v6657_v37 = vpack.c.bf16 %v2994_v30, %v2962_v25  ;;  %v6665_v38 = vpack.c.bf16 %v2996_v31, %v2964_v29  ;;  %6549 = vmatmul.mubr.msk.f32.vlgmr.msra.gmra.mrb[72].mxu0 %vm3110_vm8, %v8010_v24  ;;  %6553 = vmatmul.mubr.msk.f32.vlgmr.msra.gmra.mrb[72].mxu1 %vm3110_vm8, %v8010_v24  ;;  %v1838_v39 = vpop.f32.mrb[21].mxu0  ;;  %v1927_v11 = vpop.f32.mrb[21].mxu1  ;;  %v2898_v35 = vmul.f32 0.2, %v1836_v34  ;;  %v2900_v40 = vmul.f32 0.2, %v1925_v36 }
 0x127   : > { %v6655_v4 = vpack.c.bf16 %v2995_v1, %v2963_v10  ;;  %v6663_v28 = vpack.c.bf16 %v2997_v15, %v2965_v33  ;;  %3371 = vmatprep.mubr.f32.mxu0 %v7048_v3  ;;  %3460 = vmatprep.mubr.f32.mxu1 %v7048_v3  ;;  %v2899_v5 = vmul.f32 0.2, %v1838_v39  ;;  %v2901_v41 = vmul.f32 0.2, %v1927_v11 }
 0x128   : > { %v3026_v50 = vmax.f32 %v1836_v34, %v2898_v35  ;;  %v3028_v23 = vmax.f32 %v1925_v36, %v2900_v40 }
 0x129   : > { %v1842_v42 = vpop.f32.mrb[22].mxu0  ;;  %v1931_v44 = vpop.f32.mrb[22].mxu1  ;;  %6656 = vmatprep.subr.bf16.mxu0 %v6655_v4  ;;  %6664 = vmatprep.subr.bf16.mxu1 %v6663_v28  ;;  %v3027_v57 = vmax.f32 %v1838_v39, %v2899_v5  ;;  %v3029_v54 = vmax.f32 %v1927_v11, %v2901_v41 }
 0x12a   : > { %v2930_v12 = vmul.f32 0.2, %v1842_v42  ;;  %v2932_v47 = vmul.f32 0.2, %v1931_v44  ;;  %6550 = vmatmul.mubr.msk.f32.gmra.mrb[74].mxu0 %vm3110_vm8, %v8021_v27  ;;  %6554 = vmatmul.mubr.msk.f32.gmra.mrb[74].mxu1 %vm3110_vm8, %v8021_v27  ;;  %v1844_v18 = vpop.f32.mrb[23].mxu0  ;;  %v1933_v46 = vpop.f32.mrb[23].mxu1 }
 0x12b   : > { %v2931_v51 = vmul.f32 0.2, %v1844_v18  ;;  %v2933_v8 = vmul.f32 0.2, %v1933_v46  ;;  %6658 = vmatpush1.bf16.msra.mxu0 %v6657_v37  ;;  %6666 = vmatpush1.bf16.msra.mxu1 %v6665_v38 }
 0x12c   : > { %v3058_v52 = vmax.f32 %v1842_v42, %v2930_v12  ;;  %v3060_v20 = vmax.f32 %v1931_v44, %v2932_v47  ;;  %3377 = vmatprep.mubr.f32.mxu0 %v7048_v3  ;;  %3466 = vmatprep.mubr.f32.mxu1 %v7048_v3 }
 0x12d   : > { %v3059_v55 = vmax.f32 %v1844_v18, %v2931_v51  ;;  %v3061_v58 = vmax.f32 %v1933_v46, %v2933_v8  ;;  %v2002_v59 = vpop.f32.mrb[24].mxu0  ;;  %v2091_v60 = vpop.f32.mrb[24].mxu1 }
 0x12e   : > { %v6661_v63 = vpack.c.bf16 %v3058_v52, %v3026_v50  ;;  %v6669_v49 = vpack.c.bf16 %v3060_v20, %v3028_v23  ;;  %6551 = vmatmul.mubr.msk.f32.gmra.mrb[76].mxu0 %vm3110_vm8, %v8030_v45  ;;  %6555 = vmatmul.mubr.msk.f32.gmra.mrb[76].mxu1 %vm3110_vm8, %v8030_v45  ;;  %v2004_v53 = vpop.f32.mrb[25].mxu0  ;;  %v2093_v48 = vpop.f32.mrb[25].mxu1  ;;  %v2838_v19 = vmul.f32 0.2, %v2002_v59  ;;  %v2840_v0 = vmul.f32 0.2, %v2091_v60 }
 0x12f   : > { %v6659_v43 = vpack.c.bf16 %v3059_v55, %v3027_v57  ;;  %v6667_v26 = vpack.c.bf16 %v3061_v58, %v3029_v54  ;;  %3383 = vmatprep.mubr.f32.mxu0 %v7048_v3  ;;  %3472 = vmatprep.mubr.f32.mxu1 %v7048_v3  ;;  %v2839_v13 = vmul.f32 0.2, %v2004_v53  ;;  %v2841_v14 = vmul.f32 0.2, %v2093_v48 }
 0x130   : > { %v2966_v21 = vmax.f32 %v2002_v59, %v2838_v19  ;;  %v2968_v62 = vmax.f32 %v2091_v60, %v2840_v0 }
 0x131   : > { %v2008_v16 = vpop.f32.mrb[26].mxu0  ;;  %v2097_v32 = vpop.f32.mrb[26].mxu1  ;;  %6660 = vmatprep.subr.bf16.mxu0 %v6659_v43  ;;  %6668 = vmatprep.subr.bf16.mxu1 %v6667_v26  ;;  %v2967_v31 = vmax.f32 %v2004_v53, %v2839_v13  ;;  %v2969_v10 = vmax.f32 %v2093_v48, %v2841_v14 }
 0x132   : > { %v2870_v56 = vmul.f32 0.2, %v2008_v16  ;;  %v2872_v22 = vmul.f32 0.2, %v2097_v32  ;;  %6552 = vmatmul.mubr.msk.f32.gmra.mrb[78].mxu0 %vm3110_vm8, %v8043_v61  ;;  %6556 = vmatmul.mubr.msk.f32.gmra.mrb[78].mxu1 %vm3110_vm8, %v8043_v61  ;;  %v2010_v7 = vpop.f32.mrb[27].mxu0  ;;  %v2099_v9 = vpop.f32.mrb[27].mxu1 }
 0x133   : > { %v2871_v25 = vmul.f32 0.2, %v2010_v7  ;;  %v2873_v17 = vmul.f32 0.2, %v2099_v9  ;;  %6662 = vmatpush1.bf16.msra.mxu0 %v6661_v63  ;;  %6670 = vmatpush1.bf16.msra.mxu1 %v6669_v49 }
 0x134   : > { %v2998_v29 = vmax.f32 %v2008_v16, %v2870_v56  ;;  %v3000_v30 = vmax.f32 %v2097_v32, %v2872_v22  ;;  %3543 = vmatprep.mubr.f32.mxu0 %v7048_v3  ;;  %3632 = vmatprep.mubr.f32.mxu1 %v7048_v3 }
 0x135   : > { %v2999_v33 = vmax.f32 %v2010_v7, %v2871_v25  ;;  %v3001_v1 = vmax.f32 %v2099_v9, %v2873_v17  ;;  %v2014_v15 = vpop.f32.mrb[28].mxu0  ;;  %v2103_v34 = vpop.f32.mrb[28].mxu1 }
 0x136   : > { %v6673_v36 = vpack.c.bf16 %v2998_v29, %v2966_v21  ;;  %v6681_v37 = vpack.c.bf16 %v3000_v30, %v2968_v62  ;;  %6557 = vmatmul.mubr.msk.f32.vlgmr.msra.gmra.mrb[80].mxu0 %vm3110_vm8, %v8010_v24  ;;  %6561 = vmatmul.mubr.msk.f32.vlgmr.msra.gmra.mrb[80].mxu1 %vm3110_vm8, %v8010_v24  ;;  %v2016_v38 = vpop.f32.mrb[29].mxu0  ;;  %v2105_v39 = vpop.f32.mrb[29].mxu1  ;;  %v2902_v28 = vmul.f32 0.2, %v2014_v15  ;;  %v2904_v35 = vmul.f32 0.2, %v2103_v34 }
 0x137   : > { %v6671_v11 = vpack.c.bf16 %v2999_v33, %v2967_v31  ;;  %v6679_v4 = vpack.c.bf16 %v3001_v1, %v2969_v10  ;;  %3549 = vmatprep.mubr.f32.mxu0 %v7048_v3  ;;  %3638 = vmatprep.mubr.f32.mxu1 %v7048_v3  ;;  %v2903_v40 = vmul.f32 0.2, %v2016_v38  ;;  %v2905_v5 = vmul.f32 0.2, %v2105_v39 }
 0x138   : > { %v3030_v46 = vmax.f32 %v2014_v15, %v2902_v28  ;;  %v3032_v8 = vmax.f32 %v2103_v34, %v2904_v35 }
 0x139   : > { %v2020_v41 = vpop.f32.mrb[30].mxu0  ;;  %v2109_v42 = vpop.f32.mrb[30].mxu1  ;;  %6672 = vmatprep.subr.bf16.mxu0 %v6671_v11  ;;  %6680 = vmatprep.subr.bf16.mxu1 %v6679_v4  ;;  %v3031_v20 = vmax.f32 %v2016_v38, %v2903_v40  ;;  %v3033_v57 = vmax.f32 %v2105_v39, %v2905_v5 }
 0x13a   : > { %v2934_v44 = vmul.f32 0.2, %v2020_v41  ;;  %v2936_v12 = vmul.f32 0.2, %v2109_v42  ;;  %6558 = vmatmul.mubr.msk.f32.gmra.mrb[82].mxu0 %vm3110_vm8, %v8021_v27  ;;  %6562 = vmatmul.mubr.msk.f32.gmra.mrb[82].mxu1 %vm3110_vm8, %v8021_v27  ;;  %v2022_v47 = vpop.f32.mrb[31].mxu0  ;;  %v2111_v18 = vpop.f32.mrb[31].mxu1 }
 0x13b   : > { %v2935_v50 = vmul.f32 0.2, %v2022_v47  ;;  %v2937_v51 = vmul.f32 0.2, %v2111_v18  ;;  %6674 = vmatpush1.bf16.msra.mxu0 %v6673_v36  ;;  %6682 = vmatpush1.bf16.msra.mxu1 %v6681_v37 }
 0x13c   : > { %v3062_v23 = vmax.f32 %v2020_v41, %v2934_v44  ;;  %v3064_v52 = vmax.f32 %v2109_v42, %v2936_v12  ;;  %3555 = vmatprep.mubr.f32.mxu0 %v7048_v3  ;;  %3644 = vmatprep.mubr.f32.mxu1 %v7048_v3 }
 0x13d   : > { %v3063_v54 = vmax.f32 %v2022_v47, %v2935_v50  ;;  %v3065_v55 = vmax.f32 %v2111_v18, %v2937_v51  ;;  %v2180_v58 = vpop.f32.mrb[32].mxu0  ;;  %v2269_v59 = vpop.f32.mrb[32].mxu1 }
 0x13e   : > { %v6677_v60 = vpack.c.bf16 %v3062_v23, %v3030_v46  ;;  %v6685_v63 = vpack.c.bf16 %v3064_v52, %v3032_v8  ;;  %6559 = vmatmul.mubr.msk.f32.gmra.mrb[84].mxu0 %vm3110_vm8, %v8030_v45  ;;  %6563 = vmatmul.mubr.msk.f32.gmra.mrb[84].mxu1 %vm3110_vm8, %v8030_v45  ;;  %v2182_v49 = vpop.f32.mrb[33].mxu0  ;;  %v2271_v53 = vpop.f32.mrb[33].mxu1  ;;  %v2842_v26 = vmul.f32 0.2, %v2180_v58  ;;  %v2844_v19 = vmul.f32 0.2, %v2269_v59 }
 0x13f   : > { %v6675_v48 = vpack.c.bf16 %v3063_v54, %v3031_v20  ;;  %v6683_v43 = vpack.c.bf16 %v3065_v55, %v3033_v57  ;;  %3561 = vmatprep.mubr.f32.mxu0 %v7048_v3  ;;  %3650 = vmatprep.mubr.f32.mxu1 %v7048_v3  ;;  %v2843_v0 = vmul.f32 0.2, %v2182_v49  ;;  %v2845_v13 = vmul.f32 0.2, %v2271_v53 }
 0x140   : > { %v2970_v9 = vmax.f32 %v2180_v58, %v2842_v26  ;;  %v2972_v17 = vmax.f32 %v2269_v59, %v2844_v19 }
 0x141   : > { %v2186_v14 = vpop.f32.mrb[34].mxu0  ;;  %v2275_v16 = vpop.f32.mrb[34].mxu1  ;;  %6676 = vmatprep.subr.bf16.mxu0 %v6675_v48  ;;  %6684 = vmatprep.subr.bf16.mxu1 %v6683_v43  ;;  %v2971_v30 = vmax.f32 %v2182_v49, %v2843_v0  ;;  %v2973_v31 = vmax.f32 %v2271_v53, %v2845_v13 }
 0x142   : > { %v2874_v32 = vmul.f32 0.2, %v2186_v14  ;;  %v2876_v56 = vmul.f32 0.2, %v2275_v16  ;;  %6560 = vmatmul.mubr.msk.f32.gmra.mrb[86].mxu0 %vm3110_vm8, %v8043_v61  ;;  %6564 = vmatmul.mubr.msk.f32.gmra.mrb[86].mxu1 %vm3110_vm8, %v8043_v61  ;;  %v2188_v22 = vpop.f32.mrb[35].mxu0  ;;  %v2277_v7 = vpop.f32.mrb[35].mxu1 }
 0x143   : > { %v2875_v21 = vmul.f32 0.2, %v2188_v22  ;;  %v2877_v25 = vmul.f32 0.2, %v2277_v7  ;;  %6678 = vmatpush1.bf16.msra.mxu0 %v6677_v60  ;;  %6686 = vmatpush1.bf16.msra.mxu1 %v6685_v63 }
 0x144   : > { %v3002_v62 = vmax.f32 %v2186_v14, %v2874_v32  ;;  %v3004_v29 = vmax.f32 %v2275_v16, %v2876_v56  ;;  %3721 = vmatprep.mubr.f32.mxu0 %v7048_v3  ;;  %3810 = vmatprep.mubr.f32.mxu1 %v7048_v3 }
 0x145   : > { %v3003_v10 = vmax.f32 %v2188_v22, %v2875_v21  ;;  %v3005_v33 = vmax.f32 %v2277_v7, %v2877_v25  ;;  %v2192_v1 = vpop.f32.mrb[36].mxu0  ;;  %v2281_v15 = vpop.f32.mrb[36].mxu1 }
 0x146   : > { %v6689_v34 = vpack.c.bf16 %v3002_v62, %v2970_v9  ;;  %v6697_v36 = vpack.c.bf16 %v3004_v29, %v2972_v17  ;;  %6565 = vmatmul.mubr.msk.f32.vlgmr.msra.gmra.mrb[88].mxu0 %vm3110_vm8, %v8010_v24  ;;  %6569 = vmatmul.mubr.msk.f32.vlgmr.msra.gmra.mrb[88].mxu1 %vm3110_vm8, %v8010_v24  ;;  %v2194_v37 = vpop.f32.mrb[37].mxu0  ;;  %v2283_v38 = vpop.f32.mrb[37].mxu1  ;;  %v2906_v4 = vmul.f32 0.2, %v2192_v1  ;;  %v2908_v28 = vmul.f32 0.2, %v2281_v15 }
 0x147   : > { %v6687_v39 = vpack.c.bf16 %v3003_v10, %v2971_v30  ;;  %v6695_v11 = vpack.c.bf16 %v3005_v33, %v2973_v31  ;;  %3727 = vmatprep.mubr.f32.mxu0 %v7048_v3  ;;  %3816 = vmatprep.mubr.f32.mxu1 %v7048_v3  ;;  %v2907_v35 = vmul.f32 0.2, %v2194_v37  ;;  %v2909_v40 = vmul.f32 0.2, %v2283_v38 }
 0x148   : > { %v3034_v18 = vmax.f32 %v2192_v1, %v2906_v4  ;;  %v3036_v51 = vmax.f32 %v2281_v15, %v2908_v28 }
 0x149   : > { %v2198_v5 = vpop.f32.mrb[38].mxu0  ;;  %v2287_v41 = vpop.f32.mrb[38].mxu1  ;;  %6688 = vmatprep.subr.bf16.mxu0 %v6687_v39  ;;  %6696 = vmatprep.subr.bf16.mxu1 %v6695_v11  ;;  %v3035_v52 = vmax.f32 %v2194_v37, %v2907_v35  ;;  %v3037_v20 = vmax.f32 %v2283_v38, %v2909_v40 }
 0x14a   : > { %v2938_v42 = vmul.f32 0.2, %v2198_v5  ;;  %v2940_v44 = vmul.f32 0.2, %v2287_v41  ;;  %6566 = vmatmul.mubr.msk.f32.gmra.mrb[90].mxu0 %vm3110_vm8, %v8021_v27  ;;  %6570 = vmatmul.mubr.msk.f32.gmra.mrb[90].mxu1 %vm3110_vm8, %v8021_v27  ;;  %v2200_v12 = vpop.f32.mrb[39].mxu0  ;;  %v2289_v47 = vpop.f32.mrb[39].mxu1 }
 0x14b   : > { %v2939_v46 = vmul.f32 0.2, %v2200_v12  ;;  %v2941_v50 = vmul.f32 0.2, %v2289_v47  ;;  %6690 = vmatpush1.bf16.msra.mxu0 %v6689_v34  ;;  %6698 = vmatpush1.bf16.msra.mxu1 %v6697_v36 }
 0x14c   : > { %v3066_v8 = vmax.f32 %v2198_v5, %v2938_v42  ;;  %v3068_v23 = vmax.f32 %v2287_v41, %v2940_v44  ;;  %3733 = vmatprep.mubr.f32.mxu0 %v7048_v3  ;;  %3822 = vmatprep.mubr.f32.mxu1 %v7048_v3 }
 0x14d   : > { %v3067_v57 = vmax.f32 %v2200_v12, %v2939_v46  ;;  %v3069_v54 = vmax.f32 %v2289_v47, %v2941_v50  ;;  %v2358_v55 = vpop.f32.mrb[40].mxu0  ;;  %v2447_v58 = vpop.f32.mrb[40].mxu1 }
 0x14e   : > { %v6693_v59 = vpack.c.bf16 %v3066_v8, %v3034_v18  ;;  %v6701_v60 = vpack.c.bf16 %v3068_v23, %v3036_v51  ;;  %6567 = vmatmul.mubr.msk.f32.gmra.mrb[92].mxu0 %vm3110_vm8, %v8030_v45  ;;  %6571 = vmatmul.mubr.msk.f32.gmra.mrb[92].mxu1 %vm3110_vm8, %v8030_v45  ;;  %v2360_v63 = vpop.f32.mrb[41].mxu0  ;;  %v2449_v49 = vpop.f32.mrb[41].mxu1  ;;  %v2846_v43 = vmul.f32 0.2, %v2358_v55  ;;  %v2848_v26 = vmul.f32 0.2, %v2447_v58 }
 0x14f   : > { %v6691_v53 = vpack.c.bf16 %v3067_v57, %v3035_v52  ;;  %v6699_v48 = vpack.c.bf16 %v3069_v54, %v3037_v20  ;;  %3739 = vmatprep.mubr.f32.mxu0 %v7048_v3  ;;  %3828 = vmatprep.mubr.f32.mxu1 %v7048_v3  ;;  %v2847_v19 = vmul.f32 0.2, %v2360_v63  ;;  %v2849_v0 = vmul.f32 0.2, %v2449_v49 }
 0x150   : > { %v2974_v7 = vmax.f32 %v2358_v55, %v2846_v43  ;;  %v2976_v25 = vmax.f32 %v2447_v58, %v2848_v26 }
 0x151   : > { %v2364_v13 = vpop.f32.mrb[42].mxu0  ;;  %v2453_v14 = vpop.f32.mrb[42].mxu1  ;;  %6692 = vmatprep.subr.bf16.mxu0 %v6691_v53  ;;  %6700 = vmatprep.subr.bf16.mxu1 %v6699_v48  ;;  %v2975_v29 = vmax.f32 %v2360_v63, %v2847_v19  ;;  %v2977_v30 = vmax.f32 %v2449_v49, %v2849_v0 }
 0x152   : > { %v2878_v16 = vmul.f32 0.2, %v2364_v13  ;;  %v2880_v32 = vmul.f32 0.2, %v2453_v14  ;;  %6568 = vmatmul.mubr.msk.f32.gmra.mrb[94].mxu0 %vm3110_vm8, %v8043_v61  ;;  %6572 = vmatmul.mubr.msk.f32.gmra.mrb[94].mxu1 %vm3110_vm8, %v8043_v61  ;;  %v2366_v56 = vpop.f32.mrb[43].mxu0  ;;  %v2455_v22 = vpop.f32.mrb[43].mxu1 }
 0x153   : > { %v2879_v9 = vmul.f32 0.2, %v2366_v56  ;;  %v2881_v21 = vmul.f32 0.2, %v2455_v22  ;;  %6694 = vmatpush1.bf16.msra.mxu0 %v6693_v59  ;;  %6702 = vmatpush1.bf16.msra.mxu1 %v6701_v60 }
 0x154   : > { %v3006_v17 = vmax.f32 %v2364_v13, %v2878_v16  ;;  %v3008_v62 = vmax.f32 %v2453_v14, %v2880_v32  ;;  %3899 = vmatprep.mubr.f32.mxu0 %v7048_v3  ;;  %3988 = vmatprep.mubr.f32.mxu1 %v7048_v3 }
 0x155   : > { %v3007_v31 = vmax.f32 %v2366_v56, %v2879_v9  ;;  %v3009_v10 = vmax.f32 %v2455_v22, %v2881_v21  ;;  %v2370_v33 = vpop.f32.mrb[44].mxu0  ;;  %v2459_v1 = vpop.f32.mrb[44].mxu1 }
 0x156   : > { %v6705_v15 = vpack.c.bf16 %v3006_v17, %v2974_v7  ;;  %v6713_v34 = vpack.c.bf16 %v3008_v62, %v2976_v25  ;;  %6573 = vmatmul.mubr.msk.f32.vlgmr.msra.gmra.mrb[96].mxu0 %vm3110_vm8, %v8010_v24  ;;  %6577 = vmatmul.mubr.msk.f32.vlgmr.msra.gmra.mrb[96].mxu1 %vm3110_vm8, %v8010_v24  ;;  %v2372_v36 = vpop.f32.mrb[45].mxu0  ;;  %v2461_v37 = vpop.f32.mrb[45].mxu1  ;;  %v2910_v11 = vmul.f32 0.2, %v2370_v33  ;;  %v2912_v4 = vmul.f32 0.2, %v2459_v1 }
 0x157   : > { %v6703_v38 = vpack.c.bf16 %v3007_v31, %v2975_v29  ;;  %v6711_v39 = vpack.c.bf16 %v3009_v10, %v2977_v30  ;;  %3905 = vmatprep.mubr.f32.mxu0 %v7048_v3  ;;  %3994 = vmatprep.mubr.f32.mxu1 %v7048_v3  ;;  %v2911_v28 = vmul.f32 0.2, %v2372_v36  ;;  %v2913_v35 = vmul.f32 0.2, %v2461_v37 }
 0x158   : > { %v3038_v47 = vmax.f32 %v2370_v33, %v2910_v11  ;;  %v3040_v50 = vmax.f32 %v2459_v1, %v2912_v4 }
 0x159   : > { %v2376_v40 = vpop.f32.mrb[46].mxu0  ;;  %v2465_v5 = vpop.f32.mrb[46].mxu1  ;;  %6704 = vmatprep.subr.bf16.mxu0 %v6703_v38  ;;  %6712 = vmatprep.subr.bf16.mxu1 %v6711_v39  ;;  %v3039_v23 = vmax.f32 %v2372_v36, %v2911_v28  ;;  %v3041_v52 = vmax.f32 %v2461_v37, %v2913_v35 }
 0x15a   : > { %v2942_v41 = vmul.f32 0.2, %v2376_v40  ;;  %v2944_v42 = vmul.f32 0.2, %v2465_v5  ;;  %6574 = vmatmul.mubr.msk.f32.gmra.mrb[98].mxu0 %vm3110_vm8, %v8021_v27  ;;  %6578 = vmatmul.mubr.msk.f32.gmra.mrb[98].mxu1 %vm3110_vm8, %v8021_v27  ;;  %v2378_v44 = vpop.f32.mrb[47].mxu0  ;;  %v2467_v12 = vpop.f32.mrb[47].mxu1 }
 0x15b   : > { %v2943_v18 = vmul.f32 0.2, %v2378_v44  ;;  %v2945_v46 = vmul.f32 0.2, %v2467_v12  ;;  %6706 = vmatpush1.bf16.msra.mxu0 %v6705_v15  ;;  %6714 = vmatpush1.bf16.msra.mxu1 %v6713_v34 }
 0x15c   : > { %v3070_v51 = vmax.f32 %v2376_v40, %v2942_v41  ;;  %v3072_v8 = vmax.f32 %v2465_v5, %v2944_v42  ;;  %3911 = vmatprep.mubr.f32.mxu0 %v7048_v3  ;;  %4000 = vmatprep.mubr.f32.mxu1 %v7048_v3 }
 0x15d   : > { %v3071_v20 = vmax.f32 %v2378_v44, %v2943_v18  ;;  %v3073_v57 = vmax.f32 %v2467_v12, %v2945_v46  ;;  %v2536_v54 = vpop.f32.mrb[48].mxu0  ;;  %v2625_v55 = vpop.f32.mrb[48].mxu1 }
 0x15e   : > { %v6709_v58 = vpack.c.bf16 %v3070_v51, %v3038_v47  ;;  %v6717_v59 = vpack.c.bf16 %v3072_v8, %v3040_v50  ;;  %6575 = vmatmul.mubr.msk.f32.gmra.mrb[100].mxu0 %vm3110_vm8, %v8030_v45  ;;  %6579 = vmatmul.mubr.msk.f32.gmra.mrb[100].mxu1 %vm3110_vm8, %v8030_v45  ;;  %v2538_v60 = vpop.f32.mrb[49].mxu0  ;;  %v2627_v63 = vpop.f32.mrb[49].mxu1  ;;  %v2850_v48 = vmul.f32 0.2, %v2536_v54  ;;  %v2852_v43 = vmul.f32 0.2, %v2625_v55 }
 0x15f   : > { %v6707_v49 = vpack.c.bf16 %v3071_v20, %v3039_v23  ;;  %v6715_v53 = vpack.c.bf16 %v3073_v57, %v3041_v52  ;;  %3917 = vmatprep.mubr.f32.mxu0 %v7048_v3  ;;  %4006 = vmatprep.mubr.f32.mxu1 %v7048_v3  ;;  %v2851_v26 = vmul.f32 0.2, %v2538_v60  ;;  %v2853_v19 = vmul.f32 0.2, %v2627_v63 }
 0x160   : > { %v2978_v22 = vmax.f32 %v2536_v54, %v2850_v48  ;;  %v2980_v21 = vmax.f32 %v2625_v55, %v2852_v43 }
 0x161   : > { %v2542_v0 = vpop.f32.mrb[50].mxu0  ;;  %v2631_v13 = vpop.f32.mrb[50].mxu1  ;;  %6708 = vmatprep.subr.bf16.mxu0 %v6707_v49  ;;  %6716 = vmatprep.subr.bf16.mxu1 %v6715_v53  ;;  %v2979_v62 = vmax.f32 %v2538_v60, %v2851_v26  ;;  %v2981_v29 = vmax.f32 %v2627_v63, %v2853_v19 }
 0x162   : > { %v2882_v14 = vmul.f32 0.2, %v2542_v0  ;;  %v2884_v16 = vmul.f32 0.2, %v2631_v13  ;;  %6576 = vmatmul.mubr.msk.f32.gmra.mrb[102].mxu0 %vm3110_vm8, %v8043_v61  ;;  %6580 = vmatmul.mubr.msk.f32.gmra.mrb[102].mxu1 %vm3110_vm8, %v8043_v61  ;;  %v2544_v32 = vpop.f32.mrb[51].mxu0  ;;  %v2633_v56 = vpop.f32.mrb[51].mxu1 }
 0x163   : > { %v2883_v7 = vmul.f32 0.2, %v2544_v32  ;;  %v2885_v9 = vmul.f32 0.2, %v2633_v56  ;;  %6710 = vmatpush1.bf16.msra.mxu0 %v6709_v58  ;;  %6718 = vmatpush1.bf16.msra.mxu1 %v6717_v59 }
 0x164   : > { %v3010_v25 = vmax.f32 %v2542_v0, %v2882_v14  ;;  %v3012_v17 = vmax.f32 %v2631_v13, %v2884_v16  ;;  %4077 = vmatprep.mubr.f32.mxu0 %v7048_v3  ;;  %4166 = vmatprep.mubr.f32.mxu1 %v7048_v3 }
 0x165   : > { %v3011_v30 = vmax.f32 %v2544_v32, %v2883_v7  ;;  %v3013_v31 = vmax.f32 %v2633_v56, %v2885_v9  ;;  %v2548_v10 = vpop.f32.mrb[52].mxu0  ;;  %v2637_v33 = vpop.f32.mrb[52].mxu1 }
 0x166   : > { %v6721_v1 = vpack.c.bf16 %v3010_v25, %v2978_v22  ;;  %v6729_v15 = vpack.c.bf16 %v3012_v17, %v2980_v21  ;;  %6581 = vmatmul.mubr.msk.f32.vlgmr.msra.gmra.mrb[104].mxu0 %vm3110_vm8, %v8010_v24  ;;  %6585 = vmatmul.mubr.msk.f32.vlgmr.msra.gmra.mrb[104].mxu1 %vm3110_vm8, %v8010_v24  ;;  %v2550_v34 = vpop.f32.mrb[53].mxu0  ;;  %v2639_v36 = vpop.f32.mrb[53].mxu1  ;;  %v2914_v39 = vmul.f32 0.2, %v2548_v10  ;;  %v2916_v11 = vmul.f32 0.2, %v2637_v33 }
 0x167   : > { %v6719_v37 = vpack.c.bf16 %v3011_v30, %v2979_v62  ;;  %v6727_v38 = vpack.c.bf16 %v3013_v31, %v2981_v29  ;;  %4083 = vmatprep.mubr.f32.mxu0 %v7048_v3  ;;  %4172 = vmatprep.mubr.f32.mxu1 %v7048_v3  ;;  %v2915_v4 = vmul.f32 0.2, %v2550_v34  ;;  %v2917_v28 = vmul.f32 0.2, %v2639_v36 }
 0x168   : > { %v3042_v12 = vmax.f32 %v2548_v10, %v2914_v39  ;;  %v3044_v46 = vmax.f32 %v2637_v33, %v2916_v11 }
 0x169   : > { %v2554_v35 = vpop.f32.mrb[54].mxu0  ;;  %v2643_v40 = vpop.f32.mrb[54].mxu1  ;;  %6720 = vmatprep.subr.bf16.mxu0 %v6719_v37  ;;  %6728 = vmatprep.subr.bf16.mxu1 %v6727_v38  ;;  %v3043_v8 = vmax.f32 %v2550_v34, %v2915_v4  ;;  %v3045_v23 = vmax.f32 %v2639_v36, %v2917_v28 }
 0x16a   : > { %v2946_v5 = vmul.f32 0.2, %v2554_v35  ;;  %v2948_v41 = vmul.f32 0.2, %v2643_v40  ;;  %6582 = vmatmul.mubr.msk.f32.gmra.mrb[106].mxu0 %vm3110_vm8, %v8021_v27  ;;  %6586 = vmatmul.mubr.msk.f32.gmra.mrb[106].mxu1 %vm3110_vm8, %v8021_v27  ;;  %v2556_v42 = vpop.f32.mrb[55].mxu0  ;;  %v2645_v44 = vpop.f32.mrb[55].mxu1 }
 0x16b   : > { %v2947_v47 = vmul.f32 0.2, %v2556_v42  ;;  %v2949_v18 = vmul.f32 0.2, %v2645_v44  ;;  %6722 = vmatpush1.bf16.msra.mxu0 %v6721_v1  ;;  %6730 = vmatpush1.bf16.msra.mxu1 %v6729_v15 }
 0x16c   : > { %v3074_v50 = vmax.f32 %v2554_v35, %v2946_v5  ;;  %v3076_v51 = vmax.f32 %v2643_v40, %v2948_v41  ;;  %4089 = vmatprep.mubr.f32.mxu0 %v7048_v3  ;;  %4178 = vmatprep.mubr.f32.mxu1 %v7048_v3 }
 0x16d   : > { %v3075_v52 = vmax.f32 %v2556_v42, %v2947_v47  ;;  %v3077_v20 = vmax.f32 %v2645_v44, %v2949_v18  ;;  %v2714_v57 = vpop.f32.mrb[56].mxu0  ;;  %v2803_v54 = vpop.f32.mrb[56].mxu1 }
 0x16e   : > { %v6725_v55 = vpack.c.bf16 %v3074_v50, %v3042_v12  ;;  %v6733_v58 = vpack.c.bf16 %v3076_v51, %v3044_v46  ;;  %6583 = vmatmul.mubr.msk.f32.gmra.mrb[108].mxu0 %vm3110_vm8, %v8030_v45  ;;  %6587 = vmatmul.mubr.msk.f32.gmra.mrb[108].mxu1 %vm3110_vm8, %v8030_v45  ;;  %v2716_v59 = vpop.f32.mrb[57].mxu0  ;;  %v2805_v60 = vpop.f32.mrb[57].mxu1  ;;  %v2854_v53 = vmul.f32 0.2, %v2714_v57  ;;  %v2856_v48 = vmul.f32 0.2, %v2803_v54 }
 0x16f   : > { %v6723_v63 = vpack.c.bf16 %v3075_v52, %v3043_v8  ;;  %v6731_v49 = vpack.c.bf16 %v3077_v20, %v3045_v23  ;;  %4095 = vmatprep.mubr.f32.mxu0 %v7048_v3  ;;  %4184 = vmatprep.mubr.f32.mxu1 %v7048_v3  ;;  %v2855_v43 = vmul.f32 0.2, %v2716_v59  ;;  %v2857_v26 = vmul.f32 0.2, %v2805_v60 }
 0x170   : > { %v2982_v56 = vmax.f32 %v2714_v57, %v2854_v53  ;;  %v2984_v9 = vmax.f32 %v2803_v54, %v2856_v48  ;;  %v7037_v54 = vld [vmem:[%s8486_s3 + $0x8] sm:$0xff] }
 0x171   : > { %v2720_v19 = vpop.f32.mrb[58].mxu0  ;;  %v2809_v0 = vpop.f32.mrb[58].mxu1  ;;  %6724 = vmatprep.subr.bf16.mxu0 %v6723_v63  ;;  %6732 = vmatprep.subr.bf16.mxu1 %v6731_v49  ;;  %v2983_v17 = vmax.f32 %v2716_v59, %v2855_v43  ;;  %v2985_v62 = vmax.f32 %v2805_v60, %v2857_v26 }
 0x172   : > { %v2886_v13 = vmul.f32 0.2, %v2720_v19  ;;  %v2888_v14 = vmul.f32 0.2, %v2809_v0  ;;  %6584 = vmatmul.mubr.msk.f32.gmra.mrb[110].mxu0 %vm3110_vm8, %v8043_v61  ;;  %6588 = vmatmul.mubr.msk.f32.gmra.mrb[110].mxu1 %vm3110_vm8, %v8043_v61  ;;  %v2722_v16 = vpop.f32.mrb[59].mxu0  ;;  %v2811_v32 = vpop.f32.mrb[59].mxu1 }
 0x173   : > { %v2887_v22 = vmul.f32 0.2, %v2722_v16  ;;  %v2889_v7 = vmul.f32 0.2, %v2811_v32  ;;  %6726 = vmatpush1.bf16.msra.mxu0 %v6725_v55  ;;  %6734 = vmatpush1.bf16.msra.mxu1 %v6733_v58  ;;  %v7038_v55 = vld [vmem:[%s8486_s3 + $0x10] sm:$0xff]  ;;  %v8222_v58 = vpop.permute.xlu0 %3092 }
 0x174   : > { %v3014_v21 = vmax.f32 %v2720_v19, %v2886_v13  ;;  %v3016_v25 = vmax.f32 %v2809_v0, %v2888_v14  ;;  %4255 = vmatprep.mubr.f32.mxu0 %v7048_v3  ;;  %4344 = vmatprep.mubr.f32.mxu1 %v7048_v3  ;;  %v8230_v13 = vpop.permute.xlu1 %3102 }
 0x175   : > { %v3015_v29 = vmax.f32 %v2722_v16, %v2887_v22  ;;  %v3017_v30 = vmax.f32 %v2811_v32, %v2889_v7  ;;  %v2726_v31 = vpop.f32.mrb[60].mxu0  ;;  %v2815_v10 = vpop.f32.mrb[60].mxu1 }
 0x176   : > { %v6737_v33 = vpack.c.bf16 %v3014_v21, %v2982_v56  ;;  %v6745_v1 = vpack.c.bf16 %v3016_v25, %v2984_v9  ;;  %6589 = vmatmul.mubr.msk.f32.vlgmr.msra.gmra.mrb[112].mxu0 %vm3110_vm8, %v8010_v24  ;;  %6593 = vmatmul.mubr.msk.f32.vlgmr.msra.gmra.mrb[112].mxu1 %vm3110_vm8, %v8010_v24  ;;  %v2728_v15 = vpop.f32.mrb[61].mxu0  ;;  %v2817_v34 = vpop.f32.mrb[61].mxu1  ;;  %v2918_v38 = vmul.f32 0.2, %v2726_v31  ;;  %v2920_v39 = vmul.f32 0.2, %v2815_v10 }
 0x177   : > { %v6735_v36 = vpack.c.bf16 %v3015_v29, %v2983_v17  ;;  %v6743_v37 = vpack.c.bf16 %v3017_v30, %v2985_v62  ;;  %4261 = vmatprep.mubr.f32.mxu0 %v7048_v3  ;;  %4350 = vmatprep.mubr.f32.mxu1 %v7048_v3  ;;  %v2919_v11 = vmul.f32 0.2, %v2728_v15  ;;  %v2921_v4 = vmul.f32 0.2, %v2817_v34  ;;  %v8228_v19 = vpop.permute.xlu0 %3097 }
 0x178   : > { %v3046_v42 = vmax.f32 %v2726_v31, %v2918_v38  ;;  %v3048_v47 = vmax.f32 %v2815_v10, %v2920_v39 }
 0x179   : > { %v2732_v28 = vpop.f32.mrb[62].mxu0  ;;  %v2821_v35 = vpop.f32.mrb[62].mxu1  ;;  %6736 = vmatprep.subr.bf16.mxu0 %v6735_v36  ;;  %6744 = vmatprep.subr.bf16.mxu1 %v6743_v37  ;;  %v3047_v50 = vmax.f32 %v2728_v15, %v2919_v11  ;;  %v3049_v51 = vmax.f32 %v2817_v34, %v2921_v4 }
 0x17a   : > { %v2950_v40 = vmul.f32 0.2, %v2732_v28  ;;  %v2952_v5 = vmul.f32 0.2, %v2821_v35  ;;  %6590 = vmatmul.mubr.msk.f32.gmra.mrb[114].mxu0 %vm3110_vm8, %v8021_v27  ;;  %6594 = vmatmul.mubr.msk.f32.gmra.mrb[114].mxu1 %vm3110_vm8, %v8021_v27  ;;  %v2734_v24 = vpop.f32.mrb[63].mxu0  ;;  %v2823_v41 = vpop.f32.mrb[63].mxu1 }
 0x17b   : > { %v2951_v44 = vmul.f32 0.2, %v2734_v24  ;;  %v2953_v12 = vmul.f32 0.2, %v2823_v41  ;;  %6738 = vmatpush1.bf16.msra.mxu0 %v6737_v33  ;;  %6746 = vmatpush1.bf16.msra.mxu1 %v6745_v1 }
 0x17c   : > { %v3078_v18 = vmax.f32 %v2732_v28, %v2950_v40  ;;  %v3080_v46 = vmax.f32 %v2821_v35, %v2952_v5  ;;  %4267 = vmatprep.mubr.f32.mxu0 %v7048_v3  ;;  %4356 = vmatprep.mubr.f32.mxu1 %v7048_v3 }
 0x17d   : > { %v3079_v8 = vmax.f32 %v2734_v24, %v2951_v44  ;;  %v3081_v23 = vmax.f32 %v2823_v41, %v2953_v12  ;;  %v8240_v41 = vpop.permute.xlu1 %3107 }
 0x17e   : > { %v6741_v52 = vpack.c.bf16 %v3078_v18, %v3046_v42  ;;  %v6749_v27 = vpack.c.bf16 %v3080_v46, %v3048_v47  ;;  %6591 = vmatmul.mubr.msk.f32.gmra.mrb[116].mxu0 %vm3110_vm8, %v8030_v45  ;;  %6595 = vmatmul.mubr.msk.f32.gmra.mrb[116].mxu1 %vm3110_vm8, %v8030_v45  ;;  %v7036_v45 = vld [vmem:[%s8486_s3] sm:$0xff] }
 0x17f   : > { %v6739_v20 = vpack.c.bf16 %v3079_v8, %v3047_v50  ;;  %v6747_v57 = vpack.c.bf16 %v3081_v23, %v3049_v51  ;;  %4273 = vmatprep.mubr.f32.mxu0 %v7048_v3  ;;  %4362 = vmatprep.mubr.f32.mxu1 %v7048_v3 }
 0x181   : > { %6740 = vmatprep.subr.bf16.mxu0 %v6739_v20  ;;  %6748 = vmatprep.subr.bf16.mxu1 %v6747_v57 }
 0x182   : > { %6592 = vmatmul.mubr.msk.f32.gmra.mrb[118].mxu0 %vm3110_vm8, %v8043_v61  ;;  %6596 = vmatmul.mubr.msk.f32.gmra.mrb[118].mxu1 %vm3110_vm8, %v8043_v61 }
 0x183   : > { %6742 = vmatpush1.bf16.msra.mxu0 %v6741_v52  ;;  %6750 = vmatpush1.bf16.msra.mxu1 %v6749_v27 }
 0x184   : > { %4433 = vmatprep.mubr.f32.mxu0 %v7048_v3  ;;  %4522 = vmatprep.mubr.f32.mxu1 %v7048_v3 }
 0x186   : > { %6597 = vmatmul.mubr.msk.f32.vlgmr.msra.gmra.mrb[120].mxu0 %vm3110_vm8, %v7036_v45  ;;  %6601 = vmatmul.mubr.msk.f32.vlgmr.msra.gmra.mrb[120].mxu1 %vm3110_vm8, %v7036_v45 }
 0x187   : > { %4439 = vmatprep.mubr.f32.mxu0 %v7048_v3  ;;  %4528 = vmatprep.mubr.f32.mxu1 %v7048_v3 }
 0x18a   : > { %6598 = vmatmul.mubr.msk.f32.gmra.mrb[122].mxu0 %vm3110_vm8, %v7037_v54  ;;  %6602 = vmatmul.mubr.msk.f32.gmra.mrb[122].mxu1 %vm3110_vm8, %v7037_v54 }
 0x18b   : > { %4445 = vmatprep.mubr.f32.mxu0 %v7048_v3  ;;  %4534 = vmatprep.mubr.f32.mxu1 %v7048_v3 }
 0x18e   : > { %6599 = vmatmul.mubr.msk.f32.gmra.mrb[124].mxu0 %vm3110_vm8, %v7038_v55  ;;  %6603 = vmatmul.mubr.msk.f32.gmra.mrb[124].mxu1 %vm3110_vm8, %v7038_v55 }
 0x18f   : > { %4451 = vmatprep.mubr.f32.mxu0 %v7048_v3  ;;  %4540 = vmatprep.mubr.f32.mxu1 %v7048_v3 }
 0x192   : > { %6600 = vmatmul.mubr.msk.f32.gmra.mrb[126].mxu0 %vm3110_vm8, %v8043_v61  ;;  %6604 = vmatmul.mubr.msk.f32.gmra.mrb[126].mxu1 %vm3110_vm8, %v8043_v61 }
 0x193   : > { %4881 = vmatprep.mubr.f32.mxu0 %v7048_v3  ;;  %4952 = vmatprep.mubr.f32.mxu1 %v7048_v3 }
 0x1e8   : > { %v3189_v59 = vpop.f32.mrb[64].mxu0  ;;  %v3278_v60 = vpop.f32.mrb[64].mxu1 }
 0x1e9   : > { %v3190_v63 = vadd.f32 %v3189_v59, %v8222_v58  ;;  %v3279_v49 = vadd.f32 %v3278_v60, %v8222_v58  ;;  %v3191_v53 = vpop.f32.mrb[65].mxu0  ;;  %v3280_v48 = vpop.f32.mrb[65].mxu1 }
 0x1ea   : > { %v3192_v43 = vadd.f32 %v3191_v53, %v8222_v58  ;;  %v3281_v26 = vadd.f32 %v3280_v48, %v8222_v58 }
 0x1eb   : > { %v4547_v61 = vmul.f32 0.2, %v3190_v63  ;;  %v4549_v0 = vmul.f32 0.2, %v3279_v49 }
 0x1ec   : > { %v4548_v14 = vmul.f32 0.2, %v3192_v43  ;;  %v4550_v16 = vmul.f32 0.2, %v3281_v26  ;;  %v3195_v32 = vpop.f32.mrb[66].mxu0  ;;  %v3284_v56 = vpop.f32.mrb[66].mxu1 }
 0x1ed   : > { %v3196_v22 = vadd.f32 %v3195_v32, %v8228_v19  ;;  %v3285_v7 = vadd.f32 %v3284_v56, %v8228_v19  ;;  %v3197_v9 = vpop.f32.mrb[67].mxu0  ;;  %v3286_v21 = vpop.f32.mrb[67].mxu1  ;;  %v4675_v62 = vmax.f32 %v3190_v63, %v4547_v61  ;;  %v4677_v29 = vmax.f32 %v3279_v49, %v4549_v0 }
 0x1ee   : > { %v3198_v25 = vadd.f32 %v3197_v9, %v8228_v19  ;;  %v3287_v17 = vadd.f32 %v3286_v21, %v8228_v19  ;;  %v4676_v10 = vmax.f32 %v3192_v43, %v4548_v14  ;;  %v4678_v33 = vmax.f32 %v3281_v26, %v4550_v16 }
 0x1ef   : > { %v4579_v30 = vmul.f32 0.2, %v3196_v22  ;;  %v4581_v31 = vmul.f32 0.2, %v3285_v7 }
 0x1f0   : > { %v4580_v1 = vmul.f32 0.2, %v3198_v25  ;;  %v4582_v15 = vmul.f32 0.2, %v3287_v17  ;;  %v3201_v34 = vpop.f32.mrb[68].mxu0  ;;  %v3290_v36 = vpop.f32.mrb[68].mxu1 }
 0x1f1   : > { %v4707_v37 = vmax.f32 %v3196_v22, %v4579_v30  ;;  %v4709_v38 = vmax.f32 %v3285_v7, %v4581_v31  ;;  %v3202_v39 = vadd.f32 %v3201_v34, %v8230_v13  ;;  %v3291_v11 = vadd.f32 %v3290_v36, %v8230_v13  ;;  %v3203_v4 = vpop.f32.mrb[69].mxu0  ;;  %v3292_v28 = vpop.f32.mrb[69].mxu1 }
 0x1f2   : > { %v4708_v35 = vmax.f32 %v3198_v25, %v4580_v1  ;;  %v4710_v40 = vmax.f32 %v3287_v17, %v4582_v15  ;;  %v3204_v5 = vadd.f32 %v3203_v4, %v8230_v13  ;;  %v3293_v24 = vadd.f32 %v3292_v28, %v8230_v13 }
 0x1f3   : > { %v6753_v42 = vpack.c.bf16 %v4707_v37, %v4675_v62  ;;  %v6761_v44 = vpack.c.bf16 %v4709_v38, %v4677_v29  ;;  %v4611_v12 = vmul.f32 0.2, %v3202_v39  ;;  %v4613_v47 = vmul.f32 0.2, %v3291_v11 }
 0x1f4   : > { %v3207_v18 = vpop.f32.mrb[70].mxu0  ;;  %v3296_v46 = vpop.f32.mrb[70].mxu1  ;;  %v6751_v50 = vpack.c.bf16 %v4708_v35, %v4676_v10  ;;  %v6759_v51 = vpack.c.bf16 %v4710_v40, %v4678_v33  ;;  %v4612_v8 = vmul.f32 0.2, %v3204_v5  ;;  %v4614_v23 = vmul.f32 0.2, %v3293_v24 }
 0x1f5   : > { %v3208_v52 = vadd.f32 %v3207_v18, %v8240_v41  ;;  %v3297_v27 = vadd.f32 %v3296_v46, %v8240_v41  ;;  %v3209_v20 = vpop.f32.mrb[71].mxu0  ;;  %v3298_v57 = vpop.f32.mrb[71].mxu1  ;;  %v4739_v60 = vmax.f32 %v3202_v39, %v4611_v12  ;;  %v4741_v63 = vmax.f32 %v3291_v11, %v4613_v47 }
 0x1f6   : > { %v3210_v45 = vadd.f32 %v3209_v20, %v8240_v41  ;;  %v3299_v54 = vadd.f32 %v3298_v57, %v8240_v41  ;;  %6752 = vmatprep.subr.bf16.mxu0 %v6751_v50  ;;  %6760 = vmatprep.subr.bf16.mxu1 %v6759_v51  ;;  %v4740_v48 = vmax.f32 %v3204_v5, %v4612_v8 }
 0x1f7   : > { %v4643_v55 = vmul.f32 0.2, %v3208_v52  ;;  %v4645_v59 = vmul.f32 0.2, %v3297_v27  ;;  %6754 = vmatpush1.bf16.msra.mxu0 %v6753_v42  ;;  %6762 = vmatpush1.bf16.msra.mxu1 %v6761_v44  ;;  %v4742_v43 = vmax.f32 %v3293_v24, %v4614_v23  ;;  %v8257_v24 = vld [vmem:[%s8488_s5] sm:$0x1] }
 0x1f8   : > { %v4644_v49 = vmul.f32 0.2, %v3210_v45  ;;  %v4646_v53 = vmul.f32 0.2, %v3299_v54 }
 0x1f9   : > { %v4771_v26 = vmax.f32 %v3208_v52, %v4643_v55  ;;  %v4773_v61 = vmax.f32 %v3297_v27, %v4645_v59  ;;  %v3367_v0 = vpop.f32.mrb[72].mxu0  ;;  %v3456_v14 = vpop.f32.mrb[72].mxu1 }
 0x1fa   : > { %v4772_v16 = vmax.f32 %v3210_v45, %v4644_v49  ;;  %v4774_v32 = vmax.f32 %v3299_v54, %v4646_v53  ;;  %v3368_v56 = vadd.f32 %v3367_v0, %v8222_v58  ;;  %v3457_v22 = vadd.f32 %v3456_v14, %v8222_v58  ;;  %v3369_v7 = vpop.f32.mrb[73].mxu0  ;;  %v3458_v9 = vpop.f32.mrb[73].mxu1 }
 0x1fb   : > { %v6757_v21 = vpack.c.bf16 %v4771_v26, %v4739_v60  ;;  %v6765_v25 = vpack.c.bf16 %v4773_v61, %v4741_v63  ;;  %v3370_v17 = vadd.f32 %v3369_v7, %v8222_v58  ;;  %v3459_v62 = vadd.f32 %v3458_v9, %v8222_v58 }
 0x1fc   : > { %v4551_v29 = vmul.f32 0.2, %v3368_v56  ;;  %v4553_v30 = vmul.f32 0.2, %v3457_v22  ;;  %v6755_v31 = vpack.c.bf16 %v4772_v16, %v4740_v48  ;;  %v6763_v10 = vpack.c.bf16 %v4774_v32, %v4742_v43 }
 0x1fd   : > { %v4552_v33 = vmul.f32 0.2, %v3370_v17  ;;  %v4554_v1 = vmul.f32 0.2, %v3459_v62  ;;  %v3373_v15 = vpop.f32.mrb[74].mxu0  ;;  %v3462_v34 = vpop.f32.mrb[74].mxu1 }
 0x1fe   : > { %v3374_v36 = vadd.f32 %v3373_v15, %v8228_v19  ;;  %v3463_v37 = vadd.f32 %v3462_v34, %v8228_v19  ;;  %v3375_v38 = vpop.f32.mrb[75].mxu0  ;;  %v3464_v39 = vpop.f32.mrb[75].mxu1  ;;  %6756 = vmatprep.subr.bf16.mxu0 %v6755_v31  ;;  %6764 = vmatprep.subr.bf16.mxu1 %v6763_v10  ;;  %v4679_v28 = vmax.f32 %v3368_v56, %v4551_v29 }
 0x1ff   : > { %v3376_v11 = vadd.f32 %v3375_v38, %v8228_v19  ;;  %v3465_v4 = vadd.f32 %v3464_v39, %v8228_v19  ;;  %v4681_v35 = vmax.f32 %v3457_v22, %v4553_v30  ;;  %6758 = vmatpush1.bf16.msra.mxu0 %v6757_v21  ;;  %6766 = vmatpush1.bf16.msra.mxu1 %v6765_v25 }
 0x200   : > { %v4583_v40 = vmul.f32 0.2, %v3374_v36  ;;  %v4585_v5 = vmul.f32 0.2, %v3463_v37  ;;  %v4680_v42 = vmax.f32 %v3370_v17, %v4552_v33  ;;  %v4682_v44 = vmax.f32 %v3459_v62, %v4554_v1 }
 0x201   : > { %v4584_v12 = vmul.f32 0.2, %v3376_v11  ;;  %v4586_v47 = vmul.f32 0.2, %v3465_v4  ;;  %v3379_v18 = vpop.f32.mrb[76].mxu0  ;;  %v3468_v46 = vpop.f32.mrb[76].mxu1 }
 0x202   : > { %v4711_v50 = vmax.f32 %v3374_v36, %v4583_v40  ;;  %v4713_v51 = vmax.f32 %v3463_v37, %v4585_v5  ;;  %v3380_v8 = vadd.f32 %v3379_v18, %v8230_v13  ;;  %v3469_v23 = vadd.f32 %v3468_v46, %v8230_v13  ;;  %v3381_v52 = vpop.f32.mrb[77].mxu0  ;;  %v3470_v27 = vpop.f32.mrb[77].mxu1  ;;  %6605 = vmatmul.mubr.msk.f32.vlgmr.msra.gmra.mrb[128].mxu0 %vm3110_vm8, %v8257_v24 }
 0x203   : > { %v4712_v20 = vmax.f32 %v3376_v11, %v4584_v12  ;;  %v4714_v57 = vmax.f32 %v3465_v4, %v4586_v47  ;;  %6606 = vmatmul.mubr.msk.f32.vlgmr.msra.gmra.mrb[128].mxu1 %vm3110_vm8, %v8257_v24  ;;  %v3382_v45 = vadd.f32 %v3381_v52, %v8230_v13  ;;  %5023 = vmatprep.mubr.f32.mxu0 %v7048_v3 }
 0x204   : > { %v6769_v54 = vpack.c.bf16 %v4711_v50, %v4679_v28  ;;  %v6777_v55 = vpack.c.bf16 %v4713_v51, %v4681_v35  ;;  %v4615_v59 = vmul.f32 0.2, %v3380_v8  ;;  %v4617_v60 = vmul.f32 0.2, %v3469_v23  ;;  %5094 = vmatprep.mubr.f32.mxu1 %v7048_v3 }
 0x205   : > { %v4616_v63 = vmul.f32 0.2, %v3382_v45  ;;  %v3471_v49 = vadd.f32 %v3470_v27, %v8230_v13  ;;  %v3385_v53 = vpop.f32.mrb[78].mxu0  ;;  %v3474_v48 = vpop.f32.mrb[78].mxu1  ;;  %v6767_v43 = vpack.c.bf16 %v4712_v20, %v4680_v42  ;;  %v6775_v26 = vpack.c.bf16 %v4714_v57, %v4682_v44 }
 0x206   : > { %v3386_v61 = vadd.f32 %v3385_v53, %v8240_v41  ;;  %v3475_v0 = vadd.f32 %v3474_v48, %v8240_v41  ;;  %v3387_v14 = vpop.f32.mrb[79].mxu0  ;;  %v3476_v16 = vpop.f32.mrb[79].mxu1  ;;  %v4743_v7 = vmax.f32 %v3380_v8, %v4615_v59  ;;  %v4745_v9 = vmax.f32 %v3469_v23, %v4617_v60 }
 0x207   : > { %v4618_v32 = vmul.f32 0.2, %v3471_v49  ;;  %v3388_v56 = vadd.f32 %v3387_v14, %v8240_v41  ;;  %v3477_v22 = vadd.f32 %v3476_v16, %v8240_v41  ;;  %6768 = vmatprep.subr.bf16.mxu0 %v6767_v43  ;;  %6776 = vmatprep.subr.bf16.mxu1 %v6775_v26  ;;  %v4744_v17 = vmax.f32 %v3382_v45, %v4616_v63 }
 0x208   : > { %v4647_v21 = vmul.f32 0.2, %v3386_v61  ;;  %v4649_v25 = vmul.f32 0.2, %v3475_v0  ;;  %6770 = vmatpush1.bf16.msra.mxu0 %v6769_v54  ;;  %6778 = vmatpush1.bf16.msra.mxu1 %v6777_v55 }
 0x209   : > { %v4746_v62 = vmax.f32 %v3471_v49, %v4618_v32  ;;  %v4648_v29 = vmul.f32 0.2, %v3388_v56  ;;  %v4650_v30 = vmul.f32 0.2, %v3477_v22  ;;  %v3545_v31 = vpop.f32.mrb[80].mxu0  ;;  %v3634_v10 = vpop.f32.mrb[80].mxu1 }
 0x20a   : > { %v4775_v33 = vmax.f32 %v3386_v61, %v4647_v21  ;;  %v4777_v1 = vmax.f32 %v3475_v0, %v4649_v25  ;;  %v3546_v15 = vadd.f32 %v3545_v31, %v8222_v58  ;;  %v3635_v34 = vadd.f32 %v3634_v10, %v8222_v58  ;;  %v3547_v36 = vpop.f32.mrb[81].mxu0  ;;  %v3636_v37 = vpop.f32.mrb[81].mxu1 }
 0x20b   : > { %v4776_v38 = vmax.f32 %v3388_v56, %v4648_v29  ;;  %v4778_v39 = vmax.f32 %v3477_v22, %v4650_v30  ;;  %v3548_v11 = vadd.f32 %v3547_v36, %v8222_v58  ;;  %v3637_v4 = vadd.f32 %v3636_v37, %v8222_v58 }
 0x20c   : > { %v6773_v28 = vpack.c.bf16 %v4775_v33, %v4743_v7  ;;  %v6781_v35 = vpack.c.bf16 %v4777_v1, %v4745_v9  ;;  %v4555_v40 = vmul.f32 0.2, %v3546_v15  ;;  %v4557_v5 = vmul.f32 0.2, %v3635_v34 }
 0x20d   : > { %v4556_v42 = vmul.f32 0.2, %v3548_v11  ;;  %v4558_v44 = vmul.f32 0.2, %v3637_v4  ;;  %v3551_v12 = vpop.f32.mrb[82].mxu0  ;;  %v3640_v47 = vpop.f32.mrb[82].mxu1  ;;  %v6771_v18 = vpack.c.bf16 %v4776_v38, %v4744_v17  ;;  %v6779_v46 = vpack.c.bf16 %v4778_v39, %v4746_v62 }
 0x20e   : > { %v3552_v50 = vadd.f32 %v3551_v12, %v8228_v19  ;;  %v3641_v51 = vadd.f32 %v3640_v47, %v8228_v19  ;;  %v3553_v8 = vpop.f32.mrb[83].mxu0  ;;  %v3642_v23 = vpop.f32.mrb[83].mxu1  ;;  %v4683_v20 = vmax.f32 %v3546_v15, %v4555_v40  ;;  %v4685_v57 = vmax.f32 %v3635_v34, %v4557_v5 }
 0x20f   : > { %v3554_v52 = vadd.f32 %v3553_v8, %v8228_v19  ;;  %v3643_v27 = vadd.f32 %v3642_v23, %v8228_v19  ;;  %6772 = vmatprep.subr.bf16.mxu0 %v6771_v18  ;;  %6780 = vmatprep.subr.bf16.mxu1 %v6779_v46  ;;  %v4684_v55 = vmax.f32 %v3548_v11, %v4556_v42 }
 0x210   : > { %v4587_v45 = vmul.f32 0.2, %v3552_v50  ;;  %v4589_v54 = vmul.f32 0.2, %v3641_v51  ;;  %6774 = vmatpush1.bf16.msra.mxu0 %v6773_v28  ;;  %v4686_v59 = vmax.f32 %v3637_v4, %v4558_v44  ;;  %6782 = vmatpush1.bf16.msra.mxu1 %v6781_v35 }
 0x211   : > { %v4588_v60 = vmul.f32 0.2, %v3554_v52  ;;  %v4590_v63 = vmul.f32 0.2, %v3643_v27  ;;  %v3557_v49 = vpop.f32.mrb[84].mxu0  ;;  %v3646_v53 = vpop.f32.mrb[84].mxu1 }
 0x212   : > { %v4715_v48 = vmax.f32 %v3552_v50, %v4587_v45  ;;  %v4717_v43 = vmax.f32 %v3641_v51, %v4589_v54  ;;  %v3558_v26 = vadd.f32 %v3557_v49, %v8230_v13  ;;  %v3647_v61 = vadd.f32 %v3646_v53, %v8230_v13  ;;  %v3559_v0 = vpop.f32.mrb[85].mxu0  ;;  %v3648_v14 = vpop.f32.mrb[85].mxu1 }
 0x213   : > { %v4716_v16 = vmax.f32 %v3554_v52, %v4588_v60  ;;  %v4718_v32 = vmax.f32 %v3643_v27, %v4590_v63  ;;  %6607 = vmatmul.mubr.msk.f32.vlgmr.msra.gmra.mrb[130].mxu0 %vm3110_vm8, %v8257_v24  ;;  %v3560_v56 = vadd.f32 %v3559_v0, %v8230_v13  ;;  %v3649_v22 = vadd.f32 %v3648_v14, %v8230_v13 }
 0x214   : > { %v6785_v7 = vpack.c.bf16 %v4715_v48, %v4683_v20  ;;  %v6793_v9 = vpack.c.bf16 %v4717_v43, %v4685_v57  ;;  %v4619_v21 = vmul.f32 0.2, %v3558_v26  ;;  %v4621_v25 = vmul.f32 0.2, %v3647_v61  ;;  %6608 = vmatmul.mubr.msk.f32.vlgmr.msra.gmra.mrb[130].mxu1 %vm3110_vm8, %v8257_v24  ;;  %5165 = vmatprep.mubr.f32.mxu0 %v7048_v3 }
 0x215   : > { %v4620_v17 = vmul.f32 0.2, %v3560_v56  ;;  %v4622_v62 = vmul.f32 0.2, %v3649_v22  ;;  %v3563_v29 = vpop.f32.mrb[86].mxu0  ;;  %v3652_v30 = vpop.f32.mrb[86].mxu1  ;;  %v6783_v31 = vpack.c.bf16 %v4716_v16, %v4684_v55  ;;  %v6791_v10 = vpack.c.bf16 %v4718_v32, %v4686_v59  ;;  %5236 = vmatprep.mubr.f32.mxu1 %v7048_v3 }
 0x216   : > { %v3564_v33 = vadd.f32 %v3563_v29, %v8240_v41  ;;  %v3653_v1 = vadd.f32 %v3652_v30, %v8240_v41  ;;  %v3565_v15 = vpop.f32.mrb[87].mxu0  ;;  %v3654_v34 = vpop.f32.mrb[87].mxu1  ;;  %v4747_v38 = vmax.f32 %v3558_v26, %v4619_v21  ;;  %v4749_v39 = vmax.f32 %v3647_v61, %v4621_v25 }
 0x217   : > { %v3566_v36 = vadd.f32 %v3565_v15, %v8240_v41  ;;  %v3655_v37 = vadd.f32 %v3654_v34, %v8240_v41  ;;  %6784 = vmatprep.subr.bf16.mxu0 %v6783_v31  ;;  %6792 = vmatprep.subr.bf16.mxu1 %v6791_v10  ;;  %v4748_v28 = vmax.f32 %v3560_v56, %v4620_v17 }
 0x218   : > { %v4651_v11 = vmul.f32 0.2, %v3564_v33  ;;  %v4653_v4 = vmul.f32 0.2, %v3653_v1  ;;  %6786 = vmatpush1.bf16.msra.mxu0 %v6785_v7  ;;  %v4750_v35 = vmax.f32 %v3649_v22, %v4622_v62  ;;  %6794 = vmatpush1.bf16.msra.mxu1 %v6793_v9 }
 0x219   : > { %v4652_v40 = vmul.f32 0.2, %v3566_v36  ;;  %v4654_v5 = vmul.f32 0.2, %v3655_v37  ;;  %v3723_v42 = vpop.f32.mrb[88].mxu0  ;;  %v3812_v44 = vpop.f32.mrb[88].mxu1 }
 0x21a   : > { %v4779_v12 = vmax.f32 %v3564_v33, %v4651_v11  ;;  %v4781_v47 = vmax.f32 %v3653_v1, %v4653_v4  ;;  %v3724_v18 = vadd.f32 %v3723_v42, %v8222_v58  ;;  %v3813_v46 = vadd.f32 %v3812_v44, %v8222_v58  ;;  %v3725_v50 = vpop.f32.mrb[89].mxu0  ;;  %v3814_v51 = vpop.f32.mrb[89].mxu1 }
 0x21b   : > { %v4780_v8 = vmax.f32 %v3566_v36, %v4652_v40  ;;  %v4782_v23 = vmax.f32 %v3655_v37, %v4654_v5  ;;  %v3726_v52 = vadd.f32 %v3725_v50, %v8222_v58  ;;  %v3815_v27 = vadd.f32 %v3814_v51, %v8222_v58 }
 0x21c   : > { %v6789_v20 = vpack.c.bf16 %v4779_v12, %v4747_v38  ;;  %v6797_v57 = vpack.c.bf16 %v4781_v47, %v4749_v39  ;;  %v4559_v45 = vmul.f32 0.2, %v3724_v18  ;;  %v4561_v54 = vmul.f32 0.2, %v3813_v46 }
 0x21d   : > { %v4560_v55 = vmul.f32 0.2, %v3726_v52  ;;  %v4562_v59 = vmul.f32 0.2, %v3815_v27  ;;  %v3729_v60 = vpop.f32.mrb[90].mxu0  ;;  %v3818_v63 = vpop.f32.mrb[90].mxu1  ;;  %v6787_v49 = vpack.c.bf16 %v4780_v8, %v4748_v28  ;;  %v6795_v53 = vpack.c.bf16 %v4782_v23, %v4750_v35 }
 0x21e   : > { %v3730_v48 = vadd.f32 %v3729_v60, %v8228_v19  ;;  %v3819_v43 = vadd.f32 %v3818_v63, %v8228_v19  ;;  %v3731_v26 = vpop.f32.mrb[91].mxu0  ;;  %v3820_v61 = vpop.f32.mrb[91].mxu1  ;;  %v4687_v16 = vmax.f32 %v3724_v18, %v4559_v45  ;;  %v4689_v32 = vmax.f32 %v3813_v46, %v4561_v54 }
 0x21f   : > { %v3732_v0 = vadd.f32 %v3731_v26, %v8228_v19  ;;  %v3821_v14 = vadd.f32 %v3820_v61, %v8228_v19  ;;  %6788 = vmatprep.subr.bf16.mxu0 %v6787_v49  ;;  %6796 = vmatprep.subr.bf16.mxu1 %v6795_v53  ;;  %v4688_v7 = vmax.f32 %v3726_v52, %v4560_v55 }
 0x220   : > { %v4591_v56 = vmul.f32 0.2, %v3730_v48  ;;  %v4593_v22 = vmul.f32 0.2, %v3819_v43  ;;  %6790 = vmatpush1.bf16.msra.mxu0 %v6789_v20  ;;  %v4690_v9 = vmax.f32 %v3815_v27, %v4562_v59  ;;  %6798 = vmatpush1.bf16.msra.mxu1 %v6797_v57 }
 0x221   : > { %v4592_v21 = vmul.f32 0.2, %v3732_v0  ;;  %v4594_v25 = vmul.f32 0.2, %v3821_v14  ;;  %v3735_v17 = vpop.f32.mrb[92].mxu0  ;;  %v3824_v62 = vpop.f32.mrb[92].mxu1 }
 0x222   : > { %v4719_v29 = vmax.f32 %v3730_v48, %v4591_v56  ;;  %v4721_v30 = vmax.f32 %v3819_v43, %v4593_v22  ;;  %v3736_v31 = vadd.f32 %v3735_v17, %v8230_v13  ;;  %v3825_v10 = vadd.f32 %v3824_v62, %v8230_v13  ;;  %v3737_v33 = vpop.f32.mrb[93].mxu0  ;;  %v3826_v1 = vpop.f32.mrb[93].mxu1 }
 0x223   : > { %v4720_v15 = vmax.f32 %v3732_v0, %v4592_v21  ;;  %v4722_v34 = vmax.f32 %v3821_v14, %v4594_v25  ;;  %6609 = vmatmul.mubr.msk.f32.vlgmr.msra.gmra.mrb[132].mxu0 %vm3110_vm8, %v8257_v24  ;;  %v3738_v36 = vadd.f32 %v3737_v33, %v8230_v13  ;;  %v3827_v37 = vadd.f32 %v3826_v1, %v8230_v13 }
 0x224   : > { %v6801_v38 = vpack.c.bf16 %v4719_v29, %v4687_v16  ;;  %v6809_v39 = vpack.c.bf16 %v4721_v30, %v4689_v32  ;;  %v4623_v11 = vmul.f32 0.2, %v3736_v31  ;;  %v4625_v4 = vmul.f32 0.2, %v3825_v10  ;;  %6610 = vmatmul.mubr.msk.f32.vlgmr.msra.gmra.mrb[132].mxu1 %vm3110_vm8, %v8257_v24  ;;  %5307 = vmatprep.mubr.f32.mxu0 %v7048_v3 }
 0x225   : > { %v4624_v28 = vmul.f32 0.2, %v3738_v36  ;;  %v4626_v35 = vmul.f32 0.2, %v3827_v37  ;;  %v3741_v40 = vpop.f32.mrb[94].mxu0  ;;  %v3830_v5 = vpop.f32.mrb[94].mxu1  ;;  %v6799_v42 = vpack.c.bf16 %v4720_v15, %v4688_v7  ;;  %v6807_v44 = vpack.c.bf16 %v4722_v34, %v4690_v9  ;;  %5378 = vmatprep.mubr.f32.mxu1 %v7048_v3 }
 0x226   : > { %v3742_v12 = vadd.f32 %v3741_v40, %v8240_v41  ;;  %v3831_v47 = vadd.f32 %v3830_v5, %v8240_v41  ;;  %v3743_v18 = vpop.f32.mrb[95].mxu0  ;;  %v3832_v46 = vpop.f32.mrb[95].mxu1  ;;  %v4751_v8 = vmax.f32 %v3736_v31, %v4623_v11  ;;  %v4753_v23 = vmax.f32 %v3825_v10, %v4625_v4 }
 0x227   : > { %v3744_v50 = vadd.f32 %v3743_v18, %v8240_v41  ;;  %v3833_v51 = vadd.f32 %v3832_v46, %v8240_v41  ;;  %6800 = vmatprep.subr.bf16.mxu0 %v6799_v42  ;;  %6808 = vmatprep.subr.bf16.mxu1 %v6807_v44  ;;  %v4752_v20 = vmax.f32 %v3738_v36, %v4624_v28 }
 0x228   : > { %v4655_v52 = vmul.f32 0.2, %v3742_v12  ;;  %v4657_v27 = vmul.f32 0.2, %v3831_v47  ;;  %6802 = vmatpush1.bf16.msra.mxu0 %v6801_v38  ;;  %v4754_v57 = vmax.f32 %v3827_v37, %v4626_v35  ;;  %6810 = vmatpush1.bf16.msra.mxu1 %v6809_v39 }
 0x229   : > { %v4656_v45 = vmul.f32 0.2, %v3744_v50  ;;  %v4658_v54 = vmul.f32 0.2, %v3833_v51  ;;  %v3901_v55 = vpop.f32.mrb[96].mxu0  ;;  %v3990_v59 = vpop.f32.mrb[96].mxu1 }
 0x22a   : > { %v4783_v60 = vmax.f32 %v3742_v12, %v4655_v52  ;;  %v4785_v63 = vmax.f32 %v3831_v47, %v4657_v27  ;;  %v3902_v49 = vadd.f32 %v3901_v55, %v8222_v58  ;;  %v3991_v53 = vadd.f32 %v3990_v59, %v8222_v58  ;;  %v3903_v48 = vpop.f32.mrb[97].mxu0  ;;  %v3992_v43 = vpop.f32.mrb[97].mxu1 }
 0x22b   : > { %v4784_v26 = vmax.f32 %v3744_v50, %v4656_v45  ;;  %v4786_v61 = vmax.f32 %v3833_v51, %v4658_v54  ;;  %v3904_v0 = vadd.f32 %v3903_v48, %v8222_v58  ;;  %v3993_v14 = vadd.f32 %v3992_v43, %v8222_v58 }
 0x22c   : > { %v6805_v16 = vpack.c.bf16 %v4783_v60, %v4751_v8  ;;  %v6813_v32 = vpack.c.bf16 %v4785_v63, %v4753_v23  ;;  %v4563_v56 = vmul.f32 0.2, %v3902_v49  ;;  %v4565_v22 = vmul.f32 0.2, %v3991_v53 }
 0x22d   : > { %v4564_v7 = vmul.f32 0.2, %v3904_v0  ;;  %v4566_v9 = vmul.f32 0.2, %v3993_v14  ;;  %v3907_v21 = vpop.f32.mrb[98].mxu0  ;;  %v3996_v25 = vpop.f32.mrb[98].mxu1  ;;  %v6803_v17 = vpack.c.bf16 %v4784_v26, %v4752_v20  ;;  %v6811_v62 = vpack.c.bf16 %v4786_v61, %v4754_v57 }
 0x22e   : > { %v3908_v29 = vadd.f32 %v3907_v21, %v8228_v19  ;;  %v3997_v30 = vadd.f32 %v3996_v25, %v8228_v19  ;;  %v3909_v31 = vpop.f32.mrb[99].mxu0  ;;  %v3998_v10 = vpop.f32.mrb[99].mxu1  ;;  %v4691_v15 = vmax.f32 %v3902_v49, %v4563_v56  ;;  %v4693_v34 = vmax.f32 %v3991_v53, %v4565_v22 }
 0x22f   : > { %v3910_v33 = vadd.f32 %v3909_v31, %v8228_v19  ;;  %v3999_v1 = vadd.f32 %v3998_v10, %v8228_v19  ;;  %6804 = vmatprep.subr.bf16.mxu0 %v6803_v17  ;;  %6812 = vmatprep.subr.bf16.mxu1 %v6811_v62  ;;  %v4692_v38 = vmax.f32 %v3904_v0, %v4564_v7 }
 0x230   : > { %v4595_v36 = vmul.f32 0.2, %v3908_v29  ;;  %v4597_v37 = vmul.f32 0.2, %v3997_v30  ;;  %6806 = vmatpush1.bf16.msra.mxu0 %v6805_v16  ;;  %v4694_v39 = vmax.f32 %v3993_v14, %v4566_v9  ;;  %6814 = vmatpush1.bf16.msra.mxu1 %v6813_v32 }
 0x231   : > { %v4596_v11 = vmul.f32 0.2, %v3910_v33  ;;  %v4598_v4 = vmul.f32 0.2, %v3999_v1  ;;  %v3913_v28 = vpop.f32.mrb[100].mxu0  ;;  %v4002_v35 = vpop.f32.mrb[100].mxu1 }
 0x232   : > { %v4723_v40 = vmax.f32 %v3908_v29, %v4595_v36  ;;  %v4725_v5 = vmax.f32 %v3997_v30, %v4597_v37  ;;  %v3914_v42 = vadd.f32 %v3913_v28, %v8230_v13  ;;  %v4003_v44 = vadd.f32 %v4002_v35, %v8230_v13  ;;  %v3915_v12 = vpop.f32.mrb[101].mxu0  ;;  %v4004_v47 = vpop.f32.mrb[101].mxu1 }
 0x233   : > { %v4724_v18 = vmax.f32 %v3910_v33, %v4596_v11  ;;  %v4726_v46 = vmax.f32 %v3999_v1, %v4598_v4  ;;  %v3916_v50 = vadd.f32 %v3915_v12, %v8230_v13  ;;  %v4005_v51 = vadd.f32 %v4004_v47, %v8230_v13  ;;  %6611 = vmatmul.mubr.msk.f32.vlgmr.msra.gmra.mrb[134].mxu0 %vm3110_vm8, %v8257_v24 }
 0x234   : > { %v6817_v8 = vpack.c.bf16 %v4723_v40, %v4691_v15  ;;  %v6825_v23 = vpack.c.bf16 %v4725_v5, %v4693_v34  ;;  %v4627_v52 = vmul.f32 0.2, %v3914_v42  ;;  %v4629_v27 = vmul.f32 0.2, %v4003_v44  ;;  %6612 = vmatmul.mubr.msk.f32.vlgmr.msra.gmra.mrb[134].mxu1 %vm3110_vm8, %v8257_v24  ;;  %5449 = vmatprep.mubr.f32.mxu0 %v7048_v3 }
 0x235   : > { %v4628_v20 = vmul.f32 0.2, %v3916_v50  ;;  %v4630_v57 = vmul.f32 0.2, %v4005_v51  ;;  %v3919_v45 = vpop.f32.mrb[102].mxu0  ;;  %v4008_v54 = vpop.f32.mrb[102].mxu1  ;;  %v6815_v55 = vpack.c.bf16 %v4724_v18, %v4692_v38  ;;  %v6823_v59 = vpack.c.bf16 %v4726_v46, %v4694_v39  ;;  %5520 = vmatprep.mubr.f32.mxu1 %v7048_v3 }
 0x236   : > { %v3920_v60 = vadd.f32 %v3919_v45, %v8240_v41  ;;  %v4009_v63 = vadd.f32 %v4008_v54, %v8240_v41  ;;  %v3921_v49 = vpop.f32.mrb[103].mxu0  ;;  %v4010_v53 = vpop.f32.mrb[103].mxu1  ;;  %v4755_v26 = vmax.f32 %v3914_v42, %v4627_v52  ;;  %v4757_v61 = vmax.f32 %v4003_v44, %v4629_v27 }
 0x237   : > { %v3922_v48 = vadd.f32 %v3921_v49, %v8240_v41  ;;  %v4011_v43 = vadd.f32 %v4010_v53, %v8240_v41  ;;  %6816 = vmatprep.subr.bf16.mxu0 %v6815_v55  ;;  %6824 = vmatprep.subr.bf16.mxu1 %v6823_v59  ;;  %v4756_v16 = vmax.f32 %v3916_v50, %v4628_v20 }
 0x238   : > { %v4659_v0 = vmul.f32 0.2, %v3920_v60  ;;  %v4661_v14 = vmul.f32 0.2, %v4009_v63  ;;  %6818 = vmatpush1.bf16.msra.mxu0 %v6817_v8  ;;  %v4758_v32 = vmax.f32 %v4005_v51, %v4630_v57  ;;  %6826 = vmatpush1.bf16.msra.mxu1 %v6825_v23 }
 0x239   : > { %v4660_v56 = vmul.f32 0.2, %v3922_v48  ;;  %v4662_v22 = vmul.f32 0.2, %v4011_v43  ;;  %v4079_v7 = vpop.f32.mrb[104].mxu0  ;;  %v4168_v9 = vpop.f32.mrb[104].mxu1 }
 0x23a   : > { %v4787_v21 = vmax.f32 %v3920_v60, %v4659_v0  ;;  %v4789_v25 = vmax.f32 %v4009_v63, %v4661_v14  ;;  %v4080_v17 = vadd.f32 %v4079_v7, %v8222_v58  ;;  %v4169_v62 = vadd.f32 %v4168_v9, %v8222_v58  ;;  %v4081_v29 = vpop.f32.mrb[105].mxu0  ;;  %v4170_v30 = vpop.f32.mrb[105].mxu1 }
 0x23b   : > { %v4788_v31 = vmax.f32 %v3922_v48, %v4660_v56  ;;  %v4790_v10 = vmax.f32 %v4011_v43, %v4662_v22  ;;  %v4082_v33 = vadd.f32 %v4081_v29, %v8222_v58  ;;  %v4171_v1 = vadd.f32 %v4170_v30, %v8222_v58 }
 0x23c   : > { %v6821_v15 = vpack.c.bf16 %v4787_v21, %v4755_v26  ;;  %v6829_v34 = vpack.c.bf16 %v4789_v25, %v4757_v61  ;;  %v4567_v36 = vmul.f32 0.2, %v4080_v17  ;;  %v4569_v37 = vmul.f32 0.2, %v4169_v62 }
 0x23d   : > { %v4568_v38 = vmul.f32 0.2, %v4082_v33  ;;  %v4570_v39 = vmul.f32 0.2, %v4171_v1  ;;  %v4085_v11 = vpop.f32.mrb[106].mxu0  ;;  %v4174_v4 = vpop.f32.mrb[106].mxu1  ;;  %v6819_v28 = vpack.c.bf16 %v4788_v31, %v4756_v16  ;;  %v6827_v35 = vpack.c.bf16 %v4790_v10, %v4758_v32 }
 0x23e   : > { %v4086_v40 = vadd.f32 %v4085_v11, %v8228_v19  ;;  %v4175_v5 = vadd.f32 %v4174_v4, %v8228_v19  ;;  %v4087_v42 = vpop.f32.mrb[107].mxu0  ;;  %v4176_v44 = vpop.f32.mrb[107].mxu1  ;;  %v4695_v18 = vmax.f32 %v4080_v17, %v4567_v36  ;;  %v4697_v46 = vmax.f32 %v4169_v62, %v4569_v37 }
 0x23f   : > { %v4088_v12 = vadd.f32 %v4087_v42, %v8228_v19  ;;  %v4177_v47 = vadd.f32 %v4176_v44, %v8228_v19  ;;  %6820 = vmatprep.subr.bf16.mxu0 %v6819_v28  ;;  %6828 = vmatprep.subr.bf16.mxu1 %v6827_v35  ;;  %v4696_v8 = vmax.f32 %v4082_v33, %v4568_v38 }
 0x240   : > { %v4599_v50 = vmul.f32 0.2, %v4086_v40  ;;  %v4601_v51 = vmul.f32 0.2, %v4175_v5  ;;  %6822 = vmatpush1.bf16.msra.mxu0 %v6821_v15  ;;  %v4698_v23 = vmax.f32 %v4171_v1, %v4570_v39  ;;  %6830 = vmatpush1.bf16.msra.mxu1 %v6829_v34 }
 0x241   : > { %v4600_v52 = vmul.f32 0.2, %v4088_v12  ;;  %v4602_v27 = vmul.f32 0.2, %v4177_v47  ;;  %v4091_v20 = vpop.f32.mrb[108].mxu0  ;;  %v4180_v57 = vpop.f32.mrb[108].mxu1 }
 0x242   : > { %v4727_v45 = vmax.f32 %v4086_v40, %v4599_v50  ;;  %v4729_v54 = vmax.f32 %v4175_v5, %v4601_v51  ;;  %v4092_v55 = vadd.f32 %v4091_v20, %v8230_v13  ;;  %v4181_v59 = vadd.f32 %v4180_v57, %v8230_v13  ;;  %v4093_v60 = vpop.f32.mrb[109].mxu0  ;;  %v4182_v63 = vpop.f32.mrb[109].mxu1 }
 0x243   : > { %v4728_v49 = vmax.f32 %v4088_v12, %v4600_v52  ;;  %v4730_v53 = vmax.f32 %v4177_v47, %v4602_v27  ;;  %v4094_v48 = vadd.f32 %v4093_v60, %v8230_v13  ;;  %v4183_v43 = vadd.f32 %v4182_v63, %v8230_v13  ;;  %6613 = vmatmul.mubr.msk.f32.vlgmr.msra.gmra.mrb[136].mxu0 %vm3110_vm8, %v8257_v24 }
 0x244   : > { %v6833_v26 = vpack.c.bf16 %v4727_v45, %v4695_v18  ;;  %v6841_v61 = vpack.c.bf16 %v4729_v54, %v4697_v46  ;;  %v4631_v0 = vmul.f32 0.2, %v4092_v55  ;;  %v4633_v14 = vmul.f32 0.2, %v4181_v59  ;;  %6614 = vmatmul.mubr.msk.f32.vlgmr.msra.gmra.mrb[136].mxu1 %vm3110_vm8, %v8257_v24  ;;  %5591 = vmatprep.mubr.f32.mxu0 %v7048_v3 }
 0x245   : > { %v4632_v16 = vmul.f32 0.2, %v4094_v48  ;;  %v4634_v32 = vmul.f32 0.2, %v4183_v43  ;;  %v4097_v56 = vpop.f32.mrb[110].mxu0  ;;  %v4186_v22 = vpop.f32.mrb[110].mxu1  ;;  %v6831_v7 = vpack.c.bf16 %v4728_v49, %v4696_v8  ;;  %v6839_v9 = vpack.c.bf16 %v4730_v53, %v4698_v23  ;;  %5662 = vmatprep.mubr.f32.mxu1 %v7048_v3 }
 0x246   : > { %v4098_v21 = vadd.f32 %v4097_v56, %v8240_v41  ;;  %v4187_v25 = vadd.f32 %v4186_v22, %v8240_v41  ;;  %v4099_v17 = vpop.f32.mrb[111].mxu0  ;;  %v4188_v62 = vpop.f32.mrb[111].mxu1  ;;  %v4759_v31 = vmax.f32 %v4092_v55, %v4631_v0  ;;  %v4761_v10 = vmax.f32 %v4181_v59, %v4633_v14 }
 0x247   : > { %v4100_v29 = vadd.f32 %v4099_v17, %v8240_v41  ;;  %v4189_v30 = vadd.f32 %v4188_v62, %v8240_v41  ;;  %6832 = vmatprep.subr.bf16.mxu0 %v6831_v7  ;;  %6840 = vmatprep.subr.bf16.mxu1 %v6839_v9  ;;  %v4760_v15 = vmax.f32 %v4094_v48, %v4632_v16 }
 0x248   : > { %v4663_v33 = vmul.f32 0.2, %v4098_v21  ;;  %v4665_v1 = vmul.f32 0.2, %v4187_v25  ;;  %6834 = vmatpush1.bf16.msra.mxu0 %v6833_v26  ;;  %v4762_v34 = vmax.f32 %v4183_v43, %v4634_v32  ;;  %6842 = vmatpush1.bf16.msra.mxu1 %v6841_v61 }
 0x249   : > { %v4664_v36 = vmul.f32 0.2, %v4100_v29  ;;  %v4666_v37 = vmul.f32 0.2, %v4189_v30  ;;  %v4257_v38 = vpop.f32.mrb[112].mxu0  ;;  %v4346_v39 = vpop.f32.mrb[112].mxu1 }
 0x24a   : > { %v4791_v11 = vmax.f32 %v4098_v21, %v4663_v33  ;;  %v4793_v4 = vmax.f32 %v4187_v25, %v4665_v1  ;;  %v4258_v28 = vadd.f32 %v4257_v38, %v8222_v58  ;;  %v4347_v35 = vadd.f32 %v4346_v39, %v8222_v58  ;;  %v4259_v40 = vpop.f32.mrb[113].mxu0  ;;  %v4348_v5 = vpop.f32.mrb[113].mxu1 }
 0x24b   : > { %v4792_v42 = vmax.f32 %v4100_v29, %v4664_v36  ;;  %v4794_v44 = vmax.f32 %v4189_v30, %v4666_v37  ;;  %v4260_v12 = vadd.f32 %v4259_v40, %v8222_v58  ;;  %v4349_v47 = vadd.f32 %v4348_v5, %v8222_v58 }
 0x24c   : > { %v6837_v18 = vpack.c.bf16 %v4791_v11, %v4759_v31  ;;  %v6845_v46 = vpack.c.bf16 %v4793_v4, %v4761_v10  ;;  %v4571_v50 = vmul.f32 0.2, %v4258_v28  ;;  %v4573_v51 = vmul.f32 0.2, %v4347_v35 }
 0x24d   : > { %v4572_v8 = vmul.f32 0.2, %v4260_v12  ;;  %v4574_v23 = vmul.f32 0.2, %v4349_v47  ;;  %v4263_v52 = vpop.f32.mrb[114].mxu0  ;;  %v4352_v27 = vpop.f32.mrb[114].mxu1  ;;  %v6835_v20 = vpack.c.bf16 %v4792_v42, %v4760_v15  ;;  %v6843_v57 = vpack.c.bf16 %v4794_v44, %v4762_v34 }
 0x24e   : > { %v4264_v45 = vadd.f32 %v4263_v52, %v8228_v19  ;;  %v4353_v54 = vadd.f32 %v4352_v27, %v8228_v19  ;;  %v4265_v55 = vpop.f32.mrb[115].mxu0  ;;  %v4354_v59 = vpop.f32.mrb[115].mxu1  ;;  %v4699_v49 = vmax.f32 %v4258_v28, %v4571_v50  ;;  %v4701_v53 = vmax.f32 %v4347_v35, %v4573_v51 }
 0x24f   : > { %v4266_v60 = vadd.f32 %v4265_v55, %v8228_v19  ;;  %v4355_v63 = vadd.f32 %v4354_v59, %v8228_v19  ;;  %6836 = vmatprep.subr.bf16.mxu0 %v6835_v20  ;;  %6844 = vmatprep.subr.bf16.mxu1 %v6843_v57  ;;  %v4700_v26 = vmax.f32 %v4260_v12, %v4572_v8 }
 0x250   : > { %v4603_v48 = vmul.f32 0.2, %v4264_v45  ;;  %v4605_v43 = vmul.f32 0.2, %v4353_v54  ;;  %6838 = vmatpush1.bf16.msra.mxu0 %v6837_v18  ;;  %v4702_v61 = vmax.f32 %v4349_v47, %v4574_v23  ;;  %6846 = vmatpush1.bf16.msra.mxu1 %v6845_v46 }
 0x251   : > { %v4604_v0 = vmul.f32 0.2, %v4266_v60  ;;  %v4606_v14 = vmul.f32 0.2, %v4355_v63  ;;  %v4269_v16 = vpop.f32.mrb[116].mxu0  ;;  %v4358_v32 = vpop.f32.mrb[116].mxu1 }
 0x252   : > { %v4731_v56 = vmax.f32 %v4264_v45, %v4603_v48  ;;  %v4733_v22 = vmax.f32 %v4353_v54, %v4605_v43  ;;  %v4270_v7 = vadd.f32 %v4269_v16, %v8230_v13  ;;  %v4359_v9 = vadd.f32 %v4358_v32, %v8230_v13  ;;  %v4271_v21 = vpop.f32.mrb[117].mxu0  ;;  %v4360_v25 = vpop.f32.mrb[117].mxu1 }
 0x253   : > { %v4732_v17 = vmax.f32 %v4266_v60, %v4604_v0  ;;  %v4734_v62 = vmax.f32 %v4355_v63, %v4606_v14  ;;  %v4272_v29 = vadd.f32 %v4271_v21, %v8230_v13  ;;  %v4361_v30 = vadd.f32 %v4360_v25, %v8230_v13  ;;  %6615 = vmatmul.mubr.msk.f32.vlgmr.msra.gmra.mrb[138].mxu0 %vm3110_vm8, %v8257_v24 }
 0x254   : > { %v6849_v31 = vpack.c.bf16 %v4731_v56, %v4699_v49  ;;  %v6857_v10 = vpack.c.bf16 %v4733_v22, %v4701_v53  ;;  %v4635_v33 = vmul.f32 0.2, %v4270_v7  ;;  %v4637_v1 = vmul.f32 0.2, %v4359_v9  ;;  %6616 = vmatmul.mubr.msk.f32.vlgmr.msra.gmra.mrb[138].mxu1 %vm3110_vm8, %v8257_v24  ;;  %5733 = vmatprep.mubr.f32.mxu0 %v7048_v3 }
 0x255   : > { %v4636_v15 = vmul.f32 0.2, %v4272_v29  ;;  %v4638_v34 = vmul.f32 0.2, %v4361_v30  ;;  %v4275_v36 = vpop.f32.mrb[118].mxu0  ;;  %v4364_v37 = vpop.f32.mrb[118].mxu1  ;;  %v6847_v38 = vpack.c.bf16 %v4732_v17, %v4700_v26  ;;  %v6855_v39 = vpack.c.bf16 %v4734_v62, %v4702_v61  ;;  %5804 = vmatprep.mubr.f32.mxu1 %v7048_v3 }
 0x256   : > { %v4276_v11 = vadd.f32 %v4275_v36, %v8240_v41  ;;  %v4365_v4 = vadd.f32 %v4364_v37, %v8240_v41  ;;  %v4277_v28 = vpop.f32.mrb[119].mxu0  ;;  %v4366_v35 = vpop.f32.mrb[119].mxu1  ;;  %v4763_v5 = vmax.f32 %v4270_v7, %v4635_v33  ;;  %v4765_v42 = vmax.f32 %v4359_v9, %v4637_v1 }
 0x257   : > { %v4278_v40 = vadd.f32 %v4277_v28, %v8240_v41  ;;  %v4367_v24 = vadd.f32 %v4366_v35, %v8240_v41  ;;  %6848 = vmatprep.subr.bf16.mxu0 %v6847_v38  ;;  %6856 = vmatprep.subr.bf16.mxu1 %v6855_v39  ;;  %v4764_v47 = vmax.f32 %v4272_v29, %v4636_v15  ;;  %v7039_v35 = vld [vmem:[%s8488_s5] sm:$0x1] }
 0x258   : > { %v4667_v44 = vmul.f32 0.2, %v4276_v11  ;;  %v4669_v12 = vmul.f32 0.2, %v4365_v4  ;;  %6850 = vmatpush1.bf16.msra.mxu0 %v6849_v31  ;;  %v4766_v18 = vmax.f32 %v4361_v30, %v4638_v34  ;;  %6858 = vmatpush1.bf16.msra.mxu1 %v6857_v10 }
 0x259   : > { %v4668_v46 = vmul.f32 0.2, %v4278_v40  ;;  %v4670_v50 = vmul.f32 0.2, %v4367_v24  ;;  %v4435_v51 = vpop.f32.mrb[120].mxu0  ;;  %v4524_v8 = vpop.f32.mrb[120].mxu1 }
 0x25a   : > { %v4795_v23 = vmax.f32 %v4276_v11, %v4667_v44  ;;  %v4797_v52 = vmax.f32 %v4365_v4, %v4669_v12  ;;  %v4436_v27 = vadd.f32 %v4435_v51, %v8222_v58  ;;  %v4525_v20 = vadd.f32 %v4524_v8, %v8222_v58  ;;  %v4437_v57 = vpop.f32.mrb[121].mxu0  ;;  %v4526_v45 = vpop.f32.mrb[121].mxu1 }
 0x25b   : > { %v4796_v54 = vmax.f32 %v4278_v40, %v4668_v46  ;;  %v4798_v55 = vmax.f32 %v4367_v24, %v4670_v50  ;;  %v4438_v59 = vadd.f32 %v4437_v57, %v8222_v58  ;;  %v4527_v60 = vadd.f32 %v4526_v45, %v8222_v58 }
 0x25c   : > { %v6853_v63 = vpack.c.bf16 %v4795_v23, %v4763_v5  ;;  %v6861_v49 = vpack.c.bf16 %v4797_v52, %v4765_v42  ;;  %v4575_v53 = vmul.f32 0.2, %v4436_v27  ;;  %v4577_v48 = vmul.f32 0.2, %v4525_v20 }
 0x25d   : > { %v4576_v43 = vmul.f32 0.2, %v4438_v59  ;;  %v4578_v26 = vmul.f32 0.2, %v4527_v60  ;;  %v4441_v61 = vpop.f32.mrb[122].mxu0  ;;  %v4530_v0 = vpop.f32.mrb[122].mxu1  ;;  %v6851_v14 = vpack.c.bf16 %v4796_v54, %v4764_v47  ;;  %v6859_v16 = vpack.c.bf16 %v4798_v55, %v4766_v18 }
 0x25e   : > { %v4442_v32 = vadd.f32 %v4441_v61, %v8228_v19  ;;  %v4531_v56 = vadd.f32 %v4530_v0, %v8228_v19  ;;  %v4443_v22 = vpop.f32.mrb[123].mxu0  ;;  %v4532_v7 = vpop.f32.mrb[123].mxu1  ;;  %v4703_v21 = vmax.f32 %v4436_v27, %v4575_v53  ;;  %v4705_v25 = vmax.f32 %v4525_v20, %v4577_v48 }
 0x25f   : > { %v4444_v9 = vadd.f32 %v4443_v22, %v8228_v19  ;;  %v4533_v58 = vadd.f32 %v4532_v7, %v8228_v19  ;;  %6852 = vmatprep.subr.bf16.mxu0 %v6851_v14  ;;  %6860 = vmatprep.subr.bf16.mxu1 %v6859_v16  ;;  %v4704_v29 = vmax.f32 %v4438_v59, %v4576_v43  ;;  %v4808_v0 = vpop.permute.xlu0 %4807 }
 0x260   : > { %v4607_v17 = vmul.f32 0.2, %v4442_v32  ;;  %v4609_v62 = vmul.f32 0.2, %v4531_v56  ;;  %6854 = vmatpush1.bf16.msra.mxu0 %v6853_v63  ;;  %v4706_v30 = vmax.f32 %v4527_v60, %v4578_v26  ;;  %6862 = vmatpush1.bf16.msra.mxu1 %v6861_v49  ;;  %v8409_v14 = vrot.slane %v4808_v0, %v7127_v6 }
 0x261   : > { %v4608_v31 = vmul.f32 0.2, %v4444_v9  ;;  %v4610_v10 = vmul.f32 0.2, %v4533_v58  ;;  %v4447_v33 = vpop.f32.mrb[124].mxu0  ;;  %v4536_v1 = vpop.f32.mrb[124].mxu1 }
 0x262   : > { %v4735_v15 = vmax.f32 %v4442_v32, %v4607_v17  ;;  %v4737_v34 = vmax.f32 %v4531_v56, %v4609_v62  ;;  %v4448_v36 = vadd.f32 %v4447_v33, %v8230_v13  ;;  %v4537_v19 = vadd.f32 %v4536_v1, %v8230_v13  ;;  %v4449_v37 = vpop.f32.mrb[125].mxu0  ;;  %v4538_v38 = vpop.f32.mrb[125].mxu1 }
 0x263   : > { %v4736_v39 = vmax.f32 %v4444_v9, %v4608_v31  ;;  %v4738_v11 = vmax.f32 %v4533_v58, %v4610_v10  ;;  %v4450_v4 = vadd.f32 %v4449_v37, %v8230_v13  ;;  %v4539_v28 = vadd.f32 %v4538_v38, %v8230_v13  ;;  %6617 = vmatmul.mubr.msk.f32.vlgmr.msra.gmra.mrb[140].mxu0 %vm3110_vm8, %v7039_v35 }
 0x264   : > { %v6865_v40 = vpack.c.bf16 %v4735_v15, %v4703_v21  ;;  %v6873_v24 = vpack.c.bf16 %v4737_v34, %v4705_v25  ;;  %6618 = vmatmul.mubr.msk.f32.vlgmr.msra.gmra.mrb[140].mxu1 %vm3110_vm8, %v7039_v35  ;;  %5875 = vmatprep.mubr.f32.mxu0 %v7048_v3  ;;  %v4639_v47 = vmul.f32 0.2, %v4448_v36  ;;  %v4641_v13 = vmul.f32 0.2, %v4537_v19 }
 0x265   : > { %v4453_v5 = vpop.f32.mrb[126].mxu0  ;;  %v4542_v42 = vpop.f32.mrb[126].mxu1  ;;  %v6863_v44 = vpack.c.bf16 %v4736_v39, %v4704_v29  ;;  %v6871_v12 = vpack.c.bf16 %v4738_v11, %v4706_v30  ;;  %5946 = vmatprep.mubr.f32.mxu1 %v7048_v3  ;;  %v4640_v8 = vmul.f32 0.2, %v4450_v4  ;;  %v4642_v23 = vmul.f32 0.2, %v4539_v28 }
 0x266   : > { %v4454_v18 = vadd.f32 %v4453_v5, %v8240_v41  ;;  %v4543_v46 = vadd.f32 %v4542_v42, %v8240_v41  ;;  %v4455_v50 = vpop.f32.mrb[127].mxu0  ;;  %v4544_v51 = vpop.f32.mrb[127].mxu1  ;;  %v4767_v54 = vmax.f32 %v4448_v36, %v4639_v47  ;;  %v4769_v55 = vmax.f32 %v4537_v19, %v4641_v13 }
 0x267   : > { %v4456_v52 = vadd.f32 %v4455_v50, %v8240_v41  ;;  %v4545_v27 = vadd.f32 %v4544_v51, %v8240_v41  ;;  %6864 = vmatprep.subr.bf16.mxu0 %v6863_v44  ;;  %6872 = vmatprep.subr.bf16.mxu1 %v6871_v12  ;;  %v4768_v63 = vmax.f32 %v4450_v4, %v4640_v8  ;;  %v7050_v50 = vmov 1966171168  }
 0x268   : > { %v4671_v20 = vmul.f32 0.2, %v4454_v18  ;;  %v4673_v57 = vmul.f32 0.2, %v4543_v46  ;;  %6866 = vmatpush1.bf16.msra.mxu0 %v6865_v40  ;;  %6874 = vmatpush1.bf16.msra.mxu1 %v6873_v24  ;;  %v4770_v49 = vmax.f32 %v4539_v28, %v4642_v23  ;;  %v6182_v51 = vunpack.c.l.s4 %v7050_v50 }
 0x269   : > { %v4672_v3 = vmul.f32 0.2, %v4456_v52  ;;  %v4674_v45 = vmul.f32 0.2, %v4545_v27 }
 0x26a   : > { %v4799_v59 = vmax.f32 %v4454_v18, %v4671_v20  ;;  %v4801_v60 = vmax.f32 %v4543_v46, %v4673_v57  ;;  %v6183_v23 = vunpack.c.0.s8 %v6182_v51 }
 0x26b   : > { %v4800_v53 = vmax.f32 %v4456_v52, %v4672_v3  ;;  %v4802_v48 = vmax.f32 %v4545_v27, %v4674_v45 }
 0x26c   : > { %v6869_v43 = vpack.c.bf16 %v4799_v59, %v4767_v54  ;;  %v6877_v26 = vpack.c.bf16 %v4801_v60, %v4769_v55  ;;  %v8420_v20 = vsub.s32 %v6183_v23, %v7102_v2 }
 0x26d   : > { %v6867_v61 = vpack.c.bf16 %v4800_v53, %v4768_v63  ;;  %v6875_v41 = vpack.c.bf16 %v4802_v48, %v4770_v49 }
 0x26f   : > { %6868 = vmatprep.subr.bf16.mxu0 %v6867_v61  ;;  %6876 = vmatprep.subr.bf16.mxu1 %v6875_v41 }
 0x270   : > { %6870 = vmatpush1.bf16.msra.mxu0 %v6869_v43  ;;  %6878 = vmatpush1.bf16.msra.mxu1 %v6877_v26 }
 0x273   : > { %6619 = vmatmul.mubr.msk.f32.vlgmr.msra.gmra.mrb[142].mxu0 %vm3110_vm8, %v7039_v35  ;;  %6620 = vmatmul.mubr.msk.f32.vlgmr.msra.gmra.mrb[142].mxu1 %vm3110_vm8, %v7039_v35 }
 0x2d5   : > { %v4883_v16 = vpop.f32.mrb[128].mxu0 }
 0x2d6   : > { %v4954_v32 = vpop.f32.mrb[128].mxu1  ;;  %v4884_v56 = vadd.f32 %v4883_v16, %v8409_v14  ;;  %v4885_v7 = vpop.f32.mrb[129].mxu0 }
 0x2d7   : > { %v4955_v22 = vadd.f32 %v4954_v32, %v8409_v14  ;;  %v4956_v9 = vpop.f32.mrb[129].mxu1  ;;  %v4886_v58 = vadd.f32 %v4885_v7, %v8409_v14 }
 0x2d8   : > { %v4957_v21 = vadd.f32 %v4956_v9, %v8409_v14  ;;  %v5953_v25 = vsub.f32 0.0, %v4884_v56 }
 0x2d9   : > { %v5955_v17 = vsub.f32 0.0, %v4955_v22  ;;  %v5954_v62 = vsub.f32 0.0, %v4886_v58 }
 0x2da   : > { %v5956_v29 = vsub.f32 0.0, %v4957_v21  ;;  %v5985_v30 = vmul.f32 1.442695, %v5953_v25 }
 0x2db   : > { %v5989_v31 = vmul.f32 1.442695, %v5955_v17  ;;  %v5987_v6 = vmul.f32 1.442695, %v5954_v62 }
 0x2dc   : > { %v5991_v10 = vmul.f32 1.442695, %v5956_v29  ;;  %6908 = vpow2.f32 %v5985_v30 }
 0x2dd   : > { %6910 = vpow2.f32 %v5989_v31 }
 0x2de   : > { %6912 = vpow2.f32 %v5987_v6 }
 0x2df   : > { %6914 = vpow2.f32 %v5991_v10 }
 0x2e6   : > { %v5025_v33 = vpop.f32.mrb[130].mxu0  ;;  %v6909_v1 = vpop.eup %6908 }
 0x2e7   : > { %v5026_v15 = vadd.f32 %v5025_v33, %v8409_v14  ;;  %v5096_v34 = vpop.f32.mrb[130].mxu1  ;;  %v5027_v36 = vpop.f32.mrb[131].mxu0  ;;  %v6049_v37 = vadd.f32 1.0, %v6909_v1 }
 0x2e8   : > { %v6911_v19 = vpop.eup %6910  ;;  %v5097_v38 = vadd.f32 %v5096_v34, %v8409_v14  ;;  %v5028_v39 = vadd.f32 %v5027_v36, %v8409_v14  ;;  %v5098_v11 = vpop.f32.mrb[131].mxu1 }
 0x2e9   : > { %v6913_v4 = vpop.eup %6912  ;;  %v6051_v28 = vadd.f32 1.0, %v6911_v19  ;;  %v5957_v35 = vsub.f32 0.0, %v5026_v15  ;;  %v5099_v40 = vadd.f32 %v5098_v11, %v8409_v14  ;;  %6916 = vrcp.f32 %v6049_v37 }
 0x2ea   : > { %v6915_v24 = vpop.eup %6914  ;;  %v6050_v5 = vadd.f32 1.0, %v6913_v4  ;;  %v5959_v42 = vsub.f32 0.0, %v5097_v38  ;;  %v5958_v44 = vsub.f32 0.0, %v5028_v39 }
 0x2eb   : > { %6918 = vrcp.f32 %v6051_v28  ;;  %v6052_v12 = vadd.f32 1.0, %v6915_v24  ;;  %v5993_v47 = vmul.f32 1.442695, %v5957_v35  ;;  %v5960_v13 = vsub.f32 0.0, %v5099_v40 }
 0x2ec   : > { %6920 = vrcp.f32 %v6050_v5  ;;  %v5997_v18 = vmul.f32 1.442695, %v5959_v42  ;;  %v5995_v46 = vmul.f32 1.442695, %v5958_v44 }
 0x2ed   : > { %6922 = vrcp.f32 %v6052_v12  ;;  %v5999_v8 = vmul.f32 1.442695, %v5960_v13 }
 0x2ee   : > { %6924 = vpow2.f32 %v5993_v47 }
 0x2ef   : > { %6926 = vpow2.f32 %v5997_v18 }
 0x2f0   : > { %6928 = vpow2.f32 %v5995_v46 }
 0x2f1   : > { %6930 = vpow2.f32 %v5999_v8 }
 0x2f3   : > { %v6917_v52 = vpop.eup %6916 }
 0x2f5   : > { %v6919_v27 = vpop.eup %6918 }
 0x2f6   : > { %v6921_v57 = vpop.eup %6920  ;;  %v5167_v3 = vpop.f32.mrb[132].mxu0 }
 0x2f7   : > { %v6923_v45 = vpop.eup %6922  ;;  %v6177_v54 = vcombine.low %v6917_v52, %v6921_v57  ;;  %v5168_v55 = vadd.f32 %v5167_v3, %v8409_v14  ;;  %v5238_v59 = vpop.f32.mrb[132].mxu1 }
 0x2f8   : > { %v5169_v60 = vpop.f32.mrb[133].mxu0  ;;  %v6925_v63 = vpop.eup %6924  ;;  %v6178_v49 = vcombine.low %v6919_v27, %v6923_v45  ;;  %v5239_v53 = vadd.f32 %v5238_v59, %v8409_v14 }
 0x2f9   : > { %v5170_v48 = vadd.f32 %v5169_v60, %v8409_v14  ;;  %v5240_v43 = vpop.f32.mrb[133].mxu1  ;;  %v6927_v26 = vpop.eup %6926  ;;  %v6187_v61 = vrot.slane %v6177_v54, %v8420_v20  ;;  %v6053_v2 = vadd.f32 1.0, %v6925_v63  ;;  %v5961_v41 = vsub.f32 0.0, %v5168_v55 }
 0x2fa   : > { %v5241_v0 = vadd.f32 %v5240_v43, %v8409_v14  ;;  %v6929_v16 = vpop.eup %6928  ;;  %v6194_v32 = vrot.slane %v6178_v49, %v8420_v20  ;;  %v6055_v56 = vadd.f32 1.0, %v6927_v26  ;;  %v5963_v22 = vsub.f32 0.0, %v5239_v53 }
 0x2fb   : > { %v5962_v7 = vsub.f32 0.0, %v5170_v48  ;;  %v6931_v9 = vpop.eup %6930  ;;  %6932 = vrcp.f32 %v6053_v2  ;;  %v6054_v58 = vadd.f32 1.0, %v6929_v16  ;;  %v6001_v21 = vmul.f32 1.442695, %v5961_v41 }
 0x2fc   : > { %v5964_v25 = vsub.f32 0.0, %v5241_v0  ;;  %v6209_v17 = vcombine.low %v6187_v61, %v6194_v32  ;;  %6934 = vrcp.f32 %v6055_v56  ;;  %v6056_v62 = vadd.f32 1.0, %v6931_v9 }
 0x2fd   : > { %v6005_v29 = vmul.f32 1.442695, %v5963_v22  ;;  %6936 = vrcp.f32 %v6054_v58  ;;  %v6003_v30 = vmul.f32 1.442695, %v5962_v7 }
 0x2fe   : > { %6938 = vrcp.f32 %v6056_v62  ;;  %v6007_v31 = vmul.f32 1.442695, %v5964_v25  ;;  %v6217_v3 = vrot.slane %v6209_v17, %v8420_v20 }
 0x2ff   : > { %6940 = vpow2.f32 %v6001_v21 }
 0x300   : > { %6942 = vpow2.f32 %v6005_v29 }
 0x301   : > { %6944 = vpow2.f32 %v6003_v30 }
 0x302   : > { %6946 = vpow2.f32 %v6007_v31 }
 0x305   : > { %v6933_v6 = vpop.eup %6932 }
 0x306   : > { %v6935_v10 = vpop.eup %6934  ;;  %v5309_v33 = vpop.f32.mrb[134].mxu0 }
 0x307   : > { %v6937_v1 = vpop.eup %6936  ;;  %v5310_v15 = vadd.f32 %v5309_v33, %v8409_v14  ;;  %v5380_v34 = vpop.f32.mrb[134].mxu1 }
 0x308   : > { %v5311_v36 = vpop.f32.mrb[135].mxu0  ;;  %v6939_v19 = vpop.eup %6938  ;;  %v6179_v37 = vcombine.low %v6933_v6, %v6937_v1  ;;  %v5381_v38 = vadd.f32 %v5380_v34, %v8409_v14 }
 0x309   : > { %v5312_v39 = vadd.f32 %v5311_v36, %v8409_v14  ;;  %v5382_v11 = vpop.f32.mrb[135].mxu1  ;;  %v6941_v4 = vpop.eup %6940  ;;  %v6180_v28 = vcombine.low %v6935_v10, %v6939_v19  ;;  %v5965_v35 = vsub.f32 0.0, %v5310_v15 }
 0x30a   : > { %v5383_v40 = vadd.f32 %v5382_v11, %v8409_v14  ;;  %v6943_v24 = vpop.eup %6942  ;;  %v6201_v5 = vrot.slane %v6179_v37, %v8420_v20  ;;  %v6057_v42 = vadd.f32 1.0, %v6941_v4  ;;  %v5967_v44 = vsub.f32 0.0, %v5381_v38 }
 0x30b   : > { %v5966_v12 = vsub.f32 0.0, %v5312_v39  ;;  %v6945_v47 = vpop.eup %6944  ;;  %v6208_v13 = vrot.slane %v6180_v28, %v8420_v20  ;;  %v6059_v18 = vadd.f32 1.0, %v6943_v24  ;;  %v6009_v8 = vmul.f32 1.442695, %v5965_v35 }
 0x30c   : > { %v5968_v46 = vsub.f32 0.0, %v5383_v40  ;;  %v6947_v50 = vpop.eup %6946  ;;  %6948 = vrcp.f32 %v6057_v42  ;;  %v6058_v51 = vadd.f32 1.0, %v6945_v47  ;;  %v6013_v27 = vmul.f32 1.442695, %v5967_v44 }
 0x30d   : > { %v6210_v23 = vcombine.low %v6201_v5, %v6208_v13  ;;  %6950 = vrcp.f32 %v6059_v18  ;;  %v6060_v52 = vadd.f32 1.0, %v6947_v50  ;;  %v6011_v57 = vmul.f32 1.442695, %v5966_v12 }
 0x30e   : > { %6952 = vrcp.f32 %v6058_v51  ;;  %v6015_v54 = vmul.f32 1.442695, %v5968_v46 }
 0x30f   : > { %v6224_v45 = vrot.slane %v6210_v23, %v8420_v20  ;;  %6954 = vrcp.f32 %v6060_v52 }
 0x310   : > { %6956 = vpow2.f32 %v6009_v8 }
 0x311   : > { %v6225_v55 = vcombine.low %v6217_v3, %v6224_v45  ;;  %6958 = vpow2.f32 %v6013_v27 }
 0x312   : > { %6960 = vpow2.f32 %v6011_v57 }
 0x313   : > { %6377 = vst [vmem:[%s8440_s25] sm:$0xff] %v6225_v55  ;;  %6962 = vpow2.f32 %v6015_v54 }
 0x316   : > { %v6949_v59 = vpop.eup %6948  ;;  %v5451_v60 = vpop.f32.mrb[136].mxu0 }
 0x317   : > { %v6951_v63 = vpop.eup %6950  ;;  %v5452_v49 = vadd.f32 %v5451_v60, %v8409_v14  ;;  %v5522_v53 = vpop.f32.mrb[136].mxu1 }
 0x318   : > { %v5453_v48 = vpop.f32.mrb[137].mxu0  ;;  %v6953_v43 = vpop.eup %6952  ;;  %v5523_v26 = vadd.f32 %v5522_v53, %v8409_v14 }
 0x319   : > { %v5454_v61 = vadd.f32 %v5453_v48, %v8409_v14  ;;  %v5524_v2 = vpop.f32.mrb[137].mxu1  ;;  %v6955_v41 = vpop.eup %6954  ;;  %v6226_v0 = vcombine.low %v6949_v59, %v6953_v43  ;;  %v5969_v16 = vsub.f32 0.0, %v5452_v49 }
 0x31a   : > { %v5525_v32 = vadd.f32 %v5524_v2, %v8409_v14  ;;  %v6957_v56 = vpop.eup %6956  ;;  %v6227_v22 = vcombine.low %v6951_v63, %v6955_v41  ;;  %v5971_v7 = vsub.f32 0.0, %v5523_v26 }
 0x31b   : > { %v6959_v9 = vpop.eup %6958  ;;  %v6236_v58 = vrot.slane %v6226_v0, %v8420_v20  ;;  %v6061_v21 = vadd.f32 1.0, %v6957_v56  ;;  %v5970_v25 = vsub.f32 0.0, %v5454_v61  ;;  %v6017_v10 = vmul.f32 1.442695, %v5969_v16 }
 0x31c   : > { %v6961_v17 = vpop.eup %6960  ;;  %v6243_v62 = vrot.slane %v6227_v22, %v8420_v20  ;;  %v6063_v29 = vadd.f32 1.0, %v6959_v9  ;;  %v5972_v30 = vsub.f32 0.0, %v5525_v32  ;;  %v6021_v15 = vmul.f32 1.442695, %v5971_v7 }
 0x31d   : > { %v6963_v31 = vpop.eup %6962  ;;  %6964 = vrcp.f32 %v6061_v21  ;;  %v6062_v6 = vadd.f32 1.0, %v6961_v17  ;;  %v6019_v34 = vmul.f32 1.442695, %v5970_v25 }
 0x31e   : > { %v6258_v33 = vcombine.low %v6236_v58, %v6243_v62  ;;  %6966 = vrcp.f32 %v6063_v29  ;;  %v6064_v1 = vadd.f32 1.0, %v6963_v31  ;;  %v6023_v36 = vmul.f32 1.442695, %v5972_v30 }
 0x31f   : > { %6968 = vrcp.f32 %v6062_v6 }
 0x320   : > { %6970 = vrcp.f32 %v6064_v1  ;;  %v6266_v53 = vrot.slane %v6258_v33, %v8420_v20 }
 0x321   : > { %6972 = vpow2.f32 %v6017_v10 }
 0x322   : > { %6974 = vpow2.f32 %v6021_v15 }
 0x323   : > { %6976 = vpow2.f32 %v6019_v34 }
 0x324   : > { %6978 = vpow2.f32 %v6023_v36 }
 0x326   : > { %v5593_v19 = vpop.f32.mrb[138].mxu0 }
 0x327   : > { %v6965_v37 = vpop.eup %6964  ;;  %v5594_v38 = vadd.f32 %v5593_v19, %v8409_v14  ;;  %v5664_v39 = vpop.f32.mrb[138].mxu1 }
 0x328   : > { %v5595_v11 = vpop.f32.mrb[139].mxu0  ;;  %v6967_v4 = vpop.eup %6966  ;;  %v5665_v28 = vadd.f32 %v5664_v39, %v8409_v14 }
 0x329   : > { %v5596_v35 = vadd.f32 %v5595_v11, %v8409_v14  ;;  %v5666_v40 = vpop.f32.mrb[139].mxu1  ;;  %v6969_v24 = vpop.eup %6968  ;;  %v5973_v5 = vsub.f32 0.0, %v5594_v38 }
 0x32a   : > { %v5667_v42 = vadd.f32 %v5666_v40, %v8409_v14  ;;  %v6971_v44 = vpop.eup %6970  ;;  %v6228_v12 = vcombine.low %v6965_v37, %v6969_v24  ;;  %v5975_v47 = vsub.f32 0.0, %v5665_v28 }
 0x32b   : > { %v6973_v13 = vpop.eup %6972  ;;  %v6229_v18 = vcombine.low %v6967_v4, %v6971_v44  ;;  %v6025_v46 = vmul.f32 1.442695, %v5973_v5  ;;  %v5974_v50 = vsub.f32 0.0, %v5596_v35 }
 0x32c   : > { %v6975_v51 = vpop.eup %6974  ;;  %v6250_v8 = vrot.slane %v6228_v12, %v8420_v20  ;;  %v6065_v23 = vadd.f32 1.0, %v6973_v13  ;;  %v5976_v52 = vsub.f32 0.0, %v5667_v42  ;;  %v6029_v55 = vmul.f32 1.442695, %v5975_v47 }
 0x32d   : > { %v6977_v27 = vpop.eup %6976  ;;  %v6257_v57 = vrot.slane %v6229_v18, %v8420_v20  ;;  %v6067_v3 = vadd.f32 1.0, %v6975_v51  ;;  %6980 = vpow2.f32 %v6025_v46  ;;  %v6027_v63 = vmul.f32 1.442695, %v5974_v50 }
 0x32e   : > { %v6979_v45 = vpop.eup %6978  ;;  %6982 = vrcp.f32 %v6065_v23  ;;  %v6066_v54 = vadd.f32 1.0, %v6977_v27  ;;  %v6031_v49 = vmul.f32 1.442695, %v5976_v52 }
 0x32f   : > { %v6259_v59 = vcombine.low %v6250_v8, %v6257_v57  ;;  %6984 = vrcp.f32 %v6067_v3  ;;  %v6068_v60 = vadd.f32 1.0, %v6979_v45 }
 0x330   : > { %6986 = vrcp.f32 %v6066_v54 }
 0x331   : > { %v6273_v48 = vrot.slane %v6259_v59, %v8420_v20  ;;  %6988 = vrcp.f32 %v6068_v60 }
 0x332   : > { %6990 = vpow2.f32 %v6029_v55 }
 0x333   : > { %v6274_v43 = vcombine.low %v6266_v53, %v6273_v48  ;;  %6992 = vpow2.f32 %v6027_v63 }
 0x334   : > { %6994 = vpow2.f32 %v6031_v49 }
 0x335   : > { %6378 = vst [vmem:[%s8440_s25 + $0x8] sm:$0xff] %v6274_v43 }
 0x336   : > { %v5735_v26 = vpop.f32.mrb[140].mxu0 }
 0x337   : > { %v6981_v61 = vpop.eup %6980  ;;  %v5736_v2 = vadd.f32 %v5735_v26, %v8409_v14  ;;  %v5806_v41 = vpop.f32.mrb[140].mxu1 }
 0x338   : > { %v5737_v0 = vpop.f32.mrb[141].mxu0  ;;  %v6983_v16 = vpop.eup %6982  ;;  %v6069_v32 = vadd.f32 1.0, %v6981_v61  ;;  %v5807_v56 = vadd.f32 %v5806_v41, %v8409_v14 }
 0x339   : > { %v5738_v22 = vadd.f32 %v5737_v0, %v8409_v14  ;;  %v5808_v7 = vpop.f32.mrb[141].mxu1  ;;  %v6985_v9 = vpop.eup %6984  ;;  %v5977_v58 = vsub.f32 0.0, %v5736_v2 }
 0x33a   : > { %v5809_v21 = vadd.f32 %v5808_v7, %v8409_v14  ;;  %v6987_v25 = vpop.eup %6986  ;;  %v5979_v17 = vsub.f32 0.0, %v5807_v56  ;;  %6996 = vrcp.f32 %v6069_v32 }
 0x33b   : > { %v5978_v62 = vsub.f32 0.0, %v5738_v22  ;;  %v6989_v29 = vpop.eup %6988  ;;  %v6275_v30 = vcombine.low %v6983_v16, %v6987_v25  ;;  %v6033_v31 = vmul.f32 1.442695, %v5977_v58 }
 0x33c   : > { %v5980_v6 = vsub.f32 0.0, %v5809_v21  ;;  %v6991_v10 = vpop.eup %6990  ;;  %v6276_v33 = vcombine.low %v6985_v9, %v6989_v29  ;;  %v6037_v1 = vmul.f32 1.442695, %v5979_v17 }
 0x33d   : > { %v6993_v15 = vpop.eup %6992  ;;  %v6285_v34 = vrot.slane %v6275_v30, %v8420_v20  ;;  %v6071_v36 = vadd.f32 1.0, %v6991_v10  ;;  %6998 = vpow2.f32 %v6033_v31  ;;  %v6035_v39 = vmul.f32 1.442695, %v5978_v62 }
 0x33e   : > { %v6995_v19 = vpop.eup %6994  ;;  %v6292_v37 = vrot.slane %v6276_v33, %v8420_v20  ;;  %v6070_v38 = vadd.f32 1.0, %v6993_v15  ;;  %7000 = vpow2.f32 %v6037_v1  ;;  %v6039_v4 = vmul.f32 1.442695, %v5980_v6 }
 0x33f   : > { %7002 = vrcp.f32 %v6071_v36  ;;  %v6072_v11 = vadd.f32 1.0, %v6995_v19 }
 0x340   : > { %v6307_v28 = vcombine.low %v6285_v34, %v6292_v37  ;;  %7004 = vrcp.f32 %v6070_v38 }
 0x341   : > { %7006 = vrcp.f32 %v6072_v11 }
 0x342   : > { %7008 = vpow2.f32 %v6035_v39  ;;  %v6315_v41 = vrot.slane %v6307_v28, %v8420_v20 }
 0x343   : > { %7010 = vpow2.f32 %v6039_v4 }
 0x344   : > { %v6997_v35 = vpop.eup %6996 }
 0x346   : > { %v5877_v40 = vpop.f32.mrb[142].mxu0  ;;  %v5948_v24 = vpop.f32.mrb[142].mxu1 }
 0x347   : > { %v6999_v5 = vpop.eup %6998  ;;  %v5878_v42 = vadd.f32 %v5877_v40, %v8409_v14  ;;  %v5949_v44 = vadd.f32 %v5948_v24, %v8409_v14  ;;  %v5879_v12 = vpop.f32.mrb[143].mxu0 }
 0x348   : > { %v5950_v47 = vpop.f32.mrb[143].mxu1  ;;  %v7001_v13 = vpop.eup %7000  ;;  %v6073_v18 = vadd.f32 1.0, %v6999_v5  ;;  %v5880_v46 = vadd.f32 %v5879_v12, %v8409_v14 }
 0x349   : > { %v5951_v50 = vadd.f32 %v5950_v47, %v8409_v14  ;;  %v7003_v51 = vpop.eup %7002  ;;  %v6075_v8 = vadd.f32 1.0, %v7001_v13  ;;  %v5981_v23 = vsub.f32 0.0, %v5878_v42  ;;  %v5983_v52 = vsub.f32 0.0, %v5949_v44 }
 0x34a   : > { %v7005_v27 = vpop.eup %7004  ;;  %v5982_v57 = vsub.f32 0.0, %v5880_v46  ;;  %7012 = vrcp.f32 %v6073_v18 }
 0x34b   : > { %v5984_v3 = vsub.f32 0.0, %v5951_v50  ;;  %v7007_v45 = vpop.eup %7006  ;;  %v6277_v54 = vcombine.low %v6997_v35, %v7005_v27  ;;  %v6041_v55 = vmul.f32 1.442695, %v5981_v23  ;;  %v6045_v59 = vmul.f32 1.442695, %v5983_v52 }
 0x34c   : > { %v7009_v60 = vpop.eup %7008  ;;  %v6278_v63 = vcombine.low %v7003_v51, %v7007_v45  ;;  %7014 = vrcp.f32 %v6075_v8  ;;  %v6043_v14 = vmul.f32 1.442695, %v5982_v57 }
 0x34d   : > { %v7011_v49 = vpop.eup %7010  ;;  %v6299_v53 = vrot.slane %v6277_v54, %v8420_v20  ;;  %v6074_v48 = vadd.f32 1.0, %v7009_v60  ;;  %7016 = vpow2.f32 %v6041_v55  ;;  %v6047_v61 = vmul.f32 1.442695, %v5984_v3 }
 0x34e   : > { %v6306_v43 = vrot.slane %v6278_v63, %v8420_v20  ;;  %v6076_v26 = vadd.f32 1.0, %v7011_v49  ;;  %7018 = vpow2.f32 %v6045_v59 }
 0x34f   : > { %7020 = vrcp.f32 %v6074_v48 }
 0x350   : > { %v6308_v2 = vcombine.low %v6299_v53, %v6306_v43  ;;  %7022 = vrcp.f32 %v6076_v26 }
 0x351   : > { %7024 = vpow2.f32 %v6043_v14 }
 0x352   : > { %v6322_v0 = vrot.slane %v6308_v2, %v8420_v20  ;;  %7026 = vpow2.f32 %v6047_v61 }
 0x354   : > { %v6323_v16 = vcombine.low %v6315_v41, %v6322_v0  ;;  %v7013_v32 = vpop.eup %7012 }
 0x356   : > { %v7015_v56 = vpop.eup %7014  ;;  %6379 = vst [vmem:[%s8440_s25 + $0x10] sm:$0xff] %v6323_v16 }
 0x357   : > { %v7017_v22 = vpop.eup %7016 }
 0x358   : > { %v7019_v7 = vpop.eup %7018  ;;  %v6077_v9 = vadd.f32 1.0, %v7017_v22 }
 0x359   : > { %v7021_v58 = vpop.eup %7020  ;;  %v6079_v21 = vadd.f32 1.0, %v7019_v7 }
 0x35a   : > { %v7023_v25 = vpop.eup %7022  ;;  %v6324_v17 = vcombine.low %v7013_v32, %v7021_v58  ;;  %7028 = vrcp.f32 %v6077_v9 }
 0x35b   : > { %v7025_v62 = vpop.eup %7024  ;;  %v6325_v29 = vcombine.low %v7015_v56, %v7023_v25  ;;  %7030 = vrcp.f32 %v6079_v21 }
 0x35c   : > { %v7027_v30 = vpop.eup %7026  ;;  %v6334_v31 = vrot.slane %v6324_v17, %v8420_v20  ;;  %v6078_v6 = vadd.f32 1.0, %v7025_v62 }
 0x35d   : > { %v6341_v10 = vrot.slane %v6325_v29, %v8420_v20  ;;  %v6080_v33 = vadd.f32 1.0, %v7027_v30 }
 0x35e   : > { %7032 = vrcp.f32 %v6078_v6 }
 0x35f   : > { %v6356_v1 = vcombine.low %v6334_v31, %v6341_v10  ;;  %7034 = vrcp.f32 %v6080_v33 }
 0x361   : > { %v6364_v28 = vrot.slane %v6356_v1, %v8420_v20 }
 0x364   : > { %v7029_v15 = vpop.eup %7028 }
 0x365   : > { %v7031_v34 = vpop.eup %7030 }
 0x368   : > { %v7033_v36 = vpop.eup %7032 }
 0x369   : > { %v7035_v19 = vpop.eup %7034  ;;  %v6326_v37 = vcombine.low %v7029_v15, %v7033_v36 }
 0x36a   : > { %v6327_v38 = vcombine.low %v7031_v34, %v7035_v19 }
 0x36b   : > { %v6348_v39 = vrot.slane %v6326_v37, %v8420_v20 }
 0x36c   : > { %v6355_v11 = vrot.slane %v6327_v38, %v8420_v20 }
 0x36e   : > { %v6357_v4 = vcombine.low %v6348_v39, %v6355_v11 }
 0x370   : > { %v6371_v35 = vrot.slane %v6357_v4, %v8420_v20 }
 0x372   : > { %v6372_v40 = vcombine.low %v6364_v28, %v6371_v35 }
 0x374   : > { %6380 = vst [vmem:[%s8440_s25 + $0x18] sm:$0xff] %v6372_v40 }
 0x375 PF: > { %s19_s26 = sadd.s32 1, %s7046_s26  }
 0x376   : > { %p16_p4 = scmp.ge.s32.totalorder %s19_s26, 4  }
 0x378   :  { %18 = sbr.rel (!%p16_p4) target bundleno = 3 (0x3), region = 81 }

</bundles_post_ra>
